<compile_context>
chip_gen: v7x
topology: tpu7x:2x2x1
jax: 0.10.0
libtpu: 0.0.40
codegen_flags: <defaults>
</compile_context>

<pallas_src>
import jax
import jax.numpy as jnp
from jax.experimental import pallas as pl
from jax.experimental.pallas import tpu as pltpu

# Module constants fixed by the spec: nn.AvgPool2d(kernel_size=8, stride=6, padding=2)
POOL_K = 8
POOL_S = 6
POOL_P = 2
LANE = 128            # TPU lane width
MAX_BATCH_TILE = 128  # rows per grid step for large batches (multiple of 8)


def _round_up(x, m):
    return (x + m - 1) // m * m


# ----------------------------- Pallas kernel --------------------------------

def _reshead_kernel(x_ref, w_ref, b_ref, o_ref):
    """Bias-fused matmul: the whole ResHead for one batch tile.

    x_ref : (TB, K)   raw NCHW-flattened activations (bf16 or f32)
    w_ref : (K,  NP)  pool-folded Linear weight (lane-padded classes)
    b_ref : (1,  NP)  bias (f32, lane-padded)
    o_ref : (TB, NP)  logits (f32, lane-padded -> unmasked lane-dense stores)
    """
    acc = jnp.dot(x_ref[...], w_ref[...], preferred_element_type=jnp.float32)
    o_ref[...] = (acc + b_ref[...]).astype(o_ref.dtype)


# ---------------------- weight preparation (pool fold) -----------------------

def fold_pool_into_linear(w_lin, b_lin, C, H, W, weight_dtype=jnp.bfloat16):
    """Fold AvgPool2d(8, 6, 2, count_include_pad=True) + NCHW .view(-1, 512)
    into the Linear weight.  Returns (Weff[(c,h,w), NP], bias[1, NP]).

    # TODO(synk): in production, run this once at parameter-init time (it is a
    # pure reparameterization of the Linear weight), not on every forward call.
    """
    OH = (H + 2 * POOL_P - POOL_K) // POOL_S + 1
    OW = (W + 2 * POOL_P - POOL_K) // POOL_S + 1
    in_feat, classes = w_lin.shape
    assert in_feat == C * OH * OW, (in_feat, C, OH, OW)   # .view(-1, 512) must line up

    # w_lin rows are in NCHW-flatten order: c*OH*OW + oh*OW + ow.
    w4 = w_lin.astype(jnp.float32).reshape(C, OH, OW, classes)
    weff = jnp.zeros((C, H, W, classes), jnp.float32)
    scale = 1.0 / float(POOL_K * POOL_K)          # count_include_pad=True -> always /64
    for oh in range(OH):
        h0 = oh * POOL_S - POOL_P
        hs, he = max(h0, 0), min(h0 + POOL_K, H)  # zero-padded rows contribute nothing
        for ow in range(OW):
            w0 = ow * POOL_S - POOL_P
            ws, we = max(w0, 0), min(w0 + POOL_K, W)
            weff = weff.at[:, hs:he, ws:we, :].add(
                scale * w4[:, oh, ow, :][:, None, None, :])

    np_lanes = _round_up(max(classes, LANE), LANE)
    weff = jnp.pad(weff.reshape(C * H * W, classes),
                   ((0, 0), (0, np_lanes - classes))).astype(weight_dtype)
    b_pad = jnp.pad(b_lin.astype(jnp.float32),
                    (0, np_lanes - classes)).reshape(1, np_lanes)
    return weff, b_pad


# -------------------------------- wrapper ------------------------------------

def reshead_matmul(x_nchw, weff, b_pad):
    """Single-pass fused ResHead on the raw NCHW activation."""
    N, C, H, W = x_nchw.shape
    K, NP = weff.shape
    assert K == C * H * W, (K, C, H, W)

    x2d = x_nchw.reshape(N, K)     # contiguous NCHW flatten: free bitcast, no HBM pass

    # Batch tile: whole batch for small N (clean single block), else 128 rows.
    TB = N if N <= MAX_BATCH_TILE else MAX_BATCH_TILE
    grid_b = pl.cdiv(N, TB)

    # Double-buffered footprint (x block + weight + output + bias) + 25% headroom,
    # never below the 32 MiB default, capped safely under v7x's 64 MiB physical.
    vmem_need = (2 * TB * K * x2d.dtype.itemsize
                 + 2 * K * NP * weff.dtype.itemsize
                 + 2 * TB * NP * 4 + 2 * NP * 4)
    vmem_limit = int(min(max(vmem_need + vmem_need // 4, 32 * 1024 * 1024),
                         48 * 1024 * 1024))

    return pl.pallas_call(
        _reshead_kernel,
        out_shape=jax.ShapeDtypeStruct((N, NP), jnp.float32),
        grid=(grid_b,),
        in_specs=[
            pl.BlockSpec((TB, K), lambda i: (i, 0)),
            pl.BlockSpec((K, NP), lambda i: (0, 0)),   # constant block -> VMEM-resident
            pl.BlockSpec((1, NP), lambda i: (0, 0)),
        ],
        out_specs=pl.BlockSpec((TB, NP), lambda i: (i, 0)),
        compiler_params=pltpu.CompilerParams(
            dimension_semantics=("parallel",),
            vmem_limit_bytes=vmem_limit),
    )(x2d, weff, b_pad)


def reshead_forward(x_nchw, w_lin, b_lin):
    """PyTorch ResHead forward.  x: NCHW, w_lin: (512, classes), b_lin: (classes,)."""
    N, C, H, W = x_nchw.shape
    classes = w_lin.shape[1]
    weff, b_pad = fold_pool_into_linear(w_lin, b_lin, C, H, W,
                                        weight_dtype=x_nchw.dtype)
    out = reshead_matmul(x_nchw, weff, b_pad)
    return out[:, :classes]


# ------------------------- pure-JAX reference (check) ------------------------

def reshead_reference(x_nchw, w_lin, b_lin):
    x = x_nchw.astype(jnp.float32)
    xp = jnp.pad(x, ((0, 0), (0, 0), (POOL_P, POOL_P), (POOL_P, POOL_P)))
    s = jax.lax.reduce_window(xp, jnp.float32(0), jax.lax.add,
                              window_dimensions=(1, 1, POOL_K, POOL_K),
                              window_strides=(1, 1, POOL_S, POOL_S),
                              padding="VALID")
    pooled = s / float(POOL_K * POOL_K)        # count_include_pad=True
    flat = pooled.reshape(-1, w_lin.shape[0])  # NCHW .view(-1, 512)
    return flat @ w_lin + b_lin


# ---------------------------------- main --------------------------------------

if __name__ == "__main__":
    num_classes = 10
    key = jax.random.PRNGKey(0)
    kx, kw_, kb_ = jax.random.split(key, 3)

    # Backbone feature map feeding ResHead: (N, 128, 10, 10) -> pool -> (N,128,2,2)
    # -> view -> (N, 512) -> Linear(512, 10).  Activations arrive bf16 (production
    # path: halves HBM traffic of the dominant stream); accumulation is f32.
    x = jax.random.normal(kx, (2, 128, 10, 10), jnp.float32).astype(jnp.bfloat16)
    w_lin = jax.random.normal(kw_, (512, num_classes), jnp.float32) * 0.02
    b_lin = jax.random.normal(kb_, (num_classes,), jnp.float32) * 0.02

    fwd = jax.jit(reshead_forward)
    y = fwd(x, w_lin, b_lin)
    jax.block_until_ready(y)

    y_ref = jax.jit(reshead_reference)(x, w_lin, b_lin)
    assert y.shape == (2, num_classes), y.shape
    assert bool(jnp.all(jnp.isfinite(y)))
    max_err = float(jnp.max(jnp.abs(y - y_ref)))
    # bf16 activations/weights with f32 accumulation vs. pure-f32 reference.
    assert max_err < 5e-3, max_err
    print("KERNEL_OK")
</pallas_src>

<mosaic_0001>
module attributes {stable_mosaic.version = 11 : i64} {
  func.func @_reshead_kernel(%arg0: i32, %arg1: memref<2x12800xbf16, #tpu.memory_space<vmem>>, %arg2: memref<12800x128xbf16, #tpu.memory_space<vmem>>, %arg3: memref<1x128xf32, #tpu.memory_space<vmem>>, %arg4: memref<2x128xf32, #tpu.memory_space<vmem>>) attributes {dimension_semantics = [#tpu.dimension_semantics<parallel>], iteration_bounds = array<i64: 1>, scalar_prefetch = 0 : i64, scratch_operands = 0 : i64, tpu.core_type = #tpu.core_type<tc>, window_params = [{transform_indices = @transform_0, window_bounds = array<i64: 2, 12800>}, {pipeline_mode = #tpu.pipeline_mode<synchronous>, transform_indices = @transform_1, window_bounds = array<i64: 12800, 128>}, {pipeline_mode = #tpu.pipeline_mode<synchronous>, transform_indices = @transform_2, window_bounds = array<i64: 1, 128>}, {transform_indices = @transform_3, window_bounds = array<i64: 2, 128>}]} {
    %c0 = arith.constant 0 : index
    %c0_0 = arith.constant 0 : index
    %0 = vector.load %arg1[%c0, %c0_0] : memref<2x12800xbf16, #tpu.memory_space<vmem>>, vector<2x12800xbf16>
    %c0_1 = arith.constant 0 : index
    %c0_2 = arith.constant 0 : index
    %1 = vector.load %arg2[%c0_1, %c0_2] : memref<12800x128xbf16, #tpu.memory_space<vmem>>, vector<12800x128xbf16>
    %cst = arith.constant dense<0.000000e+00> : vector<2x128xf32>
    %2 = tpu.matmul %0, %1, %cst {dimension_numbers = #tpu.dot_dimension_numbers<[1], [0], [0], [1], [0, 0, 1, 1], [], []>} : vector<2x12800xbf16>, vector<12800x128xbf16>, vector<2x128xf32> -> vector<2x128xf32>
    %c0_3 = arith.constant 0 : index
    %c0_4 = arith.constant 0 : index
    %3 = vector.load %arg3[%c0_3, %c0_4] : memref<1x128xf32, #tpu.memory_space<vmem>>, vector<1x128xf32>
    %4 = vector.broadcast %3 : vector<1x128xf32> to vector<2x128xf32>
    %5 = arith.addf %2, %4 : vector<2x128xf32>
    %c0_5 = arith.constant 0 : index
    %c0_6 = arith.constant 0 : index
    %6 = vector.load %arg4[%c0_5, %c0_6] : memref<2x128xf32, #tpu.memory_space<vmem>>, vector<2x128xf32>
    tpu.vector_store %arg4[%c0_5, %c0_6], %5 {strides = array<i32>} : memref<2x128xf32, #tpu.memory_space<vmem>>, vector<2x128xf32>,
    return
  }
  func.func @transform_0(%arg0: i32) -> (i32, i32) {
    %c0_i32 = arith.constant 0 : i32
    %c0_i32_0 = arith.constant 0 : i32
    return %arg0, %c0_i32 : i32, i32
  }
  func.func @transform_1(%arg0: i32) -> (i32, i32) {
    %c0_i32 = arith.constant 0 : i32
    %c0_i32_0 = arith.constant 0 : i32
    %c0_i32_1 = arith.constant 0 : i32
    return %c0_i32, %c0_i32_0 : i32, i32
  }
  func.func @transform_2(%arg0: i32) -> (i32, i32) {
    %c0_i32 = arith.constant 0 : i32
    %c0_i32_0 = arith.constant 0 : i32
    %c0_i32_1 = arith.constant 0 : i32
    return %c0_i32, %c0_i32_0 : i32, i32
  }
  func.func @transform_3(%arg0: i32) -> (i32, i32) {
    %c0_i32 = arith.constant 0 : i32
    %c0_i32_0 = arith.constant 0 : i32
    return %arg0, %c0_i32 : i32, i32
  }
}

</mosaic_0001>

<bundles_post_ra>
// kernel: reshead_forward.1
= control target key start
LH: loop header
LB: loop body
LE: loop exit
PB: predicated region body
PF: predicated region fallthrough
CT: control target
= control target key end

     0   :  { %v1653_v28 = vlaneseq  ;;  %v11916_v36 = vmov 1966171168   ;;  %s14579_s0 = inlined_call_operand.vmem [shape: bf16[2,12800], index: 0, kind: input, shape index: {}]   ;;  %s14580_s1 = inlined_call_operand.vmem [shape: bf16[12800,128], index: 1, kind: input, shape index: {}]   ;;  %s14581_s2 = inlined_call_operand.vmem [shape: f32[1,128], index: 2, kind: input, shape index: {}]   ;;  %s14582_s3 = inlined_call_operand.hbm [shape: f32[2,128], index: 3, kind: output, shape index: {}]  }
   0x1   :  { %v11080_v0 = vld [vmem:[%s14580_s1 + $0x40] sm:$0xff]   ;;  %v11084_v4 = vld [vmem:[%s14580_s1 + $0x48] sm:$0xff]   ;;  %v11088_v8 = vld [vmem:[%s14580_s1 + $0x50] sm:$0xff]   ;;  %v1651_v37 = vunpack.c.l.s4 %v11916_v36 }
   0x2   :  { %v11081_v1 = vld [vmem:[%s14580_s1 + $0xc0] sm:$0xff]   ;;  %9978 = vmatprep.subr.bf16.mxu0 %v11080_v0  ;;  %v11085_v5 = vld [vmem:[%s14580_s1 + $0xc8] sm:$0xff]   ;;  %v11089_v9 = vld [vmem:[%s14580_s1 + $0xd0] sm:$0xff]   ;;  %v1654_v33 = vshrl.u32 %v1653_v28, 7 }
   0x3   :  { %v11082_v2 = vld [vmem:[%s14580_s1] sm:$0xff]   ;;  %10000 = vmatprep.subr.bf16.mxu1 %v11081_v1  ;;  %v11086_v6 = vld [vmem:[%s14580_s1 + $0x8] sm:$0xff]   ;;  %v11090_v10 = vld [vmem:[%s14580_s1 + $0x10] sm:$0xff]   ;;  %v1652_v40 = vunpack.c.0.s8 %v1651_v37 }
   0x4   :  { %v11083_v3 = vld [vmem:[%s14580_s1 + $0x80] sm:$0xff]   ;;  %9979 = vmatpush3.bf16.msra.mxu0 %v11082_v2  ;;  %v11087_v7 = vld [vmem:[%s14580_s1 + $0x88] sm:$0xff]   ;;  %v11091_v11 = vld [vmem:[%s14580_s1 + $0x90] sm:$0xff]  }
   0x5   :  { %10001 = vmatpush3.bf16.msra.mxu1 %v11083_v3  ;;  %9980 = vmatprep.subr.bf16.mxu0 %v11084_v4  ;;  %v11092_v12 = vld [vmem:[%s14580_s1 + $0x58] sm:$0xff]   ;;  %v11096_v16 = vld [vmem:[%s14580_s1 + $0x60] sm:$0xff]   ;;  %v11100_v20 = vld [vmem:[%s14580_s1 + $0x68] sm:$0xff]   ;;  %v12043_v41 = vsub.s32 %v1652_v40, %v1654_v33 }
   0x6   :  { %10002 = vmatprep.subr.bf16.mxu1 %v11085_v5  ;;  %v11093_v13 = vld [vmem:[%s14580_s1 + $0xd8] sm:$0xff]   ;;  %v11097_v17 = vld [vmem:[%s14580_s1 + $0xe0] sm:$0xff]   ;;  %v11101_v21 = vld [vmem:[%s14580_s1 + $0xe8] sm:$0xff]  }
   0x7   :  { %v11094_v14 = vld [vmem:[%s14580_s1 + $0x18] sm:$0xff]   ;;  %v11098_v18 = vld [vmem:[%s14580_s1 + $0x20] sm:$0xff]   ;;  %v11102_v22 = vld [vmem:[%s14580_s1 + $0x28] sm:$0xff]  }
   0x8   :  { %9981 = vmatpush3.bf16.msra.mxu0 %v11086_v6  ;;  %v11095_v15 = vld [vmem:[%s14580_s1 + $0x98] sm:$0xff]   ;;  %v11099_v19 = vld [vmem:[%s14580_s1 + $0xa0] sm:$0xff]   ;;  %v11103_v23 = vld [vmem:[%s14580_s1 + $0xa8] sm:$0xff]  }
   0x9   :  { %10003 = vmatpush3.bf16.msra.mxu1 %v11087_v7  ;;  %9982 = vmatprep.subr.bf16.mxu0 %v11088_v8  ;;  %v11104_v24 = vld [vmem:[%s14580_s1 + $0x70] sm:$0xff]   ;;  %v11108_v29 = vld [vmem:[%s14580_s1 + $0x78] sm:$0xff]   ;;  %v16_v34 = vld [vmem:[%s14579_s0] sm:$0xff] }
   0xa   :  { %10004 = vmatprep.subr.bf16.mxu1 %v11089_v9  ;;  %v11105_v25 = vld [vmem:[%s14580_s1 + $0xf0] sm:$0xff]   ;;  %v11109_v30 = vld [vmem:[%s14580_s1 + $0xf8] sm:$0xff]   ;;  %v11113_v35 = vld [vmem:[%s14580_s1 + $0x140] sm:$0xff]   ;;  %v1649_v39 = vcombine.high %v16_v34, %v16_v34  ;;  %v1656_v42 = vrot.slane %v16_v34, %v12043_v41 }
   0xb   :  { %v11106_v26 = vld [vmem:[%s14580_s1 + $0x30] sm:$0xff]   ;;  %v11110_v31 = vld [vmem:[%s14580_s1 + $0x38] sm:$0xff]   ;;  %v11114_v38 = vld [vmem:[%s14580_s1 + $0x1c0] sm:$0xff]  }
   0xc   :  { %9983 = vmatpush3.bf16.msra.mxu0 %v11090_v10  ;;  %v11107_v27 = vld [vmem:[%s14580_s1 + $0xb0] sm:$0xff]   ;;  %v11111_v32 = vld [vmem:[%s14580_s1 + $0xb8] sm:$0xff]   ;;  %v12047_v43 = vrot.slane %v1649_v39, %v12043_v41  ;;  %v1664_v44 = vcombine.high %v1656_v42, %v1656_v42  ;;  %v1672_v45 = vrot.slane %v1656_v42, %v12043_v41  ;;  %v11115_v47 = vld [vmem:[%s14580_s1 + $0x100] sm:$0xff]  }
   0xd   :  { %10005 = vmatpush3.bf16.msra.mxu1 %v11091_v11  ;;  %9984 = vmatprep.subr.bf16.mxu0 %v11092_v12  ;;  %v11116_v49 = vld [vmem:[%s14580_s1 + $0x180] sm:$0xff]   ;;  %v11117_v52 = vld [vmem:[%s14580_s1 + $0x148] sm:$0xff]   ;;  %v11121_v58 = vld [vmem:[%s14580_s1 + $0x150] sm:$0xff]  }
   0xe   :  { %10006 = vmatprep.subr.bf16.mxu1 %v11093_v13  ;;  %v1665_v46 = vcombine.high %v12047_v43, %v12047_v43  ;;  %v1686_v48 = vrot.slane %v1664_v44, %v12043_v41  ;;  %v1694_v51 = vcombine.high %v1672_v45, %v1672_v45  ;;  %v11118_v54 = vld [vmem:[%s14580_s1 + $0x1c8] sm:$0xff]   ;;  %v11122_v59 = vld [vmem:[%s14580_s1 + $0x1d0] sm:$0xff]   ;;  %v11125_v62 = vld [vmem:[%s14580_s1 + $0x158] sm:$0xff]  }
   0xf   :  { %v11119_v55 = vld [vmem:[%s14580_s1 + $0x108] sm:$0xff]   ;;  %v11123_v60 = vld [vmem:[%s14580_s1 + $0x110] sm:$0xff]   ;;  %v11126_v63 = vld [vmem:[%s14580_s1 + $0x1d8] sm:$0xff]  }
  0x10   :  { %9985 = vmatpush3.bf16.msra.mxu0 %v11094_v14  ;;  %v1693_v50 = vrot.slane %v1665_v46, %v12043_v41  ;;  %7193 = vmatprep.mubr.bf16.mxu0 %v1686_v48  ;;  %v1696_v53 = vcombine.high %v1686_v48, %v1686_v48  ;;  %v11120_v57 = vld [vmem:[%s14580_s1 + $0x188] sm:$0xff]   ;;  %v11124_v61 = vld [vmem:[%s14580_s1 + $0x190] sm:$0xff]   ;;  %v11127_v0 = vld [vmem:[%s14580_s1 + $0x118] sm:$0xff]  }
  0x11   :  { %10007 = vmatpush3.bf16.msra.mxu1 %v11095_v15  ;;  %9986 = vmatprep.subr.bf16.mxu0 %v11096_v16  ;;  %v11128_v1 = vld [vmem:[%s14580_s1 + $0x198] sm:$0xff]   ;;  %v11129_v2 = vld [vmem:[%s14580_s1 + $0x160] sm:$0xff]   ;;  %v11133_v6 = vld [vmem:[%s14580_s1 + $0x168] sm:$0xff]  }
  0x12   :  { %10008 = vmatprep.subr.bf16.mxu1 %v11097_v17  ;;  %v1697_v56 = vcombine.high %v1693_v50, %v1693_v50  ;;  %7233 = vmatprep.mubr.bf16.mxu1 %v1696_v53  ;;  %v11130_v3 = vld [vmem:[%s14580_s1 + $0x1e0] sm:$0xff]   ;;  %v11134_v7 = vld [vmem:[%s14580_s1 + $0x1e8] sm:$0xff]   ;;  %v11137_v10 = vld [vmem:[%s14580_s1 + $0x170] sm:$0xff]  }
  0x13   :  { %v11131_v4 = vld [vmem:[%s14580_s1 + $0x120] sm:$0xff]   ;;  %v11135_v8 = vld [vmem:[%s14580_s1 + $0x128] sm:$0xff]   ;;  %v11138_v11 = vld [vmem:[%s14580_s1 + $0x1f0] sm:$0xff]  }
  0x14   :  { %9987 = vmatpush3.bf16.msra.mxu0 %v11098_v18  ;;  %v11132_v5 = vld [vmem:[%s14580_s1 + $0x1a0] sm:$0xff]   ;;  %v11136_v9 = vld [vmem:[%s14580_s1 + $0x1a8] sm:$0xff]   ;;  %v11139_v12 = vld [vmem:[%s14580_s1 + $0x130] sm:$0xff]   ;;  %v1679_v18 = vrot.slane %v12047_v43, %v12043_v41 }
  0x15   :  { %10009 = vmatpush3.bf16.msra.mxu1 %v11099_v19  ;;  %9988 = vmatprep.subr.bf16.mxu0 %v11100_v20  ;;  %v11140_v13 = vld [vmem:[%s14580_s1 + $0x1b0] sm:$0xff]   ;;  %v11141_v14 = vld [vmem:[%s14580_s1 + $0x178] sm:$0xff]   ;;  %v11145_v19 = vld [vmem:[%s14580_s1 + $0x240] sm:$0xff]  }
  0x16   :  { %10010 = vmatprep.subr.bf16.mxu1 %v11101_v21  ;;  %v11142_v15 = vld [vmem:[%s14580_s1 + $0x1f8] sm:$0xff]   ;;  %v11146_v20 = vld [vmem:[%s14580_s1 + $0x2c0] sm:$0xff]   ;;  %v11153_v28 = vld [vmem:[%s14580_s1 + $0x250] sm:$0xff]  }
  0x17   :  { %v11143_v16 = vld [vmem:[%s14580_s1 + $0x138] sm:$0xff]   ;;  %v11147_v21 = vld [vmem:[%s14580_s1 + $0x200] sm:$0xff]   ;;  %v11165_v40 = vld [vmem:[%s14580_s1 + $0x268] sm:$0xff]  }
  0x18   :  { %9989 = vmatpush3.bf16.msra.mxu0 %v11102_v22  ;;  %v11144_v17 = vld [vmem:[%s14580_s1 + $0x1b8] sm:$0xff]   ;;  %v11148_v22 = vld [vmem:[%s14580_s1 + $0x280] sm:$0xff]   ;;  %v11166_v42 = vld [vmem:[%s14580_s1 + $0x2e8] sm:$0xff]  }
  0x19   :  { %10011 = vmatpush3.bf16.msra.mxu1 %v11103_v23  ;;  %9990 = vmatprep.subr.bf16.mxu0 %v11104_v24  ;;  %v1695_v23 = vcombine.high %v1679_v18, %v1679_v18  ;;  %v11149_v24 = vld [vmem:[%s14580_s1 + $0x248] sm:$0xff]   ;;  %v11158_v33 = vld [vmem:[%s14580_s1 + $0x2d8] sm:$0xff]   ;;  %v11161_v36 = vld [vmem:[%s14580_s1 + $0x260] sm:$0xff]  }
  0x1a   :  { %10012 = vmatprep.subr.bf16.mxu1 %v11105_v25  ;;  %v11150_v25 = vld [vmem:[%s14580_s1 + $0x2c8] sm:$0xff]   ;;  %v11159_v34 = vld [vmem:[%s14580_s1 + $0x218] sm:$0xff]   ;;  %v11162_v37 = vld [vmem:[%s14580_s1 + $0x2e0] sm:$0xff]  }
  0x1b   :  { %v11164_v39 = vld [vmem:[%s14580_s1 + $0x2a0] sm:$0xff]   ;;  %v11167_v43 = vld [vmem:[%s14580_s1 + $0x228] sm:$0xff]  }
  0x1c   :  { %9991 = vmatpush3.bf16.msra.mxu0 %v11106_v26  ;;  %v11151_v26 = vld [vmem:[%s14580_s1 + $0x208] sm:$0xff]  }
  0x1d   :  { %10013 = vmatpush3.bf16.msra.mxu1 %v11107_v27  ;;  %9992 = vmatprep.subr.bf16.mxu0 %v11108_v29  ;;  %v11152_v27 = vld [vmem:[%s14580_s1 + $0x288] sm:$0xff]   ;;  %v11154_v29 = vld [vmem:[%s14580_s1 + $0x2d0] sm:$0xff]  }
  0x1e   :  { %10014 = vmatprep.subr.bf16.mxu1 %v11109_v30  ;;  %v11155_v30 = vld [vmem:[%s14580_s1 + $0x210] sm:$0xff]   ;;  %v11168_v44 = vld [vmem:[%s14580_s1 + $0x2a8] sm:$0xff]  }
  0x1f   :  { %v17_v46 = vld [vmem:[%s14579_s0 + $0x8] sm:$0xff] }
  0x20   :  { %9993 = vmatpush3.bf16.msra.mxu0 %v11110_v31  ;;  %v11156_v31 = vld [vmem:[%s14580_s1 + $0x290] sm:$0xff]   ;;  %v1705_v48 = vrot.slane %v17_v46, %v12043_v41 }
  0x21   :  { %10015 = vmatpush3.bf16.msra.mxu1 %v11111_v32  ;;  %10022 = vmatprep.subr.bf16.mxu0 %v11113_v35  ;;  %v11157_v32 = vld [vmem:[%s14580_s1 + $0x258] sm:$0xff]  }
  0x22   :  { %10044 = vmatprep.subr.bf16.mxu1 %v11114_v38  ;;  %v11160_v35 = vld [vmem:[%s14580_s1 + $0x298] sm:$0xff]   ;;  %v11163_v38 = vld [vmem:[%s14580_s1 + $0x220] sm:$0xff]  }
  0x23   :  { %7194 = vmatmul.mubr.bf16.vlgmr.msra.gmra.mrb[0].mxu0 %v1672_v45  ;;  %v11169_v45 = vld [vmem:[%s14580_s1 + $0x270] sm:$0xff]  }
  0x24   :  { %10023 = vmatpush3.bf16.msra.mxu0 %v11115_v47  ;;  %7234 = vmatmul.mubr.bf16.vlgmr.msra.gmra.mrb[0].mxu1 %v1694_v51  ;;  %v11170_v47 = vld [vmem:[%s14580_s1 + $0x2f0] sm:$0xff]  }
  0x25   :  { %10024 = vmatprep.subr.bf16.mxu0 %v11117_v52  ;;  %10045 = vmatpush3.bf16.msra.mxu1 %v11116_v49  ;;  %v1698_v49 = vcombine.high %v17_v46, %v17_v46  ;;  %v11172_v51 = vld [vmem:[%s14580_s1 + $0x2b0] sm:$0xff]   ;;  %v1713_v52 = vcombine.high %v1705_v48, %v1705_v48 }
  0x26   :  { %7273 = vmatprep.mubr.bf16.mxu0 %v1693_v50  ;;  %10046 = vmatprep.subr.bf16.mxu1 %v11118_v54  ;;  %v11171_v50 = vld [vmem:[%s14580_s1 + $0x230] sm:$0xff]   ;;  %v11173_v54 = vld [vmem:[%s14580_s1 + $0x278] sm:$0xff]  }
  0x27   :  { %7313 = vmatprep.mubr.bf16.mxu1 %v1697_v56  ;;  %v12235_v53 = vrot.slane %v1698_v49, %v12043_v41  ;;  %v1735_v56 = vrot.slane %v1713_v52, %v12043_v41  ;;  %v11220_v46 = vld [vmem:[%s14580_s1 + $0x410] sm:$0xff]   ;;  %v11223_v49 = vld [vmem:[%s14580_s1 + $0x4d8] sm:$0xff]   ;;  %v11226_v52 = vld [vmem:[%s14580_s1 + $0x460] sm:$0xff]  }
  0x28   :  { %10025 = vmatpush3.bf16.msra.mxu0 %v11119_v55  ;;  %v11174_v55 = vld [vmem:[%s14580_s1 + $0x2f8] sm:$0xff]  }
  0x29   :  { %10026 = vmatprep.subr.bf16.mxu0 %v11121_v58  ;;  %10047 = vmatpush3.bf16.msra.mxu1 %v11120_v57  ;;  %v1714_v57 = vcombine.high %v12235_v53, %v12235_v53  ;;  %v11175_v58 = vld [vmem:[%s14580_s1 + $0x238] sm:$0xff]  }
  0x2a   :  { %10048 = vmatprep.subr.bf16.mxu1 %v11122_v59  ;;  %v11176_v59 = vld [vmem:[%s14580_s1 + $0x2b8] sm:$0xff]  }
  0x2c   :  { %10027 = vmatpush3.bf16.msra.mxu0 %v11123_v60  ;;  %v1745_v60 = vcombine.high %v1735_v56, %v1735_v56 }
  0x2d   :  { %10028 = vmatprep.subr.bf16.mxu0 %v11125_v62  ;;  %10049 = vmatpush3.bf16.msra.mxu1 %v11124_v61  ;;  %v1721_v61 = vrot.slane %v1705_v48, %v12043_v41  ;;  %v11177_v62 = vld [vmem:[%s14580_s1 + $0x340] sm:$0xff]   ;;  %v11222_v48 = vld [vmem:[%s14580_s1 + $0x458] sm:$0xff]  }
  0x2e   :  { %10050 = vmatprep.subr.bf16.mxu1 %v11126_v63  ;;  %v11178_v63 = vld [vmem:[%s14580_s1 + $0x3c0] sm:$0xff]  }
  0x30   :  { %10029 = vmatpush3.bf16.msra.mxu0 %v11127_v0  ;;  %v1742_v0 = vrot.slane %v1714_v57, %v12043_v41  ;;  %v11231_v57 = vld [vmem:[%s14580_s1 + $0x4e8] sm:$0xff]  }
  0x31   :  { %10030 = vmatprep.subr.bf16.mxu0 %v11129_v2  ;;  %10051 = vmatpush3.bf16.msra.mxu1 %v11128_v1  ;;  %v11179_v1 = vld [vmem:[%s14580_s1 + $0x300] sm:$0xff]  }
  0x32   :  { %10052 = vmatprep.subr.bf16.mxu1 %v11130_v3  ;;  %v11180_v2 = vld [vmem:[%s14580_s1 + $0x380] sm:$0xff]   ;;  %v1743_v3 = vcombine.high %v1721_v61, %v1721_v61 }
  0x34   :  { %10031 = vmatpush3.bf16.msra.mxu0 %v11131_v4  ;;  %v11181_v4 = vld [vmem:[%s14580_s1 + $0x348] sm:$0xff]  }
  0x35   :  { %10032 = vmatprep.subr.bf16.mxu0 %v11133_v6  ;;  %10053 = vmatpush3.bf16.msra.mxu1 %v11132_v5  ;;  %v11182_v5 = vld [vmem:[%s14580_s1 + $0x3c8] sm:$0xff]   ;;  %v1746_v6 = vcombine.high %v1742_v0, %v1742_v0 }
  0x36   :  { %10054 = vmatprep.subr.bf16.mxu1 %v11134_v7  ;;  %v11183_v7 = vld [vmem:[%s14580_s1 + $0x308] sm:$0xff]  }
  0x38   :  { %10033 = vmatpush3.bf16.msra.mxu0 %v11135_v8  ;;  %v11184_v8 = vld [vmem:[%s14580_s1 + $0x388] sm:$0xff]  }
  0x39   :  { %10034 = vmatprep.subr.bf16.mxu0 %v11137_v10  ;;  %10055 = vmatpush3.bf16.msra.mxu1 %v11136_v9  ;;  %v11185_v9 = vld [vmem:[%s14580_s1 + $0x350] sm:$0xff]  }
  0x3a   :  { %10056 = vmatprep.subr.bf16.mxu1 %v11138_v11  ;;  %v11186_v10 = vld [vmem:[%s14580_s1 + $0x3d0] sm:$0xff]  }
  0x3b   :  { %v11187_v11 = vld [vmem:[%s14580_s1 + $0x310] sm:$0xff]  }
  0x3c   :  { %10035 = vmatpush3.bf16.msra.mxu0 %v11139_v12  ;;  %v11188_v12 = vld [vmem:[%s14580_s1 + $0x390] sm:$0xff]  }
  0x3d   :  { %10036 = vmatprep.subr.bf16.mxu0 %v11141_v14  ;;  %10057 = vmatpush3.bf16.msra.mxu1 %v11140_v13  ;;  %v11189_v13 = vld [vmem:[%s14580_s1 + $0x358] sm:$0xff]  }
  0x3e   :  { %10058 = vmatprep.subr.bf16.mxu1 %v11142_v15  ;;  %v11190_v14 = vld [vmem:[%s14580_s1 + $0x3d8] sm:$0xff]  }
  0x3f   :  { %v11191_v15 = vld [vmem:[%s14580_s1 + $0x318] sm:$0xff]  }
  0x40   :  { %10037 = vmatpush3.bf16.msra.mxu0 %v11143_v16  ;;  %v11192_v16 = vld [vmem:[%s14580_s1 + $0x398] sm:$0xff]  }
  0x41   :  { %10066 = vmatprep.subr.bf16.mxu0 %v11145_v19  ;;  %10059 = vmatpush3.bf16.msra.mxu1 %v11144_v17  ;;  %v11193_v17 = vld [vmem:[%s14580_s1 + $0x360] sm:$0xff]  }
  0x42   :  { %10088 = vmatprep.subr.bf16.mxu1 %v11146_v20  ;;  %v11195_v19 = vld [vmem:[%s14580_s1 + $0x320] sm:$0xff]  }
  0x43   :  { %7274 = vmatmul.mubr.bf16.vlgmr.msra.gmra.mrb[4].mxu0 %v1679_v18  ;;  %v11194_v18 = vld [vmem:[%s14580_s1 + $0x3e0] sm:$0xff]  }
  0x44   :  { %10067 = vmatpush3.bf16.msra.mxu0 %v11147_v21  ;;  %7314 = vmatmul.mubr.bf16.vlgmr.msra.gmra.mrb[4].mxu1 %v1695_v23  ;;  %v11196_v20 = vld [vmem:[%s14580_s1 + $0x3a0] sm:$0xff]   ;;  %v11197_v21 = vld [vmem:[%s14580_s1 + $0x368] sm:$0xff]  }
  0x45   :  { %10068 = vmatprep.subr.bf16.mxu0 %v11149_v24  ;;  %10089 = vmatpush3.bf16.msra.mxu1 %v11148_v22  ;;  %v11198_v22 = vld [vmem:[%s14580_s1 + $0x3e8] sm:$0xff]  }
  0x46   :  { %10090 = vmatprep.subr.bf16.mxu1 %v11150_v25  ;;  %7353 = vmatprep.mubr.bf16.mxu0 %v1735_v56  ;;  %v11199_v23 = vld [vmem:[%s14580_s1 + $0x328] sm:$0xff]   ;;  %v11201_v25 = vld [vmem:[%s14580_s1 + $0x370] sm:$0xff]  }
  0x47   :  { %7393 = vmatprep.mubr.bf16.mxu1 %v1745_v60  ;;  %v11200_v24 = vld [vmem:[%s14580_s1 + $0x3a8] sm:$0xff]   ;;  %v11234_v60 = vld [vmem:[%s14580_s1 + $0x470] sm:$0xff]  }
  0x48   :  { %10069 = vmatpush3.bf16.msra.mxu0 %v11151_v26  ;;  %v11202_v26 = vld [vmem:[%s14580_s1 + $0x3f0] sm:$0xff]   ;;  %v11230_v56 = vld [vmem:[%s14580_s1 + $0x468] sm:$0xff]  }
  0x49   :  { %10070 = vmatprep.subr.bf16.mxu0 %v11153_v28  ;;  %10091 = vmatpush3.bf16.msra.mxu1 %v11152_v27  ;;  %v11203_v27 = vld [vmem:[%s14580_s1 + $0x330] sm:$0xff]  }
  0x4a   :  { %10092 = vmatprep.subr.bf16.mxu1 %v11154_v29  ;;  %v11204_v28 = vld [vmem:[%s14580_s1 + $0x3b0] sm:$0xff]   ;;  %v11205_v29 = vld [vmem:[%s14580_s1 + $0x378] sm:$0xff]  }
  0x4c   :  { %10071 = vmatpush3.bf16.msra.mxu0 %v11155_v30  ;;  %v11206_v30 = vld [vmem:[%s14580_s1 + $0x3f8] sm:$0xff]  }
  0x4d   :  { %10072 = vmatprep.subr.bf16.mxu0 %v11157_v32  ;;  %10093 = vmatpush3.bf16.msra.mxu1 %v11156_v31  ;;  %v11207_v31 = vld [vmem:[%s14580_s1 + $0x338] sm:$0xff]  }
  0x4e   :  { %10094 = vmatprep.subr.bf16.mxu1 %v11158_v33  ;;  %v11208_v32 = vld [vmem:[%s14580_s1 + $0x3b8] sm:$0xff]   ;;  %v1728_v33 = vrot.slane %v12235_v53, %v12043_v41  ;;  %v11227_v53 = vld [vmem:[%s14580_s1 + $0x4e0] sm:$0xff]  }
  0x50   :  { %10073 = vmatpush3.bf16.msra.mxu0 %v11159_v34  ;;  %v11210_v34 = vld [vmem:[%s14580_s1 + $0x440] sm:$0xff]  }
  0x51   :  { %10074 = vmatprep.subr.bf16.mxu0 %v11161_v36  ;;  %10095 = vmatpush3.bf16.msra.mxu1 %v11160_v35  ;;  %v11211_v35 = vld [vmem:[%s14580_s1 + $0x4c0] sm:$0xff]  }
  0x52   :  { %10096 = vmatprep.subr.bf16.mxu1 %v11162_v37  ;;  %v11212_v36 = vld [vmem:[%s14580_s1 + $0x400] sm:$0xff]  }
  0x53   :  { %v11213_v37 = vld [vmem:[%s14580_s1 + $0x480] sm:$0xff]  }
  0x54   :  { %10075 = vmatpush3.bf16.msra.mxu0 %v11163_v38  ;;  %v1744_v38 = vcombine.high %v1728_v33, %v1728_v33 }
  0x55   :  { %10076 = vmatprep.subr.bf16.mxu0 %v11165_v40  ;;  %10097 = vmatpush3.bf16.msra.mxu1 %v11164_v39  ;;  %v11214_v39 = vld [vmem:[%s14580_s1 + $0x448] sm:$0xff]  }
  0x56   :  { %10098 = vmatprep.subr.bf16.mxu1 %v11166_v42  ;;  %v11215_v40 = vld [vmem:[%s14580_s1 + $0x4c8] sm:$0xff]  }
  0x57   :  { %v11216_v42 = vld [vmem:[%s14580_s1 + $0x408] sm:$0xff]  }
  0x58   :  { %10077 = vmatpush3.bf16.msra.mxu0 %v11167_v43  ;;  %v11217_v43 = vld [vmem:[%s14580_s1 + $0x488] sm:$0xff]  }
  0x59   :  { %10078 = vmatprep.subr.bf16.mxu0 %v11169_v45  ;;  %10099 = vmatpush3.bf16.msra.mxu1 %v11168_v44  ;;  %v11218_v44 = vld [vmem:[%s14580_s1 + $0x450] sm:$0xff]  }
  0x5a   :  { %10100 = vmatprep.subr.bf16.mxu1 %v11170_v47  ;;  %v11219_v45 = vld [vmem:[%s14580_s1 + $0x4d0] sm:$0xff]  }
  0x5b   :  { %v11221_v47 = vld [vmem:[%s14580_s1 + $0x490] sm:$0xff]  }
  0x5c   :  { %10079 = vmatpush3.bf16.msra.mxu0 %v11171_v50  ;;  %v11224_v50 = vld [vmem:[%s14580_s1 + $0x418] sm:$0xff]  }
  0x5d   :  { %10080 = vmatprep.subr.bf16.mxu0 %v11173_v54  ;;  %10101 = vmatpush3.bf16.msra.mxu1 %v11172_v51  ;;  %v11225_v51 = vld [vmem:[%s14580_s1 + $0x498] sm:$0xff]   ;;  %v11228_v54 = vld [vmem:[%s14580_s1 + $0x420] sm:$0xff]  }
  0x5e   :  { %10102 = vmatprep.subr.bf16.mxu1 %v11174_v55  ;;  %v11229_v55 = vld [vmem:[%s14580_s1 + $0x4a0] sm:$0xff]  }
  0x60   :  { %10081 = vmatpush3.bf16.msra.mxu0 %v11175_v58  ;;  %v11232_v58 = vld [vmem:[%s14580_s1 + $0x428] sm:$0xff]  }
  0x61   :  { %10110 = vmatprep.subr.bf16.mxu0 %v11177_v62  ;;  %10103 = vmatpush3.bf16.msra.mxu1 %v11176_v59  ;;  %v11233_v59 = vld [vmem:[%s14580_s1 + $0x4a8] sm:$0xff]   ;;  %v11235_v62 = vld [vmem:[%s14580_s1 + $0x4f0] sm:$0xff]  }
  0x62   :  { %10132 = vmatprep.subr.bf16.mxu1 %v11178_v63 }
  0x63   :  { %7354 = vmatmul.mubr.bf16.vlgmr.msra.gmra.mrb[8].mxu0 %v1721_v61  ;;  %v18_v61 = vld [vmem:[%s14579_s0 + $0x10] sm:$0xff] }
  0x64   :  { %10111 = vmatpush3.bf16.msra.mxu0 %v11179_v1  ;;  %7433 = vmatprep.mubr.bf16.mxu0 %v1742_v0  ;;  %v1754_v63 = vrot.slane %v18_v61, %v12043_v41  ;;  %v1747_v0 = vcombine.high %v18_v61, %v18_v61  ;;  %v11236_v1 = vld [vmem:[%s14580_s1 + $0x430] sm:$0xff]  }
  0x65   :  { %7394 = vmatmul.mubr.bf16.vlgmr.msra.gmra.mrb[8].mxu1 %v1743_v3  ;;  %10112 = vmatprep.subr.bf16.mxu0 %v11181_v4  ;;  %v11285_v61 = vld [vmem:[%s14580_s1 + $0x610] sm:$0xff]  }
  0x66   :  { %10133 = vmatpush3.bf16.msra.mxu1 %v11180_v2  ;;  %7473 = vmatprep.mubr.bf16.mxu1 %v1746_v6  ;;  %v11237_v2 = vld [vmem:[%s14580_s1 + $0x4b0] sm:$0xff]   ;;  %v1762_v3 = vcombine.high %v1754_v63, %v1754_v63  ;;  %v12441_v4 = vrot.slane %v1747_v0, %v12043_v41  ;;  %v11239_v6 = vld [vmem:[%s14580_s1 + $0x4f8] sm:$0xff]  }
  0x67   :  { %10134 = vmatprep.subr.bf16.mxu1 %v11182_v5  ;;  %v11238_v5 = vld [vmem:[%s14580_s1 + $0x478] sm:$0xff]  }
  0x68   :  { %10113 = vmatpush3.bf16.msra.mxu0 %v11183_v7  ;;  %v1784_v7 = vrot.slane %v1762_v3, %v12043_v41  ;;  %v11288_v0 = vld [vmem:[%s14580_s1 + $0x6d8] sm:$0xff]   ;;  %v11291_v3 = vld [vmem:[%s14580_s1 + $0x660] sm:$0xff]  }
  0x69   :  { %10114 = vmatprep.subr.bf16.mxu0 %v11185_v9  ;;  %v11240_v9 = vld [vmem:[%s14580_s1 + $0x438] sm:$0xff]  }
  0x6a   :  { %10135 = vmatpush3.bf16.msra.mxu1 %v11184_v8  ;;  %v1763_v8 = vcombine.high %v12441_v4, %v12441_v4 }
  0x6b   :  { %10136 = vmatprep.subr.bf16.mxu1 %v11186_v10  ;;  %v11241_v10 = vld [vmem:[%s14580_s1 + $0x4b8] sm:$0xff]  }
  0x6c   :  { %10115 = vmatpush3.bf16.msra.mxu0 %v11187_v11  ;;  %v1794_v11 = vcombine.high %v1784_v7, %v1784_v7 }
  0x6d   :  { %10116 = vmatprep.subr.bf16.mxu0 %v11189_v13  ;;  %v11242_v13 = vld [vmem:[%s14580_s1 + $0x540] sm:$0xff]  }
  0x6e   :  { %10137 = vmatpush3.bf16.msra.mxu1 %v11188_v12  ;;  %v1770_v12 = vrot.slane %v1754_v63, %v12043_v41  ;;  %v11287_v63 = vld [vmem:[%s14580_s1 + $0x658] sm:$0xff]  }
  0x6f   :  { %10138 = vmatprep.subr.bf16.mxu1 %v11190_v14  ;;  %v11243_v14 = vld [vmem:[%s14580_s1 + $0x5c0] sm:$0xff]  }
  0x70   :  { %10117 = vmatpush3.bf16.msra.mxu0 %v11191_v15  ;;  %v1791_v15 = vrot.slane %v1763_v8, %v12043_v41  ;;  %v11296_v8 = vld [vmem:[%s14580_s1 + $0x6e8] sm:$0xff]  }
  0x71   :  { %10118 = vmatprep.subr.bf16.mxu0 %v11193_v17  ;;  %v11245_v17 = vld [vmem:[%s14580_s1 + $0x580] sm:$0xff]  }
  0x72   :  { %10139 = vmatpush3.bf16.msra.mxu1 %v11192_v16  ;;  %v11244_v16 = vld [vmem:[%s14580_s1 + $0x500] sm:$0xff]  }
  0x73   :  { %10140 = vmatprep.subr.bf16.mxu1 %v11194_v18  ;;  %v1792_v18 = vcombine.high %v1770_v12, %v1770_v12 }
  0x74   :  { %10119 = vmatpush3.bf16.msra.mxu0 %v11195_v19  ;;  %v11246_v19 = vld [vmem:[%s14580_s1 + $0x548] sm:$0xff]  }
  0x75   :  { %10120 = vmatprep.subr.bf16.mxu0 %v11197_v21  ;;  %v1795_v21 = vcombine.high %v1791_v15, %v1791_v15 }
  0x76   :  { %10141 = vmatpush3.bf16.msra.mxu1 %v11196_v20  ;;  %v11247_v20 = vld [vmem:[%s14580_s1 + $0x5c8] sm:$0xff]  }
  0x77   :  { %10142 = vmatprep.subr.bf16.mxu1 %v11198_v22  ;;  %v11248_v22 = vld [vmem:[%s14580_s1 + $0x508] sm:$0xff]  }
  0x78   :  { %10121 = vmatpush3.bf16.msra.mxu0 %v11199_v23  ;;  %v11249_v23 = vld [vmem:[%s14580_s1 + $0x588] sm:$0xff]  }
  0x79   :  { %10122 = vmatprep.subr.bf16.mxu0 %v11201_v25  ;;  %v11251_v25 = vld [vmem:[%s14580_s1 + $0x5d0] sm:$0xff]  }
  0x7a   :  { %10143 = vmatpush3.bf16.msra.mxu1 %v11200_v24  ;;  %v11250_v24 = vld [vmem:[%s14580_s1 + $0x550] sm:$0xff]  }
  0x7b   :  { %10144 = vmatprep.subr.bf16.mxu1 %v11202_v26  ;;  %v11252_v26 = vld [vmem:[%s14580_s1 + $0x510] sm:$0xff]  }
  0x7c   :  { %10123 = vmatpush3.bf16.msra.mxu0 %v11203_v27  ;;  %v11253_v27 = vld [vmem:[%s14580_s1 + $0x590] sm:$0xff]  }
  0x7d   :  { %10124 = vmatprep.subr.bf16.mxu0 %v11205_v29  ;;  %v11255_v29 = vld [vmem:[%s14580_s1 + $0x5d8] sm:$0xff]  }
  0x7e   :  { %10145 = vmatpush3.bf16.msra.mxu1 %v11204_v28  ;;  %v11254_v28 = vld [vmem:[%s14580_s1 + $0x558] sm:$0xff]  }
  0x7f   :  { %10146 = vmatprep.subr.bf16.mxu1 %v11206_v30  ;;  %v11256_v30 = vld [vmem:[%s14580_s1 + $0x518] sm:$0xff]  }
  0x80   :  { %10125 = vmatpush3.bf16.msra.mxu0 %v11207_v31  ;;  %v11257_v31 = vld [vmem:[%s14580_s1 + $0x598] sm:$0xff]  }
  0x81   :  { %10154 = vmatprep.subr.bf16.mxu0 %v11210_v34  ;;  %v11260_v34 = vld [vmem:[%s14580_s1 + $0x520] sm:$0xff]  }
  0x82   :  { %10147 = vmatpush3.bf16.msra.mxu1 %v11208_v32  ;;  %v11258_v32 = vld [vmem:[%s14580_s1 + $0x560] sm:$0xff]  }
  0x83   :  { %7434 = vmatmul.mubr.bf16.vlgmr.msra.gmra.mrb[12].mxu0 %v1728_v33  ;;  %10176 = vmatprep.subr.bf16.mxu1 %v11211_v35  ;;  %v11259_v33 = vld [vmem:[%s14580_s1 + $0x5e0] sm:$0xff]  }
  0x84   :  { %10155 = vmatpush3.bf16.msra.mxu0 %v11212_v36  ;;  %7513 = vmatprep.mubr.bf16.mxu0 %v1784_v7  ;;  %v11261_v35 = vld [vmem:[%s14580_s1 + $0x5a0] sm:$0xff]   ;;  %v11262_v36 = vld [vmem:[%s14580_s1 + $0x568] sm:$0xff]  }
  0x85   :  { %7474 = vmatmul.mubr.bf16.vlgmr.msra.gmra.mrb[12].mxu1 %v1744_v38  ;;  %10156 = vmatprep.subr.bf16.mxu0 %v11214_v39  ;;  %v11264_v38 = vld [vmem:[%s14580_s1 + $0x528] sm:$0xff]  }
  0x86   :  { %10177 = vmatpush3.bf16.msra.mxu1 %v11213_v37  ;;  %7553 = vmatprep.mubr.bf16.mxu1 %v1794_v11  ;;  %v11263_v37 = vld [vmem:[%s14580_s1 + $0x5e8] sm:$0xff]   ;;  %v11299_v11 = vld [vmem:[%s14580_s1 + $0x670] sm:$0xff]  }
  0x87   :  { %10178 = vmatprep.subr.bf16.mxu1 %v11215_v40  ;;  %v11265_v39 = vld [vmem:[%s14580_s1 + $0x5a8] sm:$0xff]   ;;  %v11266_v40 = vld [vmem:[%s14580_s1 + $0x570] sm:$0xff]  }
  0x88   :  { %10157 = vmatpush3.bf16.msra.mxu0 %v11216_v42  ;;  %v11267_v42 = vld [vmem:[%s14580_s1 + $0x5f0] sm:$0xff]   ;;  %v11295_v7 = vld [vmem:[%s14580_s1 + $0x668] sm:$0xff]  }
  0x89   :  { %10158 = vmatprep.subr.bf16.mxu0 %v11218_v44  ;;  %v11269_v44 = vld [vmem:[%s14580_s1 + $0x5b0] sm:$0xff]  }
  0x8a   :  { %10179 = vmatpush3.bf16.msra.mxu1 %v11217_v43  ;;  %v11268_v43 = vld [vmem:[%s14580_s1 + $0x530] sm:$0xff]  }
  0x8b   :  { %10180 = vmatprep.subr.bf16.mxu1 %v11219_v45  ;;  %v11270_v45 = vld [vmem:[%s14580_s1 + $0x578] sm:$0xff]  }
  0x8c   :  { %10159 = vmatpush3.bf16.msra.mxu0 %v11220_v46  ;;  %v11271_v46 = vld [vmem:[%s14580_s1 + $0x5f8] sm:$0xff]  }
  0x8d   :  { %10160 = vmatprep.subr.bf16.mxu0 %v11222_v48  ;;  %v11273_v48 = vld [vmem:[%s14580_s1 + $0x5b8] sm:$0xff]  }
  0x8e   :  { %10181 = vmatpush3.bf16.msra.mxu1 %v11221_v47  ;;  %v11272_v47 = vld [vmem:[%s14580_s1 + $0x538] sm:$0xff]  }
  0x8f   :  { %10182 = vmatprep.subr.bf16.mxu1 %v11223_v49  ;;  %v1777_v49 = vrot.slane %v12441_v4, %v12043_v41  ;;  %v11292_v4 = vld [vmem:[%s14580_s1 + $0x6e0] sm:$0xff]  }
  0x90   :  { %10161 = vmatpush3.bf16.msra.mxu0 %v11224_v50  ;;  %v11275_v50 = vld [vmem:[%s14580_s1 + $0x640] sm:$0xff]  }
  0x91   :  { %10162 = vmatprep.subr.bf16.mxu0 %v11226_v52  ;;  %v11277_v52 = vld [vmem:[%s14580_s1 + $0x600] sm:$0xff]  }
  0x92   :  { %10183 = vmatpush3.bf16.msra.mxu1 %v11225_v51  ;;  %v11276_v51 = vld [vmem:[%s14580_s1 + $0x6c0] sm:$0xff]  }
  0x93   :  { %10184 = vmatprep.subr.bf16.mxu1 %v11227_v53  ;;  %v11278_v53 = vld [vmem:[%s14580_s1 + $0x680] sm:$0xff]  }
  0x94   :  { %10163 = vmatpush3.bf16.msra.mxu0 %v11228_v54  ;;  %v1793_v54 = vcombine.high %v1777_v49, %v1777_v49 }
  0x95   :  { %10164 = vmatprep.subr.bf16.mxu0 %v11230_v56  ;;  %v11280_v56 = vld [vmem:[%s14580_s1 + $0x6c8] sm:$0xff]  }
  0x96   :  { %10185 = vmatpush3.bf16.msra.mxu1 %v11229_v55  ;;  %v11279_v55 = vld [vmem:[%s14580_s1 + $0x648] sm:$0xff]  }
  0x97   :  { %10186 = vmatprep.subr.bf16.mxu1 %v11231_v57  ;;  %v11281_v57 = vld [vmem:[%s14580_s1 + $0x608] sm:$0xff]  }
  0x98   :  { %10165 = vmatpush3.bf16.msra.mxu0 %v11232_v58  ;;  %v11282_v58 = vld [vmem:[%s14580_s1 + $0x688] sm:$0xff]  }
  0x99   :  { %10166 = vmatprep.subr.bf16.mxu0 %v11234_v60  ;;  %v11284_v60 = vld [vmem:[%s14580_s1 + $0x6d0] sm:$0xff]  }
  0x9a   :  { %10187 = vmatpush3.bf16.msra.mxu1 %v11233_v59  ;;  %v11283_v59 = vld [vmem:[%s14580_s1 + $0x650] sm:$0xff]  }
  0x9b   :  { %10188 = vmatprep.subr.bf16.mxu1 %v11235_v62  ;;  %v11286_v62 = vld [vmem:[%s14580_s1 + $0x690] sm:$0xff]  }
  0x9c   :  { %10167 = vmatpush3.bf16.msra.mxu0 %v11236_v1  ;;  %v11289_v1 = vld [vmem:[%s14580_s1 + $0x618] sm:$0xff]  }
  0x9d   :  { %10168 = vmatprep.subr.bf16.mxu0 %v11238_v5  ;;  %v11293_v5 = vld [vmem:[%s14580_s1 + $0x620] sm:$0xff]  }
  0x9e   :  { %10189 = vmatpush3.bf16.msra.mxu1 %v11237_v2  ;;  %v11290_v2 = vld [vmem:[%s14580_s1 + $0x698] sm:$0xff]  }
  0x9f   :  { %10190 = vmatprep.subr.bf16.mxu1 %v11239_v6  ;;  %v11294_v6 = vld [vmem:[%s14580_s1 + $0x6a0] sm:$0xff]  }
  0xa0   :  { %10169 = vmatpush3.bf16.msra.mxu0 %v11240_v9  ;;  %v11297_v9 = vld [vmem:[%s14580_s1 + $0x628] sm:$0xff]  }
  0xa1   :  { %10198 = vmatprep.subr.bf16.mxu0 %v11242_v13  ;;  %v11300_v13 = vld [vmem:[%s14580_s1 + $0x6f0] sm:$0xff]  }
  0xa2   :  { %10191 = vmatpush3.bf16.msra.mxu1 %v11241_v10  ;;  %v11298_v10 = vld [vmem:[%s14580_s1 + $0x6a8] sm:$0xff]  }
  0xa3   :  { %7514 = vmatmul.mubr.bf16.vlgmr.msra.gmra.mrb[16].mxu0 %v1770_v12  ;;  %10220 = vmatprep.subr.bf16.mxu1 %v11243_v14  ;;  %v19_v12 = vld [vmem:[%s14579_s0 + $0x18] sm:$0xff] }
  0xa4   :  { %10199 = vmatpush3.bf16.msra.mxu0 %v11244_v16  ;;  %7593 = vmatprep.mubr.bf16.mxu0 %v1791_v15  ;;  %v1803_v14 = vrot.slane %v19_v12, %v12043_v41  ;;  %v1796_v15 = vcombine.high %v19_v12, %v19_v12  ;;  %v11301_v16 = vld [vmem:[%s14580_s1 + $0x630] sm:$0xff]   ;;  %v11338_v12 = vld [vmem:[%s14580_s1 + $0x7b8] sm:$0xff]  }
  0xa5   :  { %7554 = vmatmul.mubr.bf16.vlgmr.msra.gmra.mrb[16].mxu1 %v1792_v18  ;;  %10200 = vmatprep.subr.bf16.mxu0 %v11246_v19 }
  0xa6   :  { %10221 = vmatpush3.bf16.msra.mxu1 %v11245_v17  ;;  %7633 = vmatprep.mubr.bf16.mxu1 %v1795_v21  ;;  %v11303_v17 = vld [vmem:[%s14580_s1 + $0x678] sm:$0xff]   ;;  %v1811_v18 = vcombine.high %v1803_v14, %v1803_v14  ;;  %v12647_v19 = vrot.slane %v1796_v15, %v12043_v41  ;;  %v11341_v15 = vld [vmem:[%s14580_s1 + $0x8c0] sm:$0xff]  }
  0xa7   :  { %10222 = vmatprep.subr.bf16.mxu1 %v11247_v20  ;;  %v11302_v20 = vld [vmem:[%s14580_s1 + $0x6b0] sm:$0xff]   ;;  %v11304_v21 = vld [vmem:[%s14580_s1 + $0x6f8] sm:$0xff]  }
  0xa8   :  { %10201 = vmatpush3.bf16.msra.mxu0 %v11248_v22  ;;  %v1833_v22 = vrot.slane %v1811_v18, %v12043_v41 }
  0xa9   :  { %10202 = vmatprep.subr.bf16.mxu0 %v11250_v24  ;;  %v11305_v24 = vld [vmem:[%s14580_s1 + $0x638] sm:$0xff]  }
  0xaa   :  { %10223 = vmatpush3.bf16.msra.mxu1 %v11249_v23  ;;  %v1812_v23 = vcombine.high %v12647_v19, %v12647_v19 }
  0xab   :  { %10224 = vmatprep.subr.bf16.mxu1 %v11251_v25  ;;  %v1843_v25 = vcombine.high %v1833_v22, %v1833_v22 }
  0xac   :  { %10203 = vmatpush3.bf16.msra.mxu0 %v11252_v26  ;;  %v1819_v26 = vrot.slane %v1803_v14, %v12043_v41  ;;  %v11340_v14 = vld [vmem:[%s14580_s1 + $0x840] sm:$0xff]  }
  0xad   :  { %10204 = vmatprep.subr.bf16.mxu0 %v11254_v28  ;;  %v11306_v28 = vld [vmem:[%s14580_s1 + $0x6b8] sm:$0xff]  }
  0xae   :  { %10225 = vmatpush3.bf16.msra.mxu1 %v11253_v27  ;;  %v11307_v27 = vld [vmem:[%s14580_s1 + $0x740] sm:$0xff]  }
  0xaf   :  { %10226 = vmatprep.subr.bf16.mxu1 %v11255_v29  ;;  %v1840_v29 = vrot.slane %v1812_v23, %v12043_v41  ;;  %v11348_v23 = vld [vmem:[%s14580_s1 + $0x850] sm:$0xff]  }
  0xb0   :  { %10205 = vmatpush3.bf16.msra.mxu0 %v11256_v30  ;;  %v11308_v30 = vld [vmem:[%s14580_s1 + $0x7c0] sm:$0xff]  }
  0xb1   :  { %10206 = vmatprep.subr.bf16.mxu0 %v11258_v32  ;;  %v1841_v32 = vcombine.high %v1819_v26, %v1819_v26 }
  0xb2   :  { %10227 = vmatpush3.bf16.msra.mxu1 %v11257_v31  ;;  %v11309_v31 = vld [vmem:[%s14580_s1 + $0x700] sm:$0xff]  }
  0xb3   :  { %10228 = vmatprep.subr.bf16.mxu1 %v11259_v33  ;;  %v11311_v33 = vld [vmem:[%s14580_s1 + $0x748] sm:$0xff]  }
  0xb4   :  { %10207 = vmatpush3.bf16.msra.mxu0 %v11260_v34  ;;  %v11310_v34 = vld [vmem:[%s14580_s1 + $0x780] sm:$0xff]  }
  0xb5   :  { %10208 = vmatprep.subr.bf16.mxu0 %v11262_v36  ;;  %v11312_v36 = vld [vmem:[%s14580_s1 + $0x7c8] sm:$0xff]  }
  0xb6   :  { %10229 = vmatpush3.bf16.msra.mxu1 %v11261_v35  ;;  %v1844_v35 = vcombine.high %v1840_v29, %v1840_v29 }
  0xb7   :  { %10230 = vmatprep.subr.bf16.mxu1 %v11263_v37  ;;  %v11313_v37 = vld [vmem:[%s14580_s1 + $0x708] sm:$0xff]  }
  0xb8   :  { %10209 = vmatpush3.bf16.msra.mxu0 %v11264_v38  ;;  %v11315_v38 = vld [vmem:[%s14580_s1 + $0x750] sm:$0xff]  }
  0xb9   :  { %10210 = vmatprep.subr.bf16.mxu0 %v11266_v40  ;;  %v11316_v40 = vld [vmem:[%s14580_s1 + $0x7d0] sm:$0xff]  }
  0xba   :  { %10231 = vmatpush3.bf16.msra.mxu1 %v11265_v39  ;;  %v11314_v39 = vld [vmem:[%s14580_s1 + $0x788] sm:$0xff]  }
  0xbb   :  { %10232 = vmatprep.subr.bf16.mxu1 %v11267_v42  ;;  %v11317_v42 = vld [vmem:[%s14580_s1 + $0x710] sm:$0xff]  }
  0xbc   :  { %10211 = vmatpush3.bf16.msra.mxu0 %v11268_v43  ;;  %v11319_v43 = vld [vmem:[%s14580_s1 + $0x758] sm:$0xff]  }
  0xbd   :  { %10212 = vmatprep.subr.bf16.mxu0 %v11270_v45  ;;  %v11320_v45 = vld [vmem:[%s14580_s1 + $0x7d8] sm:$0xff]  }
  0xbe   :  { %10233 = vmatpush3.bf16.msra.mxu1 %v11269_v44  ;;  %v11318_v44 = vld [vmem:[%s14580_s1 + $0x790] sm:$0xff]  }
  0xbf   :  { %10234 = vmatprep.subr.bf16.mxu1 %v11271_v46  ;;  %v11321_v46 = vld [vmem:[%s14580_s1 + $0x718] sm:$0xff]  }
  0xc0   :  { %10213 = vmatpush3.bf16.msra.mxu0 %v11272_v47  ;;  %v11322_v47 = vld [vmem:[%s14580_s1 + $0x798] sm:$0xff]  }
  0xc1   :  { %10242 = vmatprep.subr.bf16.mxu0 %v11275_v50  ;;  %v11325_v50 = vld [vmem:[%s14580_s1 + $0x720] sm:$0xff]  }
  0xc2   :  { %10235 = vmatpush3.bf16.msra.mxu1 %v11273_v48  ;;  %v11323_v48 = vld [vmem:[%s14580_s1 + $0x760] sm:$0xff]  }
  0xc3   :  { %7594 = vmatmul.mubr.bf16.vlgmr.msra.gmra.mrb[20].mxu0 %v1777_v49  ;;  %10264 = vmatprep.subr.bf16.mxu1 %v11276_v51  ;;  %v11324_v49 = vld [vmem:[%s14580_s1 + $0x7e0] sm:$0xff]  }
  0xc4   :  { %10243 = vmatpush3.bf16.msra.mxu0 %v11277_v52  ;;  %7673 = vmatprep.mubr.bf16.mxu0 %v1833_v22  ;;  %v11326_v51 = vld [vmem:[%s14580_s1 + $0x7a0] sm:$0xff]   ;;  %v11327_v52 = vld [vmem:[%s14580_s1 + $0x768] sm:$0xff]  }
  0xc5   :  { %7634 = vmatmul.mubr.bf16.vlgmr.msra.gmra.mrb[20].mxu1 %v1793_v54  ;;  %10244 = vmatprep.subr.bf16.mxu0 %v11279_v55  ;;  %v11329_v54 = vld [vmem:[%s14580_s1 + $0x728] sm:$0xff]  }
  0xc6   :  { %10265 = vmatpush3.bf16.msra.mxu1 %v11278_v53  ;;  %7713 = vmatprep.mubr.bf16.mxu1 %v1843_v25  ;;  %v11328_v53 = vld [vmem:[%s14580_s1 + $0x7e8] sm:$0xff]   ;;  %v11350_v25 = vld [vmem:[%s14580_s1 + $0x810] sm:$0xff]  }
  0xc7   :  { %10266 = vmatprep.subr.bf16.mxu1 %v11280_v56  ;;  %v11330_v55 = vld [vmem:[%s14580_s1 + $0x7a8] sm:$0xff]   ;;  %v9176_v56 = vld [vmem:[%s14581_s2] ss:$0 sm:$0xff] }
  0xc8   :  { %10245 = vmatpush3.bf16.msra.mxu0 %v11281_v57  ;;  %v11331_v57 = vld [vmem:[%s14580_s1 + $0x770] sm:$0xff]   ;;  %v11347_v22 = vld [vmem:[%s14580_s1 + $0x888] sm:$0xff]  }
  0xc9   :  { %10246 = vmatprep.subr.bf16.mxu0 %v11283_v59  ;;  %v11332_v59 = vld [vmem:[%s14580_s1 + $0x7f0] sm:$0xff]  }
  0xca   :  { %10267 = vmatpush3.bf16.msra.mxu1 %v11282_v58 }
  0xcb   :  { %10268 = vmatprep.subr.bf16.mxu1 %v11284_v60 }
  0xcc   :  { %10247 = vmatpush3.bf16.msra.mxu0 %v11285_v61  ;;  %v11333_v61 = vld [vmem:[%s14580_s1 + $0x730] sm:$0xff]  }
  0xcd   :  { %10248 = vmatprep.subr.bf16.mxu0 %v11287_v63 }
  0xce   :  { %10269 = vmatpush3.bf16.msra.mxu1 %v11286_v62 }
  0xcf   :  { %10270 = vmatprep.subr.bf16.mxu1 %v11288_v0 }
  0xd0   :  { %10249 = vmatpush3.bf16.msra.mxu0 %v11289_v1  ;;  %v11334_v1 = vld [vmem:[%s14580_s1 + $0x7b0] sm:$0xff]  }
  0xd1   :  { %10250 = vmatprep.subr.bf16.mxu0 %v11291_v3 }
  0xd2   :  { %10271 = vmatpush3.bf16.msra.mxu1 %v11290_v2  ;;  %v11335_v2 = vld [vmem:[%s14580_s1 + $0x778] sm:$0xff]  }
  0xd3   :  { %10272 = vmatprep.subr.bf16.mxu1 %v11292_v4 }
  0xd4   :  { %10251 = vmatpush3.bf16.msra.mxu0 %v11293_v5 }
  0xd5   :  { %10252 = vmatprep.subr.bf16.mxu0 %v11295_v7 }
  0xd6   :  { %10273 = vmatpush3.bf16.msra.mxu1 %v11294_v6 }
  0xd7   :  { %10274 = vmatprep.subr.bf16.mxu1 %v11296_v8  ;;  %v11336_v8 = vld [vmem:[%s14580_s1 + $0x7f8] sm:$0xff]  }
  0xd8   :  { %10253 = vmatpush3.bf16.msra.mxu0 %v11297_v9 }
  0xd9   :  { %10254 = vmatprep.subr.bf16.mxu0 %v11299_v11 }
  0xda   :  { %10275 = vmatpush3.bf16.msra.mxu1 %v11298_v10  ;;  %v11337_v10 = vld [vmem:[%s14580_s1 + $0x738] sm:$0xff]  }
  0xdb   :  { %10276 = vmatprep.subr.bf16.mxu1 %v11300_v13  ;;  %v1826_v13 = vrot.slane %v12647_v19, %v12043_v41  ;;  %v11344_v19 = vld [vmem:[%s14580_s1 + $0x848] sm:$0xff]  }
  0xdc   :  { %10255 = vmatpush3.bf16.msra.mxu0 %v11301_v16  ;;  %v11342_v16 = vld [vmem:[%s14580_s1 + $0x800] sm:$0xff]  }
  0xdd   :  { %10256 = vmatprep.subr.bf16.mxu0 %v11303_v17  ;;  %v11343_v17 = vld [vmem:[%s14580_s1 + $0x880] sm:$0xff]   ;;  %v1842_v18 = vcombine.high %v1826_v13, %v1826_v13 }
  0xde   :  { %10277 = vmatpush3.bf16.msra.mxu1 %v11302_v20  ;;  %v11345_v20 = vld [vmem:[%s14580_s1 + $0x8c8] sm:$0xff]  }
  0xdf   :  { %10278 = vmatprep.subr.bf16.mxu1 %v11304_v21  ;;  %v11346_v21 = vld [vmem:[%s14580_s1 + $0x808] sm:$0xff]  }
  0xe0   :  { %10257 = vmatpush3.bf16.msra.mxu0 %v11305_v24  ;;  %v11349_v24 = vld [vmem:[%s14580_s1 + $0x8d0] sm:$0xff]  }
  0xe1   :  { %10286 = vmatprep.subr.bf16.mxu0 %v11307_v27  ;;  %v11352_v27 = vld [vmem:[%s14580_s1 + $0x858] sm:$0xff]  }
  0xe2   :  { %10279 = vmatpush3.bf16.msra.mxu1 %v11306_v28  ;;  %v11353_v28 = vld [vmem:[%s14580_s1 + $0x8d8] sm:$0xff]  }
  0xe3   :  { %7674 = vmatmul.mubr.bf16.vlgmr.msra.gmra.mrb[24].mxu0 %v1819_v26  ;;  %10308 = vmatprep.subr.bf16.mxu1 %v11308_v30  ;;  %v11351_v26 = vld [vmem:[%s14580_s1 + $0x890] sm:$0xff]   ;;  %v11355_v30 = vld [vmem:[%s14580_s1 + $0x898] sm:$0xff]  }
  0xe4   :  { %10287 = vmatpush3.bf16.msra.mxu0 %v11309_v31  ;;  %7753 = vmatprep.mubr.bf16.mxu0 %v1840_v29  ;;  %v11354_v29 = vld [vmem:[%s14580_s1 + $0x818] sm:$0xff]   ;;  %v11356_v31 = vld [vmem:[%s14580_s1 + $0x860] sm:$0xff]  }
  0xe5   :  { %7714 = vmatmul.mubr.bf16.vlgmr.msra.gmra.mrb[24].mxu1 %v1841_v32  ;;  %10288 = vmatprep.subr.bf16.mxu0 %v11311_v33  ;;  %v11357_v32 = vld [vmem:[%s14580_s1 + $0x8e0] sm:$0xff]  }
  0xe6   :  { %10309 = vmatpush3.bf16.msra.mxu1 %v11310_v34  ;;  %7793 = vmatprep.mubr.bf16.mxu1 %v1844_v35  ;;  %v11358_v33 = vld [vmem:[%s14580_s1 + $0x820] sm:$0xff]   ;;  %v11360_v35 = vld [vmem:[%s14580_s1 + $0x868] sm:$0xff]  }
  0xe7   :  { %10310 = vmatprep.subr.bf16.mxu1 %v11312_v36  ;;  %v11359_v34 = vld [vmem:[%s14580_s1 + $0x8a0] sm:$0xff]   ;;  %v11361_v36 = vld [vmem:[%s14580_s1 + $0x8e8] sm:$0xff]  }
  0xe8   :  { %10289 = vmatpush3.bf16.msra.mxu0 %v11313_v37  ;;  %v11362_v37 = vld [vmem:[%s14580_s1 + $0x828] sm:$0xff]  }
  0xe9   :  { %10290 = vmatprep.subr.bf16.mxu0 %v11315_v38  ;;  %v11363_v38 = vld [vmem:[%s14580_s1 + $0x8a8] sm:$0xff]  }
  0xea   :  { %10311 = vmatpush3.bf16.msra.mxu1 %v11314_v39  ;;  %v11364_v39 = vld [vmem:[%s14580_s1 + $0x870] sm:$0xff]  }
  0xeb   :  { %10312 = vmatprep.subr.bf16.mxu1 %v11316_v40  ;;  %v11365_v40 = vld [vmem:[%s14580_s1 + $0x8f0] sm:$0xff]  }
  0xec   :  { %10291 = vmatpush3.bf16.msra.mxu0 %v11317_v42 }
  0xed   :  { %10292 = vmatprep.subr.bf16.mxu0 %v11319_v43  ;;  %v11366_v43 = vld [vmem:[%s14580_s1 + $0x830] sm:$0xff]  }
  0xee   :  { %10313 = vmatpush3.bf16.msra.mxu1 %v11318_v44 }
  0xef   :  { %10314 = vmatprep.subr.bf16.mxu1 %v11320_v45  ;;  %v20_v45 = vld [vmem:[%s14579_s0 + $0x20] sm:$0xff] }
  0xf0   :  { %10293 = vmatpush3.bf16.msra.mxu0 %v11321_v46 }
  0xf1   :  { %10294 = vmatprep.subr.bf16.mxu0 %v11323_v48 }
  0xf2   :  { %10315 = vmatpush3.bf16.msra.mxu1 %v11322_v47 }
  0xf3   :  { %10316 = vmatprep.subr.bf16.mxu1 %v11324_v49  ;;  %v11367_v49 = vld [vmem:[%s14580_s1 + $0x8b0] sm:$0xff]  }
  0xf4   :  { %10295 = vmatpush3.bf16.msra.mxu0 %v11325_v50  ;;  %v11368_v50 = vld [vmem:[%s14580_s1 + $0x878] sm:$0xff]  }
  0xf5   :  { %10296 = vmatprep.subr.bf16.mxu0 %v11327_v52  ;;  %v1845_v52 = vcombine.high %v20_v45, %v20_v45 }
  0xf6   :  { %10317 = vmatpush3.bf16.msra.mxu1 %v11326_v51  ;;  %v9994_v58 = vpop.f32.mrb[0].mxu0  ;;  %v1852_v51 = vrot.slane %v20_v45, %v12043_v41 }
  0xf7   :  { %v9995_v60 = vpop.f32.mrb[1].mxu0  ;;  %10318 = vmatprep.subr.bf16.mxu1 %v11328_v53  ;;  %v10016_v62 = vpop.f32.mrb[0].mxu1 }
  0xf8   :  { %v9996_v63 = vadd.f32 %v9995_v60, %v9994_v58  ;;  %v9997_v0 = vpop.f32.mrb[2].mxu0  ;;  %10297 = vmatpush3.bf16.msra.mxu0 %v11329_v54  ;;  %v10017_v3 = vpop.f32.mrb[1].mxu1  ;;  %v11369_v58 = vld [vmem:[%s14580_s1 + $0x8f8] sm:$0xff]  }
  0xf9   :  { %v9998_v4 = vpop.f32.mrb[3].mxu0  ;;  %10298 = vmatprep.subr.bf16.mxu0 %v11331_v57  ;;  %v10018_v6 = vadd.f32 %v10017_v3, %v10016_v62  ;;  %v10019_v7 = vpop.f32.mrb[2].mxu1  ;;  %v12868_v62 = vrot.slane %v1845_v52, %v12043_v41  ;;  %v11371_v0 = vld [vmem:[%s14580_s1 + $0x8b8] sm:$0xff]   ;;  %v11372_v3 = vld [vmem:[%s14580_s1 + $0x940] sm:$0xff]  }
  0xfa   :  { %v7196_v5 = vadd.f32 %v9996_v63, %v9176_v56  ;;  %10319 = vmatpush3.bf16.msra.mxu1 %v11330_v55  ;;  %v10020_v9 = vpop.f32.mrb[3].mxu1  ;;  %v11374_v7 = vld [vmem:[%s14580_s1 + $0x900] sm:$0xff]   ;;  %v11403_v52 = vld [vmem:[%s14580_s1 + $0x9b8] sm:$0xff]  }
  0xfb   :  { %10320 = vmatprep.subr.bf16.mxu1 %v11332_v59  ;;  %v1860_v59 = vcombine.high %v1852_v51, %v1852_v51  ;;  %v1861_v4 = vcombine.high %v12868_v62, %v12868_v62  ;;  %v11375_v9 = vld [vmem:[%s14580_s1 + $0x980] sm:$0xff]  }
  0xfc   :  { %v12762_v11 = vadd.f32 %v10018_v6, %v7196_v5  ;;  %10299 = vmatpush3.bf16.msra.mxu0 %v11333_v61  ;;  %v11370_v61 = vld [vmem:[%s14580_s1 + $0x838] sm:$0xff]   ;;  %v11373_v6 = vld [vmem:[%s14580_s1 + $0x9c0] sm:$0xff]  }
  0xfd   :  { %10300 = vmatprep.subr.bf16.mxu0 %v11335_v2  ;;  %v1868_v2 = vrot.slane %v1852_v51, %v12043_v41 }
  0xfe   :  { %10321 = vmatpush3.bf16.msra.mxu1 %v11334_v1  ;;  %v1882_v1 = vrot.slane %v1860_v59, %v12043_v41  ;;  %v11409_v59 = vld [vmem:[%s14580_s1 + $0xa48] sm:$0xff]  }
  0xff   :  { %10322 = vmatprep.subr.bf16.mxu1 %v11336_v8  ;;  %v1889_v8 = vrot.slane %v1861_v4, %v12043_v41  ;;  %v11418_v4 = vld [vmem:[%s14580_s1 + $0xad8] sm:$0xff]  }
 0x100   :  { %10301 = vmatpush3.bf16.msra.mxu0 %v11337_v10  ;;  %v1892_v5 = vcombine.high %v1882_v1, %v1882_v1  ;;  %v1890_v10 = vcombine.high %v1868_v2, %v1868_v2 }
 0x101   :  { %10330 = vmatprep.subr.bf16.mxu0 %v11340_v14  ;;  %v11378_v14 = vld [vmem:[%s14580_s1 + $0x908] sm:$0xff]  }
 0x102   :  { %10323 = vmatpush3.bf16.msra.mxu1 %v11338_v12  ;;  %v11377_v12 = vld [vmem:[%s14580_s1 + $0x9c8] sm:$0xff]  }
 0x103   :  { %7754 = vmatmul.mubr.bf16.vlgmr.msra.gmra.mrb[28].mxu0 %v1826_v13  ;;  %10352 = vmatprep.subr.bf16.mxu1 %v11341_v15  ;;  %v1893_v13 = vcombine.high %v1889_v8, %v1889_v8  ;;  %v11379_v15 = vld [vmem:[%s14580_s1 + $0x988] sm:$0xff]  }
 0x104   :  { %10331 = vmatpush3.bf16.msra.mxu0 %v11342_v16  ;;  %7833 = vmatprep.mubr.bf16.mxu0 %v1882_v1  ;;  %v11380_v16 = vld [vmem:[%s14580_s1 + $0x950] sm:$0xff]  }
 0x105   :  { %7794 = vmatmul.mubr.bf16.vlgmr.msra.gmra.mrb[28].mxu1 %v1842_v18  ;;  %10332 = vmatprep.subr.bf16.mxu0 %v11344_v19  ;;  %v11382_v18 = vld [vmem:[%s14580_s1 + $0x910] sm:$0xff]  }
 0x106   :  { %10353 = vmatpush3.bf16.msra.mxu1 %v11343_v17  ;;  %7873 = vmatprep.mubr.bf16.mxu1 %v1892_v5  ;;  %v11381_v17 = vld [vmem:[%s14580_s1 + $0x9d0] sm:$0xff]   ;;  %v11419_v5 = vld [vmem:[%s14580_s1 + $0xa18] sm:$0xff]  }
 0x107   :  { %10354 = vmatprep.subr.bf16.mxu1 %v11345_v20  ;;  %v11383_v19 = vld [vmem:[%s14580_s1 + $0x990] sm:$0xff]   ;;  %v11384_v20 = vld [vmem:[%s14580_s1 + $0x958] sm:$0xff]  }
 0x108   :  { %10333 = vmatpush3.bf16.msra.mxu0 %v11346_v21  ;;  %v11385_v21 = vld [vmem:[%s14580_s1 + $0x9d8] sm:$0xff]   ;;  %v11415_v1 = vld [vmem:[%s14580_s1 + $0xa10] sm:$0xff]  }
 0x109   :  { %10334 = vmatprep.subr.bf16.mxu0 %v11348_v23  ;;  %v11387_v23 = vld [vmem:[%s14580_s1 + $0x998] sm:$0xff]  }
 0x10a   :  { %10355 = vmatpush3.bf16.msra.mxu1 %v11347_v22  ;;  %v11386_v22 = vld [vmem:[%s14580_s1 + $0x918] sm:$0xff]  }
 0x10b   :  { %10356 = vmatprep.subr.bf16.mxu1 %v11349_v24  ;;  %v11388_v24 = vld [vmem:[%s14580_s1 + $0x960] sm:$0xff]  }
 0x10c   :  { %10335 = vmatpush3.bf16.msra.mxu0 %v11350_v25  ;;  %v11389_v25 = vld [vmem:[%s14580_s1 + $0x9e0] sm:$0xff]  }
 0x10d   :  { %10336 = vmatprep.subr.bf16.mxu0 %v11352_v27  ;;  %v11391_v27 = vld [vmem:[%s14580_s1 + $0x9a0] sm:$0xff]  }
 0x10e   :  { %10357 = vmatpush3.bf16.msra.mxu1 %v11351_v26  ;;  %v11390_v26 = vld [vmem:[%s14580_s1 + $0x920] sm:$0xff]  }
 0x10f   :  { %10358 = vmatprep.subr.bf16.mxu1 %v11353_v28  ;;  %v11392_v28 = vld [vmem:[%s14580_s1 + $0x968] sm:$0xff]  }
 0x110   :  { %10337 = vmatpush3.bf16.msra.mxu0 %v11354_v29  ;;  %v11393_v29 = vld [vmem:[%s14580_s1 + $0x9e8] sm:$0xff]  }
 0x111   :  { %10338 = vmatprep.subr.bf16.mxu0 %v11356_v31  ;;  %v11395_v31 = vld [vmem:[%s14580_s1 + $0x9a8] sm:$0xff]  }
 0x112   :  { %10359 = vmatpush3.bf16.msra.mxu1 %v11355_v30  ;;  %v11394_v30 = vld [vmem:[%s14580_s1 + $0x928] sm:$0xff]  }
 0x113   :  { %10360 = vmatprep.subr.bf16.mxu1 %v11357_v32  ;;  %v11396_v32 = vld [vmem:[%s14580_s1 + $0x970] sm:$0xff]  }
 0x114   :  { %10339 = vmatpush3.bf16.msra.mxu0 %v11358_v33 }
 0x115   :  { %10340 = vmatprep.subr.bf16.mxu0 %v11360_v35 }
 0x116   :  { %10361 = vmatpush3.bf16.msra.mxu1 %v11359_v34  ;;  %v10038_v42 = vpop.f32.mrb[4].mxu0  ;;  %v11397_v34 = vld [vmem:[%s14580_s1 + $0x9f0] sm:$0xff]  }
 0x117   :  { %v10039_v44 = vpop.f32.mrb[5].mxu0  ;;  %10362 = vmatprep.subr.bf16.mxu1 %v11361_v36  ;;  %v10060_v46 = vpop.f32.mrb[4].mxu1  ;;  %v11398_v36 = vld [vmem:[%s14580_s1 + $0x930] sm:$0xff]  }
 0x118   :  { %v10040_v47 = vadd.f32 %v10039_v44, %v10038_v42  ;;  %v10041_v48 = vpop.f32.mrb[6].mxu0  ;;  %10341 = vmatpush3.bf16.msra.mxu0 %v11362_v37  ;;  %v10061_v53 = vpop.f32.mrb[5].mxu1  ;;  %v11400_v42 = vld [vmem:[%s14580_s1 + $0x978] sm:$0xff]  }
 0x119   :  { %v10042_v54 = vpop.f32.mrb[7].mxu0  ;;  %10342 = vmatprep.subr.bf16.mxu0 %v11364_v39  ;;  %v10062_v56 = vadd.f32 %v10061_v53, %v10060_v46  ;;  %v10063_v57 = vpop.f32.mrb[6].mxu1  ;;  %v11401_v48 = vld [vmem:[%s14580_s1 + $0x9f8] sm:$0xff]   ;;  %v1875_v53 = vrot.slane %v12868_v62, %v12043_v41  ;;  %v11412_v62 = vld [vmem:[%s14580_s1 + $0xa88] sm:$0xff]  }
 0x11a   :  { %v7276_v55 = vadd.f32 %v10040_v47, %v12762_v11  ;;  %10363 = vmatpush3.bf16.msra.mxu1 %v11363_v38  ;;  %v10064_v60 = vpop.f32.mrb[7].mxu1  ;;  %v11376_v11 = vld [vmem:[%s14580_s1 + $0x948] sm:$0xff]   ;;  %v11405_v54 = vld [vmem:[%s14580_s1 + $0xa40] sm:$0xff]  }
 0x11b   :  { %10364 = vmatprep.subr.bf16.mxu1 %v11365_v40  ;;  %v11399_v40 = vld [vmem:[%s14580_s1 + $0x9b0] sm:$0xff]   ;;  %v11408_v57 = vld [vmem:[%s14580_s1 + $0xa80] sm:$0xff]   ;;  %v11410_v60 = vld [vmem:[%s14580_s1 + $0xac8] sm:$0xff]  }
 0x11c   :  { %v12870_v63 = vadd.f32 %v10062_v56, %v7276_v55  ;;  %10343 = vmatpush3.bf16.msra.mxu0 %v11366_v43  ;;  %v11406_v55 = vld [vmem:[%s14580_s1 + $0xac0] sm:$0xff]  }
 0x11d   :  { %10344 = vmatprep.subr.bf16.mxu0 %v11368_v50  ;;  %v11402_v50 = vld [vmem:[%s14580_s1 + $0x938] sm:$0xff]   ;;  %v11407_v56 = vld [vmem:[%s14580_s1 + $0xa00] sm:$0xff]  }
 0x11e   :  { %10365 = vmatpush3.bf16.msra.mxu1 %v11367_v49 }
 0x11f   :  { %10366 = vmatprep.subr.bf16.mxu1 %v11369_v58  ;;  %v1891_v58 = vcombine.high %v1875_v53, %v1875_v53 }
 0x120   :  { %10345 = vmatpush3.bf16.msra.mxu0 %v11370_v61  ;;  %v11411_v61 = vld [vmem:[%s14580_s1 + $0xa08] sm:$0xff]  }
 0x121   :  { %10374 = vmatprep.subr.bf16.mxu0 %v11372_v3  ;;  %v11417_v3 = vld [vmem:[%s14580_s1 + $0xa58] sm:$0xff]  }
 0x122   :  { %10367 = vmatpush3.bf16.msra.mxu1 %v11371_v0  ;;  %v11414_v0 = vld [vmem:[%s14580_s1 + $0xad0] sm:$0xff]  }
 0x123   :  { %7834 = vmatmul.mubr.bf16.vlgmr.msra.gmra.mrb[32].mxu0 %v1868_v2  ;;  %10396 = vmatprep.subr.bf16.mxu1 %v11373_v6  ;;  %v11416_v2 = vld [vmem:[%s14580_s1 + $0xa90] sm:$0xff]   ;;  %v11420_v6 = vld [vmem:[%s14580_s1 + $0xa98] sm:$0xff]  }
 0x124   :  { %10375 = vmatpush3.bf16.msra.mxu0 %v11374_v7  ;;  %7913 = vmatprep.mubr.bf16.mxu0 %v1889_v8  ;;  %v11421_v7 = vld [vmem:[%s14580_s1 + $0xa60] sm:$0xff]  }
 0x125   :  { %7874 = vmatmul.mubr.bf16.vlgmr.msra.gmra.mrb[32].mxu1 %v1890_v10  ;;  %10376 = vmatprep.subr.bf16.mxu0 %v11376_v11  ;;  %v11422_v8 = vld [vmem:[%s14580_s1 + $0xae0] sm:$0xff]   ;;  %v11425_v11 = vld [vmem:[%s14580_s1 + $0xa68] sm:$0xff]  }
 0x126   :  { %10397 = vmatpush3.bf16.msra.mxu1 %v11375_v9  ;;  %7953 = vmatprep.mubr.bf16.mxu1 %v1893_v13  ;;  %v11423_v9 = vld [vmem:[%s14580_s1 + $0xa20] sm:$0xff]   ;;  %v11427_v13 = vld [vmem:[%s14580_s1 + $0xa28] sm:$0xff]  }
 0x127   :  { %10398 = vmatprep.subr.bf16.mxu1 %v11377_v12  ;;  %v11424_v10 = vld [vmem:[%s14580_s1 + $0xaa0] sm:$0xff]   ;;  %v11426_v12 = vld [vmem:[%s14580_s1 + $0xae8] sm:$0xff]  }
 0x128   :  { %10377 = vmatpush3.bf16.msra.mxu0 %v11378_v14  ;;  %v11428_v14 = vld [vmem:[%s14580_s1 + $0xaa8] sm:$0xff]  }
 0x129   :  { %10378 = vmatprep.subr.bf16.mxu0 %v11380_v16 }
 0x12a   :  { %10399 = vmatpush3.bf16.msra.mxu1 %v11379_v15  ;;  %v11429_v15 = vld [vmem:[%s14580_s1 + $0xa70] sm:$0xff]  }
 0x12b   :  { %10400 = vmatprep.subr.bf16.mxu1 %v11381_v17  ;;  %v11430_v17 = vld [vmem:[%s14580_s1 + $0xaf0] sm:$0xff]  }
 0x12c   :  { %10379 = vmatpush3.bf16.msra.mxu0 %v11382_v18 }
 0x12d   :  { %10380 = vmatprep.subr.bf16.mxu0 %v11384_v20 }
 0x12e   :  { %10401 = vmatpush3.bf16.msra.mxu1 %v11383_v19  ;;  %v11431_v19 = vld [vmem:[%s14580_s1 + $0xa30] sm:$0xff]  }
 0x12f   :  { %10402 = vmatprep.subr.bf16.mxu1 %v11385_v21 }
 0x130   :  { %10381 = vmatpush3.bf16.msra.mxu0 %v11386_v22 }
 0x131   :  { %10382 = vmatprep.subr.bf16.mxu0 %v11388_v24  ;;  %v11433_v24 = vld [vmem:[%s14580_s1 + $0xa78] sm:$0xff]  }
 0x132   :  { %10403 = vmatpush3.bf16.msra.mxu1 %v11387_v23  ;;  %v11432_v23 = vld [vmem:[%s14580_s1 + $0xab0] sm:$0xff]  }
 0x133   :  { %10404 = vmatprep.subr.bf16.mxu1 %v11389_v25  ;;  %v21_v25 = vld [vmem:[%s14579_s0 + $0x28] sm:$0xff] }
 0x134   :  { %10383 = vmatpush3.bf16.msra.mxu0 %v11390_v26 }
 0x135   :  { %10384 = vmatprep.subr.bf16.mxu0 %v11392_v28  ;;  %v1901_v28 = vrot.slane %v21_v25, %v12043_v41 }
 0x136   :  { %10405 = vmatpush3.bf16.msra.mxu1 %v11391_v27  ;;  %v10082_v33 = vpop.f32.mrb[8].mxu0 }
 0x137   :  { %v10083_v35 = vpop.f32.mrb[9].mxu0  ;;  %10406 = vmatprep.subr.bf16.mxu1 %v11393_v29  ;;  %v1894_v29 = vcombine.high %v21_v25, %v21_v25  ;;  %v11467_v25 = vld [vmem:[%s14580_s1 + $0xb38] sm:$0xff]  }
 0x138   :  { %v10104_v37 = vpop.f32.mrb[8].mxu1  ;;  %v10084_v38 = vadd.f32 %v10083_v35, %v10082_v33  ;;  %v10085_v39 = vpop.f32.mrb[10].mxu0  ;;  %10385 = vmatpush3.bf16.msra.mxu0 %v11394_v30  ;;  %v11434_v33 = vld [vmem:[%s14580_s1 + $0xaf8] sm:$0xff]  }
 0x139   :  { %v10105_v43 = vpop.f32.mrb[9].mxu1  ;;  %v10086_v44 = vpop.f32.mrb[11].mxu0  ;;  %10386 = vmatprep.subr.bf16.mxu0 %v11396_v32  ;;  %v11435_v35 = vld [vmem:[%s14580_s1 + $0xa38] sm:$0xff]  }
 0x13a   :  { %v7356_v45 = vadd.f32 %v10084_v38, %v12870_v63  ;;  %v10106_v46 = vadd.f32 %v10105_v43, %v10104_v37  ;;  %v10107_v47 = vpop.f32.mrb[10].mxu1  ;;  %10407 = vmatpush3.bf16.msra.mxu1 %v11395_v31  ;;  %v11413_v63 = vld [vmem:[%s14580_s1 + $0xa50] sm:$0xff]   ;;  %v13080_v37 = vrot.slane %v1894_v29, %v12043_v41  ;;  %v11436_v39 = vld [vmem:[%s14580_s1 + $0xab8] sm:$0xff]   ;;  %v11437_v43 = vld [vmem:[%s14580_s1 + $0xb40] sm:$0xff]  }
 0x13b   :  { %v10108_v49 = vpop.f32.mrb[11].mxu1  ;;  %10408 = vmatprep.subr.bf16.mxu1 %v11397_v34  ;;  %v11439_v47 = vld [vmem:[%s14580_s1 + $0xb00] sm:$0xff]  }
 0x13c   :  { %v12974_v51 = vadd.f32 %v10106_v46, %v7356_v45  ;;  %10387 = vmatpush3.bf16.msra.mxu0 %v11398_v36  ;;  %v1909_v36 = vcombine.high %v1901_v28, %v1901_v28  ;;  %v1910_v44 = vcombine.high %v13080_v37, %v13080_v37  ;;  %v11438_v45 = vld [vmem:[%s14580_s1 + $0xbc0] sm:$0xff]  }
 0x13d   :  { %10388 = vmatprep.subr.bf16.mxu0 %v11400_v42  ;;  %v1917_v42 = vrot.slane %v1901_v28, %v12043_v41  ;;  %v11440_v49 = vld [vmem:[%s14580_s1 + $0xb80] sm:$0xff]   ;;  %v1924_v28 = vrot.slane %v13080_v37, %v12043_v41  ;;  %v11477_v37 = vld [vmem:[%s14580_s1 + $0xc88] sm:$0xff]  }
 0x13e   :  { %10409 = vmatpush3.bf16.msra.mxu1 %v11399_v40  ;;  %v1931_v40 = vrot.slane %v1909_v36, %v12043_v41  ;;  %v11470_v29 = vld [vmem:[%s14580_s1 + $0xc40] sm:$0xff]   ;;  %v11476_v36 = vld [vmem:[%s14580_s1 + $0xc08] sm:$0xff]  }
 0x13f   :  { %10410 = vmatprep.subr.bf16.mxu1 %v11401_v48  ;;  %v1938_v48 = vrot.slane %v1910_v44, %v12043_v41  ;;  %v11483_v44 = vld [vmem:[%s14580_s1 + $0xcd8] sm:$0xff]  }
 0x140   :  { %10389 = vmatpush3.bf16.msra.mxu0 %v11402_v50  ;;  %v1941_v46 = vcombine.high %v1931_v40, %v1931_v40  ;;  %v1939_v50 = vcombine.high %v1917_v42, %v1917_v42 }
 0x141   :  { %10418 = vmatprep.subr.bf16.mxu0 %v11405_v54  ;;  %v11443_v54 = vld [vmem:[%s14580_s1 + $0xb08] sm:$0xff]  }
 0x142   :  { %10411 = vmatpush3.bf16.msra.mxu1 %v11403_v52  ;;  %v11442_v52 = vld [vmem:[%s14580_s1 + $0xbc8] sm:$0xff]  }
 0x143   :  { %7914 = vmatmul.mubr.bf16.vlgmr.msra.gmra.mrb[36].mxu0 %v1875_v53  ;;  %10440 = vmatprep.subr.bf16.mxu1 %v11406_v55  ;;  %v1942_v53 = vcombine.high %v1938_v48, %v1938_v48  ;;  %v11444_v55 = vld [vmem:[%s14580_s1 + $0xb88] sm:$0xff]  }
 0x144   :  { %10419 = vmatpush3.bf16.msra.mxu0 %v11407_v56  ;;  %7993 = vmatprep.mubr.bf16.mxu0 %v1931_v40  ;;  %v11445_v56 = vld [vmem:[%s14580_s1 + $0xb50] sm:$0xff]  }
 0x145   :  { %7954 = vmatmul.mubr.bf16.vlgmr.msra.gmra.mrb[36].mxu1 %v1891_v58  ;;  %10420 = vmatprep.subr.bf16.mxu0 %v11409_v59  ;;  %v11447_v58 = vld [vmem:[%s14580_s1 + $0xb10] sm:$0xff]  }
 0x146   :  { %10441 = vmatpush3.bf16.msra.mxu1 %v11408_v57  ;;  %8033 = vmatprep.mubr.bf16.mxu1 %v1941_v46  ;;  %v11446_v57 = vld [vmem:[%s14580_s1 + $0xbd0] sm:$0xff]   ;;  %v11485_v46 = vld [vmem:[%s14580_s1 + $0xc98] sm:$0xff]  }
 0x147   :  { %10442 = vmatprep.subr.bf16.mxu1 %v11410_v60  ;;  %v11448_v59 = vld [vmem:[%s14580_s1 + $0xb90] sm:$0xff]   ;;  %v11449_v60 = vld [vmem:[%s14580_s1 + $0xb58] sm:$0xff]  }
 0x148   :  { %10421 = vmatpush3.bf16.msra.mxu0 %v11411_v61  ;;  %v11450_v61 = vld [vmem:[%s14580_s1 + $0xbd8] sm:$0xff]   ;;  %v11480_v40 = vld [vmem:[%s14580_s1 + $0xc10] sm:$0xff]  }
 0x149   :  { %10422 = vmatprep.subr.bf16.mxu0 %v11413_v63  ;;  %v11452_v63 = vld [vmem:[%s14580_s1 + $0xb98] sm:$0xff]  }
 0x14a   :  { %10443 = vmatpush3.bf16.msra.mxu1 %v11412_v62  ;;  %v11451_v62 = vld [vmem:[%s14580_s1 + $0xb18] sm:$0xff]  }
 0x14b   :  { %10444 = vmatprep.subr.bf16.mxu1 %v11414_v0  ;;  %v11453_v0 = vld [vmem:[%s14580_s1 + $0xb60] sm:$0xff]  }
 0x14c   :  { %10423 = vmatpush3.bf16.msra.mxu0 %v11415_v1  ;;  %v11454_v1 = vld [vmem:[%s14580_s1 + $0xbe0] sm:$0xff]  }
 0x14d   :  { %10424 = vmatprep.subr.bf16.mxu0 %v11417_v3  ;;  %v11456_v3 = vld [vmem:[%s14580_s1 + $0xba0] sm:$0xff]  }
 0x14e   :  { %10445 = vmatpush3.bf16.msra.mxu1 %v11416_v2  ;;  %v11455_v2 = vld [vmem:[%s14580_s1 + $0xb20] sm:$0xff]  }
 0x14f   :  { %10446 = vmatprep.subr.bf16.mxu1 %v11418_v4  ;;  %v11457_v4 = vld [vmem:[%s14580_s1 + $0xb68] sm:$0xff]  }
 0x150   :  { %10425 = vmatpush3.bf16.msra.mxu0 %v11419_v5  ;;  %v11458_v5 = vld [vmem:[%s14580_s1 + $0xbe8] sm:$0xff]  }
 0x151   :  { %10426 = vmatprep.subr.bf16.mxu0 %v11421_v7  ;;  %v11460_v7 = vld [vmem:[%s14580_s1 + $0xba8] sm:$0xff]  }
 0x152   :  { %10447 = vmatpush3.bf16.msra.mxu1 %v11420_v6  ;;  %v11459_v6 = vld [vmem:[%s14580_s1 + $0xb28] sm:$0xff]  }
 0x153   :  { %10448 = vmatprep.subr.bf16.mxu1 %v11422_v8  ;;  %v11461_v8 = vld [vmem:[%s14580_s1 + $0xb70] sm:$0xff]  }
 0x154   :  { %10427 = vmatpush3.bf16.msra.mxu0 %v11423_v9 }
 0x155   :  { %10428 = vmatprep.subr.bf16.mxu0 %v11425_v11 }
 0x156   :  { %10449 = vmatpush3.bf16.msra.mxu1 %v11424_v10  ;;  %v10126_v16 = vpop.f32.mrb[12].mxu0  ;;  %v11462_v10 = vld [vmem:[%s14580_s1 + $0xbf0] sm:$0xff]  }
 0x157   :  { %v10127_v18 = vpop.f32.mrb[13].mxu0  ;;  %10450 = vmatprep.subr.bf16.mxu1 %v11426_v12  ;;  %v11463_v12 = vld [vmem:[%s14580_s1 + $0xb30] sm:$0xff]  }
 0x158   :  { %v10148_v20 = vpop.f32.mrb[12].mxu1  ;;  %v10128_v21 = vadd.f32 %v10127_v18, %v10126_v16  ;;  %v10129_v22 = vpop.f32.mrb[14].mxu0  ;;  %10429 = vmatpush3.bf16.msra.mxu0 %v11427_v13  ;;  %v11464_v16 = vld [vmem:[%s14580_s1 + $0xbb0] sm:$0xff]  }
 0x159   :  { %v10149_v26 = vpop.f32.mrb[13].mxu1  ;;  %v10130_v27 = vpop.f32.mrb[15].mxu0  ;;  %10430 = vmatprep.subr.bf16.mxu0 %v11429_v15 }
 0x15a   :  { %v7436_v30 = vadd.f32 %v10128_v21, %v12974_v51  ;;  %v10150_v31 = vadd.f32 %v10149_v26, %v10148_v20  ;;  %v10151_v32 = vpop.f32.mrb[14].mxu1  ;;  %10451 = vmatpush3.bf16.msra.mxu1 %v11428_v14  ;;  %v11441_v51 = vld [vmem:[%s14580_s1 + $0xb48] sm:$0xff]   ;;  %v11468_v27 = vld [vmem:[%s14580_s1 + $0xbb8] sm:$0xff]  }
 0x15b   :  { %v10152_v34 = vpop.f32.mrb[15].mxu1  ;;  %10452 = vmatprep.subr.bf16.mxu1 %v11430_v17  ;;  %v11465_v17 = vld [vmem:[%s14580_s1 + $0xb78] sm:$0xff]   ;;  %v11473_v32 = vld [vmem:[%s14580_s1 + $0xc80] sm:$0xff]  }
 0x15c   :  { %v13082_v38 = vadd.f32 %v10150_v31, %v7436_v30  ;;  %10431 = vmatpush3.bf16.msra.mxu0 %v11431_v19  ;;  %v11471_v30 = vld [vmem:[%s14580_s1 + $0xcc0] sm:$0xff]   ;;  %v11474_v34 = vld [vmem:[%s14580_s1 + $0xc48] sm:$0xff]  }
 0x15d   :  { %10432 = vmatprep.subr.bf16.mxu0 %v11433_v24  ;;  %v11472_v31 = vld [vmem:[%s14580_s1 + $0xc00] sm:$0xff]  }
 0x15e   :  { %10453 = vmatpush3.bf16.msra.mxu1 %v11432_v23  ;;  %v11466_v23 = vld [vmem:[%s14580_s1 + $0xbf8] sm:$0xff]  }
 0x15f   :  { %10454 = vmatprep.subr.bf16.mxu1 %v11434_v33  ;;  %v1940_v33 = vcombine.high %v1924_v28, %v1924_v28 }
 0x160   :  { %10433 = vmatpush3.bf16.msra.mxu0 %v11435_v35  ;;  %v11475_v35 = vld [vmem:[%s14580_s1 + $0xcc8] sm:$0xff]  }
 0x161   :  { %10462 = vmatprep.subr.bf16.mxu0 %v11437_v43  ;;  %v11482_v43 = vld [vmem:[%s14580_s1 + $0xc58] sm:$0xff]  }
 0x162   :  { %10455 = vmatpush3.bf16.msra.mxu1 %v11436_v39  ;;  %v11479_v39 = vld [vmem:[%s14580_s1 + $0xcd0] sm:$0xff]  }
 0x163   :  { %7994 = vmatmul.mubr.bf16.vlgmr.msra.gmra.mrb[40].mxu0 %v1917_v42  ;;  %10484 = vmatprep.subr.bf16.mxu1 %v11438_v45  ;;  %v11481_v42 = vld [vmem:[%s14580_s1 + $0xc90] sm:$0xff]   ;;  %v11484_v45 = vld [vmem:[%s14580_s1 + $0xc18] sm:$0xff]  }
 0x164   :  { %10463 = vmatpush3.bf16.msra.mxu0 %v11439_v47  ;;  %8073 = vmatprep.mubr.bf16.mxu0 %v1938_v48  ;;  %v11486_v47 = vld [vmem:[%s14580_s1 + $0xc60] sm:$0xff]  }
 0x165   :  { %8034 = vmatmul.mubr.bf16.vlgmr.msra.gmra.mrb[40].mxu1 %v1939_v50  ;;  %10464 = vmatprep.subr.bf16.mxu0 %v11441_v51  ;;  %v11487_v48 = vld [vmem:[%s14580_s1 + $0xce0] sm:$0xff]   ;;  %v11490_v51 = vld [vmem:[%s14580_s1 + $0xc68] sm:$0xff]  }
 0x166   :  { %10485 = vmatpush3.bf16.msra.mxu1 %v11440_v49  ;;  %8113 = vmatprep.mubr.bf16.mxu1 %v1942_v53  ;;  %v11488_v49 = vld [vmem:[%s14580_s1 + $0xc20] sm:$0xff]   ;;  %v11492_v53 = vld [vmem:[%s14580_s1 + $0xc28] sm:$0xff]  }
 0x167   :  { %10486 = vmatprep.subr.bf16.mxu1 %v11442_v52  ;;  %v11489_v50 = vld [vmem:[%s14580_s1 + $0xca0] sm:$0xff]   ;;  %v11491_v52 = vld [vmem:[%s14580_s1 + $0xce8] sm:$0xff]  }
 0x168   :  { %10465 = vmatpush3.bf16.msra.mxu0 %v11443_v54  ;;  %v11493_v54 = vld [vmem:[%s14580_s1 + $0xca8] sm:$0xff]  }
 0x169   :  { %10466 = vmatprep.subr.bf16.mxu0 %v11445_v56 }
 0x16a   :  { %10487 = vmatpush3.bf16.msra.mxu1 %v11444_v55  ;;  %v11494_v55 = vld [vmem:[%s14580_s1 + $0xc70] sm:$0xff]  }
 0x16b   :  { %10488 = vmatprep.subr.bf16.mxu1 %v11446_v57  ;;  %v11495_v57 = vld [vmem:[%s14580_s1 + $0xcf0] sm:$0xff]  }
 0x16c   :  { %10467 = vmatpush3.bf16.msra.mxu0 %v11447_v58 }
 0x16d   :  { %10468 = vmatprep.subr.bf16.mxu0 %v11449_v60 }
 0x16e   :  { %10489 = vmatpush3.bf16.msra.mxu1 %v11448_v59  ;;  %v11496_v59 = vld [vmem:[%s14580_s1 + $0xc30] sm:$0xff]  }
 0x16f   :  { %10490 = vmatprep.subr.bf16.mxu1 %v11450_v61 }
 0x170   :  { %10469 = vmatpush3.bf16.msra.mxu0 %v11451_v62 }
 0x171   :  { %10470 = vmatprep.subr.bf16.mxu0 %v11453_v0 }
 0x172   :  { %10491 = vmatpush3.bf16.msra.mxu1 %v11452_v63  ;;  %v11497_v63 = vld [vmem:[%s14580_s1 + $0xcb0] sm:$0xff]  }
 0x173   :  { %10492 = vmatprep.subr.bf16.mxu1 %v11454_v1 }
 0x174   :  { %10471 = vmatpush3.bf16.msra.mxu0 %v11455_v2  ;;  %v11498_v2 = vld [vmem:[%s14580_s1 + $0xc78] sm:$0xff]  }
 0x175   :  { %10472 = vmatprep.subr.bf16.mxu0 %v11457_v4 }
 0x176   :  { %10493 = vmatpush3.bf16.msra.mxu1 %v11456_v3  ;;  %v10170_v9 = vpop.f32.mrb[16].mxu0  ;;  %v22_v3 = vld [vmem:[%s14579_s0 + $0x30] sm:$0xff] }
 0x177   :  { %v10171_v11 = vpop.f32.mrb[17].mxu0  ;;  %10494 = vmatprep.subr.bf16.mxu1 %v11458_v5 }
 0x178   :  { %v10192_v13 = vpop.f32.mrb[16].mxu1  ;;  %v10172_v14 = vadd.f32 %v10171_v11, %v10170_v9  ;;  %v10173_v15 = vpop.f32.mrb[18].mxu0  ;;  %10473 = vmatpush3.bf16.msra.mxu0 %v11459_v6  ;;  %v1943_v9 = vcombine.high %v22_v3, %v22_v3  ;;  %v11500_v11 = vld [vmem:[%s14580_s1 + $0xc38] sm:$0xff]  }
 0x179   :  { %v10193_v18 = vpop.f32.mrb[17].mxu1  ;;  %v10174_v19 = vpop.f32.mrb[19].mxu0  ;;  %10474 = vmatprep.subr.bf16.mxu0 %v11461_v8  ;;  %v1950_v8 = vrot.slane %v22_v3, %v12043_v41  ;;  %v11533_v3 = vld [vmem:[%s14580_s1 + $0xdb8] sm:$0xff]  }
 0x17a   :  { %v7516_v20 = vadd.f32 %v10172_v14, %v13082_v38  ;;  %v10194_v21 = vadd.f32 %v10193_v18, %v10192_v13  ;;  %v10195_v22 = vpop.f32.mrb[18].mxu1  ;;  %10495 = vmatpush3.bf16.msra.mxu1 %v11460_v7  ;;  %v11478_v38 = vld [vmem:[%s14580_s1 + $0xc50] sm:$0xff]   ;;  %v11499_v7 = vld [vmem:[%s14580_s1 + $0xcf8] sm:$0xff]   ;;  %v13297_v15 = vrot.slane %v1943_v9, %v12043_v41  ;;  %v11503_v19 = vld [vmem:[%s14580_s1 + $0xdc0] sm:$0xff]  }
 0x17b   :  { %v10196_v24 = vpop.f32.mrb[19].mxu1  ;;  %10496 = vmatprep.subr.bf16.mxu1 %v11462_v10  ;;  %v11501_v13 = vld [vmem:[%s14580_s1 + $0xcb8] sm:$0xff]   ;;  %v1958_v14 = vcombine.high %v1950_v8, %v1950_v8 }
 0x17c   :  { %v13186_v26 = vadd.f32 %v10194_v21, %v7516_v20  ;;  %10475 = vmatpush3.bf16.msra.mxu0 %v11463_v12  ;;  %v1959_v20 = vcombine.high %v13297_v15, %v13297_v15  ;;  %v11504_v21 = vld [vmem:[%s14580_s1 + $0xd00] sm:$0xff]  }
 0x17d   :  { %10476 = vmatprep.subr.bf16.mxu0 %v11465_v17  ;;  %v11502_v17 = vld [vmem:[%s14580_s1 + $0xd40] sm:$0xff]   ;;  %v1980_v18 = vrot.slane %v1958_v14, %v12043_v41  ;;  %v11543_v14 = vld [vmem:[%s14580_s1 + $0xe50] sm:$0xff]  }
 0x17e   :  { %10497 = vmatpush3.bf16.msra.mxu1 %v11464_v16  ;;  %v1966_v16 = vrot.slane %v1950_v8, %v12043_v41  ;;  %v1987_v24 = vrot.slane %v1959_v20, %v12043_v41  ;;  %v11538_v8 = vld [vmem:[%s14580_s1 + $0xe80] sm:$0xff]   ;;  %v11549_v20 = vld [vmem:[%s14580_s1 + $0xe18] sm:$0xff]  }
 0x17f   :  { %10498 = vmatprep.subr.bf16.mxu1 %v11466_v23  ;;  %v1990_v22 = vcombine.high %v1980_v18, %v1980_v18  ;;  %v11505_v23 = vld [vmem:[%s14580_s1 + $0xd80] sm:$0xff]  }
 0x180   :  { %10477 = vmatpush3.bf16.msra.mxu0 %v11467_v25  ;;  %v1988_v25 = vcombine.high %v1966_v16, %v1966_v16 }
 0x181   :  { %10506 = vmatprep.subr.bf16.mxu0 %v11470_v29  ;;  %v11508_v29 = vld [vmem:[%s14580_s1 + $0xd08] sm:$0xff]  }
 0x182   :  { %10499 = vmatpush3.bf16.msra.mxu1 %v11468_v27  ;;  %v11507_v27 = vld [vmem:[%s14580_s1 + $0xdc8] sm:$0xff]  }
 0x183   :  { %8074 = vmatmul.mubr.bf16.vlgmr.msra.gmra.mrb[44].mxu0 %v1924_v28  ;;  %10528 = vmatprep.subr.bf16.mxu1 %v11471_v30  ;;  %v1991_v28 = vcombine.high %v1987_v24, %v1987_v24  ;;  %v11509_v30 = vld [vmem:[%s14580_s1 + $0xd88] sm:$0xff]  }
 0x184   :  { %10507 = vmatpush3.bf16.msra.mxu0 %v11472_v31  ;;  %8153 = vmatprep.mubr.bf16.mxu0 %v1980_v18  ;;  %v11510_v31 = vld [vmem:[%s14580_s1 + $0xd50] sm:$0xff]   ;;  %v11547_v18 = vld [vmem:[%s14580_s1 + $0xe58] sm:$0xff]  }
 0x185   :  { %8114 = vmatmul.mubr.bf16.vlgmr.msra.gmra.mrb[44].mxu1 %v1940_v33  ;;  %10508 = vmatprep.subr.bf16.mxu0 %v11474_v34  ;;  %v11512_v33 = vld [vmem:[%s14580_s1 + $0xd10] sm:$0xff]  }
 0x186   :  { %10529 = vmatpush3.bf16.msra.mxu1 %v11473_v32  ;;  %8193 = vmatprep.mubr.bf16.mxu1 %v1990_v22  ;;  %v11511_v32 = vld [vmem:[%s14580_s1 + $0xdd0] sm:$0xff]   ;;  %v11551_v22 = vld [vmem:[%s14580_s1 + $0xe60] sm:$0xff]  }
 0x187   :  { %10530 = vmatprep.subr.bf16.mxu1 %v11475_v35  ;;  %v11513_v34 = vld [vmem:[%s14580_s1 + $0xd90] sm:$0xff]   ;;  %v11514_v35 = vld [vmem:[%s14580_s1 + $0xd58] sm:$0xff]  }
 0x188   :  { %10509 = vmatpush3.bf16.msra.mxu0 %v11476_v36  ;;  %v11515_v36 = vld [vmem:[%s14580_s1 + $0xdd8] sm:$0xff]  }
 0x189   :  { %10510 = vmatprep.subr.bf16.mxu0 %v11478_v38  ;;  %v11517_v38 = vld [vmem:[%s14580_s1 + $0xd98] sm:$0xff]  }
 0x18a   :  { %10531 = vmatpush3.bf16.msra.mxu1 %v11477_v37  ;;  %v11516_v37 = vld [vmem:[%s14580_s1 + $0xd18] sm:$0xff]  }
 0x18b   :  { %10532 = vmatprep.subr.bf16.mxu1 %v11479_v39  ;;  %v11518_v39 = vld [vmem:[%s14580_s1 + $0xd60] sm:$0xff]  }
 0x18c   :  { %10511 = vmatpush3.bf16.msra.mxu0 %v11480_v40  ;;  %v11519_v40 = vld [vmem:[%s14580_s1 + $0xde0] sm:$0xff]  }
 0x18d   :  { %10512 = vmatprep.subr.bf16.mxu0 %v11482_v43  ;;  %v11521_v43 = vld [vmem:[%s14580_s1 + $0xda0] sm:$0xff]  }
 0x18e   :  { %10533 = vmatpush3.bf16.msra.mxu1 %v11481_v42  ;;  %v11520_v42 = vld [vmem:[%s14580_s1 + $0xd20] sm:$0xff]  }
 0x18f   :  { %10534 = vmatprep.subr.bf16.mxu1 %v11483_v44  ;;  %v11522_v44 = vld [vmem:[%s14580_s1 + $0xd68] sm:$0xff]  }
 0x190   :  { %10513 = vmatpush3.bf16.msra.mxu0 %v11484_v45  ;;  %v11523_v45 = vld [vmem:[%s14580_s1 + $0xde8] sm:$0xff]  }
 0x191   :  { %10514 = vmatprep.subr.bf16.mxu0 %v11486_v47  ;;  %v11525_v47 = vld [vmem:[%s14580_s1 + $0xda8] sm:$0xff]  }
 0x192   :  { %10535 = vmatpush3.bf16.msra.mxu1 %v11485_v46  ;;  %v11524_v46 = vld [vmem:[%s14580_s1 + $0xd28] sm:$0xff]  }
 0x193   :  { %10536 = vmatprep.subr.bf16.mxu1 %v11487_v48  ;;  %v11526_v48 = vld [vmem:[%s14580_s1 + $0xd70] sm:$0xff]  }
 0x194   :  { %10515 = vmatpush3.bf16.msra.mxu0 %v11488_v49 }
 0x195   :  { %10516 = vmatprep.subr.bf16.mxu0 %v11490_v51 }
 0x196   :  { %10537 = vmatpush3.bf16.msra.mxu1 %v11489_v50  ;;  %v10214_v56 = vpop.f32.mrb[20].mxu0  ;;  %v11527_v50 = vld [vmem:[%s14580_s1 + $0xdf0] sm:$0xff]  }
 0x197   :  { %v10215_v58 = vpop.f32.mrb[21].mxu0  ;;  %10538 = vmatprep.subr.bf16.mxu1 %v11491_v52  ;;  %v11528_v52 = vld [vmem:[%s14580_s1 + $0xd30] sm:$0xff]  }
 0x198   :  { %v10236_v60 = vpop.f32.mrb[20].mxu1  ;;  %v10216_v61 = vadd.f32 %v10215_v58, %v10214_v56  ;;  %v10217_v62 = vpop.f32.mrb[22].mxu0  ;;  %10517 = vmatpush3.bf16.msra.mxu0 %v11492_v53  ;;  %v11529_v56 = vld [vmem:[%s14580_s1 + $0xdb0] sm:$0xff]  }
 0x199   :  { %v10237_v0 = vpop.f32.mrb[21].mxu1  ;;  %v10218_v1 = vpop.f32.mrb[23].mxu0  ;;  %10518 = vmatprep.subr.bf16.mxu0 %v11494_v55 }
 0x19a   :  { %v7596_v4 = vadd.f32 %v10216_v61, %v13186_v26  ;;  %v10238_v5 = vadd.f32 %v10237_v0, %v10236_v60  ;;  %v10239_v6 = vpop.f32.mrb[22].mxu1  ;;  %10539 = vmatpush3.bf16.msra.mxu1 %v11493_v54  ;;  %v11506_v26 = vld [vmem:[%s14580_s1 + $0xd48] sm:$0xff]   ;;  %v11532_v1 = vld [vmem:[%s14580_s1 + $0xd38] sm:$0xff]  }
 0x19b   :  { %v10240_v10 = vpop.f32.mrb[23].mxu1  ;;  %10540 = vmatprep.subr.bf16.mxu1 %v11495_v57  ;;  %v11530_v57 = vld [vmem:[%s14580_s1 + $0xd78] sm:$0xff]   ;;  %v11536_v6 = vld [vmem:[%s14580_s1 + $0xec0] sm:$0xff]  }
 0x19c   :  { %v13291_v12 = vadd.f32 %v10238_v5, %v7596_v4  ;;  %10519 = vmatpush3.bf16.msra.mxu0 %v11496_v59  ;;  %v1973_v4 = vrot.slane %v13297_v15, %v12043_v41  ;;  %v11535_v5 = vld [vmem:[%s14580_s1 + $0xe40] sm:$0xff]   ;;  %v11539_v10 = vld [vmem:[%s14580_s1 + $0xe48] sm:$0xff]   ;;  %v11544_v15 = vld [vmem:[%s14580_s1 + $0xed0] sm:$0xff]  }
 0x19d   :  { %10520 = vmatprep.subr.bf16.mxu0 %v11498_v2 }
 0x19e   :  { %10541 = vmatpush3.bf16.msra.mxu1 %v11497_v63  ;;  %v11531_v63 = vld [vmem:[%s14580_s1 + $0xdf8] sm:$0xff]   ;;  %v1989_v9 = vcombine.high %v1973_v4, %v1973_v4 }
 0x19f   :  { %10542 = vmatprep.subr.bf16.mxu1 %v11499_v7  ;;  %v11537_v7 = vld [vmem:[%s14580_s1 + $0xe00] sm:$0xff]  }
 0x1a0   :  { %10521 = vmatpush3.bf16.msra.mxu0 %v11500_v11  ;;  %v11540_v11 = vld [vmem:[%s14580_s1 + $0xec8] sm:$0xff]  }
 0x1a1   :  { %10550 = vmatprep.subr.bf16.mxu0 %v11502_v17  ;;  %v11546_v17 = vld [vmem:[%s14580_s1 + $0xe90] sm:$0xff]  }
 0x1a2   :  { %10543 = vmatpush3.bf16.msra.mxu1 %v11501_v13  ;;  %v11542_v13 = vld [vmem:[%s14580_s1 + $0xe88] sm:$0xff]  }
 0x1a3   :  { %8154 = vmatmul.mubr.bf16.vlgmr.msra.gmra.mrb[48].mxu0 %v1966_v16  ;;  %10572 = vmatprep.subr.bf16.mxu1 %v11503_v19  ;;  %v11545_v16 = vld [vmem:[%s14580_s1 + $0xe10] sm:$0xff]   ;;  %v11548_v19 = vld [vmem:[%s14580_s1 + $0xed8] sm:$0xff]  }
 0x1a4   :  { %10551 = vmatpush3.bf16.msra.mxu0 %v11504_v21  ;;  %8233 = vmatprep.mubr.bf16.mxu0 %v1987_v24  ;;  %v11550_v21 = vld [vmem:[%s14580_s1 + $0xe98] sm:$0xff]   ;;  %v11553_v24 = vld [vmem:[%s14580_s1 + $0xe20] sm:$0xff]  }
 0x1a5   :  { %8194 = vmatmul.mubr.bf16.vlgmr.msra.gmra.mrb[48].mxu1 %v1988_v25  ;;  %10552 = vmatprep.subr.bf16.mxu0 %v11506_v26  ;;  %v11554_v25 = vld [vmem:[%s14580_s1 + $0xea0] sm:$0xff]   ;;  %v11555_v26 = vld [vmem:[%s14580_s1 + $0xe68] sm:$0xff]  }
 0x1a6   :  { %10573 = vmatpush3.bf16.msra.mxu1 %v11505_v23  ;;  %8273 = vmatprep.mubr.bf16.mxu1 %v1991_v28  ;;  %v11552_v23 = vld [vmem:[%s14580_s1 + $0xee0] sm:$0xff]   ;;  %v11557_v28 = vld [vmem:[%s14580_s1 + $0xe28] sm:$0xff]  }
 0x1a7   :  { %10574 = vmatprep.subr.bf16.mxu1 %v11507_v27  ;;  %v11556_v27 = vld [vmem:[%s14580_s1 + $0xee8] sm:$0xff]  }
 0x1a8   :  { %10553 = vmatpush3.bf16.msra.mxu0 %v11508_v29  ;;  %v11558_v29 = vld [vmem:[%s14580_s1 + $0xea8] sm:$0xff]  }
 0x1a9   :  { %10554 = vmatprep.subr.bf16.mxu0 %v11510_v31 }
 0x1aa   :  { %10575 = vmatpush3.bf16.msra.mxu1 %v11509_v30  ;;  %v11559_v30 = vld [vmem:[%s14580_s1 + $0xe70] sm:$0xff]  }
 0x1ab   :  { %10576 = vmatprep.subr.bf16.mxu1 %v11511_v32  ;;  %v11560_v32 = vld [vmem:[%s14580_s1 + $0xef0] sm:$0xff]  }
 0x1ac   :  { %10555 = vmatpush3.bf16.msra.mxu0 %v11512_v33 }
 0x1ad   :  { %10556 = vmatprep.subr.bf16.mxu0 %v11514_v35 }
 0x1ae   :  { %10577 = vmatpush3.bf16.msra.mxu1 %v11513_v34  ;;  %v11561_v34 = vld [vmem:[%s14580_s1 + $0xe30] sm:$0xff]  }
 0x1af   :  { %10578 = vmatprep.subr.bf16.mxu1 %v11515_v36 }
 0x1b0   :  { %10557 = vmatpush3.bf16.msra.mxu0 %v11516_v37 }
 0x1b1   :  { %10558 = vmatprep.subr.bf16.mxu0 %v11518_v39 }
 0x1b2   :  { %10579 = vmatpush3.bf16.msra.mxu1 %v11517_v38  ;;  %v11562_v38 = vld [vmem:[%s14580_s1 + $0xeb0] sm:$0xff]  }
 0x1b3   :  { %10580 = vmatprep.subr.bf16.mxu1 %v11519_v40 }
 0x1b4   :  { %10559 = vmatpush3.bf16.msra.mxu0 %v11520_v42  ;;  %v11563_v42 = vld [vmem:[%s14580_s1 + $0xe78] sm:$0xff]  }
 0x1b5   :  { %10560 = vmatprep.subr.bf16.mxu0 %v11522_v44 }
 0x1b6   :  { %10581 = vmatpush3.bf16.msra.mxu1 %v11521_v43  ;;  %v10258_v49 = vpop.f32.mrb[24].mxu0  ;;  %v11564_v43 = vld [vmem:[%s14580_s1 + $0xef8] sm:$0xff]  }
 0x1b7   :  { %v10259_v51 = vpop.f32.mrb[25].mxu0  ;;  %10582 = vmatprep.subr.bf16.mxu1 %v11523_v45 }
 0x1b8   :  { %v10280_v53 = vpop.f32.mrb[24].mxu1  ;;  %v10260_v54 = vadd.f32 %v10259_v51, %v10258_v49  ;;  %v10261_v55 = vpop.f32.mrb[26].mxu0  ;;  %10561 = vmatpush3.bf16.msra.mxu0 %v11524_v46  ;;  %v11565_v49 = vld [vmem:[%s14580_s1 + $0xe38] sm:$0xff]  }
 0x1b9   :  { %v10281_v58 = vpop.f32.mrb[25].mxu1  ;;  %v10262_v59 = vpop.f32.mrb[27].mxu0  ;;  %10562 = vmatprep.subr.bf16.mxu0 %v11526_v48 }
 0x1ba   :  { %v7676_v60 = vadd.f32 %v10260_v54, %v13291_v12  ;;  %v10282_v61 = vadd.f32 %v10281_v58, %v10280_v53  ;;  %v10283_v62 = vpop.f32.mrb[26].mxu1  ;;  %10583 = vmatpush3.bf16.msra.mxu1 %v11525_v47  ;;  %v11541_v12 = vld [vmem:[%s14580_s1 + $0xe08] sm:$0xff]   ;;  %v23_v47 = vld [vmem:[%s14579_s0 + $0x38] sm:$0xff]  ;;  %v11568_v58 = vld [vmem:[%s14580_s1 + $0xfc0] sm:$0xff]  }
 0x1bb   :  { %v10284_v0 = vpop.f32.mrb[27].mxu1  ;;  %10584 = vmatprep.subr.bf16.mxu1 %v11527_v50  ;;  %v1999_v50 = vrot.slane %v23_v47, %v12043_v41  ;;  %v1992_v51 = vcombine.high %v23_v47, %v23_v47  ;;  %v11566_v53 = vld [vmem:[%s14580_s1 + $0xeb8] sm:$0xff]   ;;  %v11570_v62 = vld [vmem:[%s14580_s1 + $0xf80] sm:$0xff]  }
 0x1bc   :  { %v13398_v2 = vadd.f32 %v10282_v61, %v7676_v60  ;;  %10563 = vmatpush3.bf16.msra.mxu0 %v11528_v52  ;;  %v11569_v60 = vld [vmem:[%s14580_s1 + $0xf00] sm:$0xff]  }
 0x1bd   :  { %10564 = vmatprep.subr.bf16.mxu0 %v11530_v57  ;;  %v2007_v54 = vcombine.high %v1999_v50, %v1999_v50  ;;  %v2015_v55 = vrot.slane %v1999_v50, %v12043_v41  ;;  %v13513_v57 = vrot.slane %v1992_v51, %v12043_v41  ;;  %v11602_v47 = vld [vmem:[%s14580_s1 + $0x1000] sm:$0xff]   ;;  %v11604_v50 = vld [vmem:[%s14580_s1 + $0x1048] sm:$0xff]  }
 0x1be   :  { %10585 = vmatpush3.bf16.msra.mxu1 %v11529_v56  ;;  %v11567_v56 = vld [vmem:[%s14580_s1 + $0xf40] sm:$0xff]   ;;  %v11605_v51 = vld [vmem:[%s14580_s1 + $0x10c8] sm:$0xff]  }
 0x1bf   :  { %10586 = vmatprep.subr.bf16.mxu1 %v11531_v63  ;;  %v2029_v59 = vrot.slane %v2007_v54, %v12043_v41  ;;  %v2008_v61 = vcombine.high %v13513_v57, %v13513_v57  ;;  %v2037_v0 = vcombine.high %v2015_v55, %v2015_v55  ;;  %v11608_v54 = vld [vmem:[%s14580_s1 + $0x1050] sm:$0xff]  }
 0x1c0   :  { %10565 = vmatpush3.bf16.msra.mxu0 %v11532_v1  ;;  %v11571_v1 = vld [vmem:[%s14580_s1 + $0xf48] sm:$0xff]  }
 0x1c1   :  { %10594 = vmatprep.subr.bf16.mxu0 %v11535_v5  ;;  %v2039_v63 = vcombine.high %v2029_v59, %v2029_v59 }
 0x1c2   :  { %10587 = vmatpush3.bf16.msra.mxu1 %v11533_v3  ;;  %v11572_v3 = vld [vmem:[%s14580_s1 + $0xfc8] sm:$0xff]  }
 0x1c3   :  { %8234 = vmatmul.mubr.bf16.vlgmr.msra.gmra.mrb[52].mxu0 %v1973_v4  ;;  %10616 = vmatprep.subr.bf16.mxu1 %v11536_v6  ;;  %v11573_v4 = vld [vmem:[%s14580_s1 + $0xf08] sm:$0xff]  }
 0x1c4   :  { %10595 = vmatpush3.bf16.msra.mxu0 %v11537_v7  ;;  %8313 = vmatprep.mubr.bf16.mxu0 %v2029_v59  ;;  %v11574_v6 = vld [vmem:[%s14580_s1 + $0xf88] sm:$0xff]   ;;  %v11575_v7 = vld [vmem:[%s14580_s1 + $0xf50] sm:$0xff]   ;;  %v11613_v59 = vld [vmem:[%s14580_s1 + $0x10d8] sm:$0xff]  }
 0x1c5   :  { %8274 = vmatmul.mubr.bf16.vlgmr.msra.gmra.mrb[52].mxu1 %v1989_v9  ;;  %10596 = vmatprep.subr.bf16.mxu0 %v11539_v10  ;;  %v11577_v9 = vld [vmem:[%s14580_s1 + $0xf10] sm:$0xff]  }
 0x1c6   :  { %10617 = vmatpush3.bf16.msra.mxu1 %v11538_v8  ;;  %8353 = vmatprep.mubr.bf16.mxu1 %v2039_v63  ;;  %v11576_v8 = vld [vmem:[%s14580_s1 + $0xfd0] sm:$0xff]   ;;  %v11617_v63 = vld [vmem:[%s14580_s1 + $0x10e0] sm:$0xff]  }
 0x1c7   :  { %10618 = vmatprep.subr.bf16.mxu1 %v11540_v11  ;;  %v11578_v10 = vld [vmem:[%s14580_s1 + $0xf90] sm:$0xff]   ;;  %v11579_v11 = vld [vmem:[%s14580_s1 + $0xf58] sm:$0xff]  }
 0x1c8   :  { %10597 = vmatpush3.bf16.msra.mxu0 %v11541_v12  ;;  %v11580_v12 = vld [vmem:[%s14580_s1 + $0xfd8] sm:$0xff]  }
 0x1c9   :  { %10598 = vmatprep.subr.bf16.mxu0 %v11543_v14  ;;  %v11582_v14 = vld [vmem:[%s14580_s1 + $0xf98] sm:$0xff]  }
 0x1ca   :  { %10619 = vmatpush3.bf16.msra.mxu1 %v11542_v13  ;;  %v11581_v13 = vld [vmem:[%s14580_s1 + $0xf18] sm:$0xff]  }
 0x1cb   :  { %10620 = vmatprep.subr.bf16.mxu1 %v11544_v15  ;;  %v11583_v15 = vld [vmem:[%s14580_s1 + $0xf60] sm:$0xff]  }
 0x1cc   :  { %10599 = vmatpush3.bf16.msra.mxu0 %v11545_v16  ;;  %v11584_v16 = vld [vmem:[%s14580_s1 + $0xfe0] sm:$0xff]  }
 0x1cd   :  { %10600 = vmatprep.subr.bf16.mxu0 %v11547_v18  ;;  %v11586_v18 = vld [vmem:[%s14580_s1 + $0xfa0] sm:$0xff]  }
 0x1ce   :  { %10621 = vmatpush3.bf16.msra.mxu1 %v11546_v17  ;;  %v11585_v17 = vld [vmem:[%s14580_s1 + $0xf20] sm:$0xff]  }
 0x1cf   :  { %10622 = vmatprep.subr.bf16.mxu1 %v11548_v19  ;;  %v11587_v19 = vld [vmem:[%s14580_s1 + $0xf68] sm:$0xff]  }
 0x1d0   :  { %10601 = vmatpush3.bf16.msra.mxu0 %v11549_v20  ;;  %v11588_v20 = vld [vmem:[%s14580_s1 + $0xfe8] sm:$0xff]  }
 0x1d1   :  { %10602 = vmatprep.subr.bf16.mxu0 %v11551_v22  ;;  %v11590_v22 = vld [vmem:[%s14580_s1 + $0xfa8] sm:$0xff]  }
 0x1d2   :  { %10623 = vmatpush3.bf16.msra.mxu1 %v11550_v21  ;;  %v11589_v21 = vld [vmem:[%s14580_s1 + $0xf28] sm:$0xff]  }
 0x1d3   :  { %10624 = vmatprep.subr.bf16.mxu1 %v11552_v23  ;;  %v11591_v23 = vld [vmem:[%s14580_s1 + $0xf70] sm:$0xff]  }
 0x1d4   :  { %10603 = vmatpush3.bf16.msra.mxu0 %v11553_v24 }
 0x1d5   :  { %10604 = vmatprep.subr.bf16.mxu0 %v11555_v26 }
 0x1d6   :  { %10625 = vmatpush3.bf16.msra.mxu1 %v11554_v25  ;;  %v10302_v31 = vpop.f32.mrb[28].mxu0  ;;  %v11592_v25 = vld [vmem:[%s14580_s1 + $0xff0] sm:$0xff]  }
 0x1d7   :  { %v10303_v33 = vpop.f32.mrb[29].mxu0  ;;  %10626 = vmatprep.subr.bf16.mxu1 %v11556_v27  ;;  %v11593_v27 = vld [vmem:[%s14580_s1 + $0xf30] sm:$0xff]  }
 0x1d8   :  { %v10324_v35 = vpop.f32.mrb[28].mxu1  ;;  %v10304_v36 = vadd.f32 %v10303_v33, %v10302_v31  ;;  %v10305_v37 = vpop.f32.mrb[30].mxu0  ;;  %10605 = vmatpush3.bf16.msra.mxu0 %v11557_v28  ;;  %v11594_v31 = vld [vmem:[%s14580_s1 + $0xfb0] sm:$0xff]  }
 0x1d9   :  { %v10325_v39 = vpop.f32.mrb[29].mxu1  ;;  %v10306_v40 = vpop.f32.mrb[31].mxu0  ;;  %10606 = vmatprep.subr.bf16.mxu0 %v11559_v30 }
 0x1da   :  { %v7756_v44 = vadd.f32 %v10304_v36, %v13398_v2  ;;  %v10326_v45 = vadd.f32 %v10325_v39, %v10324_v35  ;;  %v10327_v46 = vpop.f32.mrb[30].mxu1  ;;  %10627 = vmatpush3.bf16.msra.mxu1 %v11558_v29  ;;  %v2036_v2 = vrot.slane %v2008_v61, %v12043_v41  ;;  %v11597_v40 = vld [vmem:[%s14580_s1 + $0xf38] sm:$0xff]  }
 0x1db   :  { %v10328_v48 = vpop.f32.mrb[31].mxu1  ;;  %10628 = vmatprep.subr.bf16.mxu1 %v11560_v32  ;;  %v11595_v32 = vld [vmem:[%s14580_s1 + $0xf78] sm:$0xff]   ;;  %v11601_v46 = vld [vmem:[%s14580_s1 + $0x10c0] sm:$0xff]  }
 0x1dc   :  { %v13503_v52 = vadd.f32 %v10326_v45, %v7756_v44  ;;  %10607 = vmatpush3.bf16.msra.mxu0 %v11561_v34  ;;  %v2040_v5 = vcombine.high %v2036_v2, %v2036_v2  ;;  %v2022_v44 = vrot.slane %v13513_v57, %v12043_v41  ;;  %v11600_v45 = vld [vmem:[%s14580_s1 + $0x1040] sm:$0xff]   ;;  %v11611_v57 = vld [vmem:[%s14580_s1 + $0x1090] sm:$0xff]   ;;  %v11615_v61 = vld [vmem:[%s14580_s1 + $0x1098] sm:$0xff]  }
 0x1dd   :  { %10608 = vmatprep.subr.bf16.mxu0 %v11563_v42  ;;  %v11603_v48 = vld [vmem:[%s14580_s1 + $0x1080] sm:$0xff]  }
 0x1de   :  { %10629 = vmatpush3.bf16.msra.mxu1 %v11562_v38  ;;  %v11596_v38 = vld [vmem:[%s14580_s1 + $0xff8] sm:$0xff]  }
 0x1df   :  { %10630 = vmatprep.subr.bf16.mxu1 %v11564_v43  ;;  %v11598_v43 = vld [vmem:[%s14580_s1 + $0xfb8] sm:$0xff]  }
 0x1e0   :  { %10609 = vmatpush3.bf16.msra.mxu0 %v11565_v49  ;;  %v2038_v49 = vcombine.high %v2022_v44, %v2022_v44 }
 0x1e1   :  { %10638 = vmatprep.subr.bf16.mxu0 %v11567_v56  ;;  %v11610_v56 = vld [vmem:[%s14580_s1 + $0x1010] sm:$0xff]  }
 0x1e2   :  { %10631 = vmatpush3.bf16.msra.mxu1 %v11566_v53  ;;  %v11607_v53 = vld [vmem:[%s14580_s1 + $0x1088] sm:$0xff]  }
 0x1e3   :  { %8314 = vmatmul.mubr.bf16.vlgmr.msra.gmra.mrb[56].mxu0 %v2015_v55  ;;  %10660 = vmatprep.subr.bf16.mxu1 %v11568_v58  ;;  %v11609_v55 = vld [vmem:[%s14580_s1 + $0x10d0] sm:$0xff]   ;;  %v11612_v58 = vld [vmem:[%s14580_s1 + $0x1058] sm:$0xff]  }
 0x1e4   :  { %10639 = vmatpush3.bf16.msra.mxu0 %v11569_v60  ;;  %8393 = vmatprep.mubr.bf16.mxu0 %v2036_v2  ;;  %v11614_v60 = vld [vmem:[%s14580_s1 + $0x1018] sm:$0xff]   ;;  %v11620_v2 = vld [vmem:[%s14580_s1 + $0x1068] sm:$0xff]  }
 0x1e5   :  { %8354 = vmatmul.mubr.bf16.vlgmr.msra.gmra.mrb[56].mxu1 %v2037_v0  ;;  %10640 = vmatprep.subr.bf16.mxu0 %v11571_v1  ;;  %v11618_v0 = vld [vmem:[%s14580_s1 + $0x1020] sm:$0xff]  }
 0x1e6   :  { %10661 = vmatpush3.bf16.msra.mxu1 %v11570_v62  ;;  %8433 = vmatprep.mubr.bf16.mxu1 %v2040_v5  ;;  %v11616_v62 = vld [vmem:[%s14580_s1 + $0x1060] sm:$0xff]   ;;  %v11623_v5 = vld [vmem:[%s14580_s1 + $0x10a8] sm:$0xff]  }
 0x1e7   :  { %10662 = vmatprep.subr.bf16.mxu1 %v11572_v3  ;;  %v11619_v1 = vld [vmem:[%s14580_s1 + $0x10a0] sm:$0xff]   ;;  %v11621_v3 = vld [vmem:[%s14580_s1 + $0x10e8] sm:$0xff]  }
 0x1e8   :  { %10641 = vmatpush3.bf16.msra.mxu0 %v11573_v4  ;;  %v11622_v4 = vld [vmem:[%s14580_s1 + $0x1028] sm:$0xff]  }
 0x1e9   :  { %10642 = vmatprep.subr.bf16.mxu0 %v11575_v7 }
 0x1ea   :  { %10663 = vmatpush3.bf16.msra.mxu1 %v11574_v6  ;;  %v11624_v6 = vld [vmem:[%s14580_s1 + $0x1070] sm:$0xff]  }
 0x1eb   :  { %10664 = vmatprep.subr.bf16.mxu1 %v11576_v8  ;;  %v11625_v8 = vld [vmem:[%s14580_s1 + $0x10f0] sm:$0xff]  }
 0x1ec   :  { %10643 = vmatpush3.bf16.msra.mxu0 %v11577_v9 }
 0x1ed   :  { %10644 = vmatprep.subr.bf16.mxu0 %v11579_v11 }
 0x1ee   :  { %10665 = vmatpush3.bf16.msra.mxu1 %v11578_v10  ;;  %v11626_v10 = vld [vmem:[%s14580_s1 + $0x1030] sm:$0xff]  }
 0x1ef   :  { %10666 = vmatprep.subr.bf16.mxu1 %v11580_v12 }
 0x1f0   :  { %10645 = vmatpush3.bf16.msra.mxu0 %v11581_v13 }
 0x1f1   :  { %10646 = vmatprep.subr.bf16.mxu0 %v11583_v15 }
 0x1f2   :  { %10667 = vmatpush3.bf16.msra.mxu1 %v11582_v14  ;;  %v11627_v14 = vld [vmem:[%s14580_s1 + $0x10b0] sm:$0xff]  }
 0x1f3   :  { %10668 = vmatprep.subr.bf16.mxu1 %v11584_v16 }
 0x1f4   :  { %10647 = vmatpush3.bf16.msra.mxu0 %v11585_v17  ;;  %v11628_v17 = vld [vmem:[%s14580_s1 + $0x1078] sm:$0xff]  }
 0x1f5   :  { %10648 = vmatprep.subr.bf16.mxu0 %v11587_v19 }
 0x1f6   :  { %10669 = vmatpush3.bf16.msra.mxu1 %v11586_v18  ;;  %v10346_v24 = vpop.f32.mrb[32].mxu0  ;;  %v11629_v18 = vld [vmem:[%s14580_s1 + $0x10f8] sm:$0xff]  }
 0x1f7   :  { %v10347_v26 = vpop.f32.mrb[33].mxu0  ;;  %10670 = vmatprep.subr.bf16.mxu1 %v11588_v20 }
 0x1f8   :  { %v10368_v28 = vpop.f32.mrb[32].mxu1  ;;  %v10348_v29 = vadd.f32 %v10347_v26, %v10346_v24  ;;  %v10349_v30 = vpop.f32.mrb[34].mxu0  ;;  %10649 = vmatpush3.bf16.msra.mxu0 %v11589_v21  ;;  %v24_v24 = vld [vmem:[%s14579_s0 + $0x40] sm:$0xff]  ;;  %v11631_v26 = vld [vmem:[%s14580_s1 + $0x10b8] sm:$0xff]  }
 0x1f9   :  { %v10369_v33 = vpop.f32.mrb[33].mxu1  ;;  %v10350_v34 = vpop.f32.mrb[35].mxu0  ;;  %10650 = vmatprep.subr.bf16.mxu0 %v11591_v23 }
 0x1fa   :  { %v7836_v35 = vadd.f32 %v10348_v29, %v13503_v52  ;;  %v10370_v36 = vadd.f32 %v10369_v33, %v10368_v28  ;;  %v10371_v37 = vpop.f32.mrb[34].mxu1  ;;  %10671 = vmatpush3.bf16.msra.mxu1 %v11590_v22  ;;  %v11606_v52 = vld [vmem:[%s14580_s1 + $0x1008] sm:$0xff]   ;;  %v11630_v22 = vld [vmem:[%s14580_s1 + $0x1038] sm:$0xff]   ;;  %v2041_v28 = vcombine.high %v24_v24, %v24_v24  ;;  %v11632_v29 = vld [vmem:[%s14580_s1 + $0x1140] sm:$0xff]  }
 0x1fb   :  { %v10372_v39 = vpop.f32.mrb[35].mxu1  ;;  %10672 = vmatprep.subr.bf16.mxu1 %v11592_v25  ;;  %v11634_v34 = vld [vmem:[%s14580_s1 + $0x1100] sm:$0xff]  }
 0x1fc   :  { %v13610_v42 = vadd.f32 %v10370_v36, %v7836_v35  ;;  %10651 = vmatpush3.bf16.msra.mxu0 %v11593_v27  ;;  %v2048_v27 = vrot.slane %v24_v24, %v12043_v41  ;;  %v13728_v33 = vrot.slane %v2041_v28, %v12043_v41  ;;  %v11635_v36 = vld [vmem:[%s14580_s1 + $0x1180] sm:$0xff]   ;;  %v11636_v39 = vld [vmem:[%s14580_s1 + $0x1148] sm:$0xff]  }
 0x1fd   :  { %10652 = vmatprep.subr.bf16.mxu0 %v11595_v32  ;;  %v11633_v32 = vld [vmem:[%s14580_s1 + $0x11c0] sm:$0xff]   ;;  %v11672_v28 = vld [vmem:[%s14580_s1 + $0x1288] sm:$0xff]  }
 0x1fe   :  { %10673 = vmatpush3.bf16.msra.mxu1 %v11594_v31  ;;  %v2056_v30 = vcombine.high %v2048_v27, %v2048_v27  ;;  %v2064_v31 = vrot.slane %v2048_v27, %v12043_v41  ;;  %v2057_v37 = vcombine.high %v13728_v33, %v13728_v33  ;;  %v11671_v27 = vld [vmem:[%s14580_s1 + $0x1208] sm:$0xff]  }
 0x1ff   :  { %10674 = vmatprep.subr.bf16.mxu1 %v11596_v38 }
 0x200   :  { %10653 = vmatpush3.bf16.msra.mxu0 %v11597_v40  ;;  %v2078_v35 = vrot.slane %v2056_v30, %v12043_v41  ;;  %v2086_v38 = vcombine.high %v2064_v31, %v2064_v31  ;;  %v11674_v30 = vld [vmem:[%s14580_s1 + $0x12d0] sm:$0xff]  }
 0x201   :  { %10682 = vmatprep.subr.bf16.mxu0 %v11600_v45  ;;  %v11639_v45 = vld [vmem:[%s14580_s1 + $0x1188] sm:$0xff]  }
 0x202   :  { %10675 = vmatpush3.bf16.msra.mxu1 %v11598_v43  ;;  %v2088_v40 = vcombine.high %v2078_v35, %v2078_v35  ;;  %v2085_v43 = vrot.slane %v2057_v37, %v12043_v41  ;;  %v11681_v37 = vld [vmem:[%s14580_s1 + $0x1260] sm:$0xff]  }
 0x203   :  { %8394 = vmatmul.mubr.bf16.vlgmr.msra.gmra.mrb[60].mxu0 %v2022_v44  ;;  %10704 = vmatprep.subr.bf16.mxu1 %v11601_v46  ;;  %v11638_v44 = vld [vmem:[%s14580_s1 + $0x1108] sm:$0xff]  }
 0x204   :  { %10683 = vmatpush3.bf16.msra.mxu0 %v11602_v47  ;;  %8473 = vmatprep.mubr.bf16.mxu0 %v2078_v35  ;;  %v2089_v46 = vcombine.high %v2085_v43, %v2085_v43  ;;  %v11640_v47 = vld [vmem:[%s14580_s1 + $0x1150] sm:$0xff]   ;;  %v11679_v35 = vld [vmem:[%s14580_s1 + $0x1218] sm:$0xff]  }
 0x205   :  { %8434 = vmatmul.mubr.bf16.vlgmr.msra.gmra.mrb[60].mxu1 %v2038_v49  ;;  %10684 = vmatprep.subr.bf16.mxu0 %v11604_v50  ;;  %v11642_v49 = vld [vmem:[%s14580_s1 + $0x1110] sm:$0xff]  }
 0x206   :  { %10705 = vmatpush3.bf16.msra.mxu1 %v11603_v48  ;;  %8513 = vmatprep.mubr.bf16.mxu1 %v2088_v40  ;;  %v11641_v48 = vld [vmem:[%s14580_s1 + $0x11d0] sm:$0xff]   ;;  %v11684_v40 = vld [vmem:[%s14580_s1 + $0x12a0] sm:$0xff]  }
 0x207   :  { %10706 = vmatprep.subr.bf16.mxu1 %v11605_v51  ;;  %v11643_v50 = vld [vmem:[%s14580_s1 + $0x1190] sm:$0xff]   ;;  %v11644_v51 = vld [vmem:[%s14580_s1 + $0x1158] sm:$0xff]  }
 0x208   :  { %10685 = vmatpush3.bf16.msra.mxu0 %v11606_v52  ;;  %v11645_v52 = vld [vmem:[%s14580_s1 + $0x11d8] sm:$0xff]  }
 0x209   :  { %10686 = vmatprep.subr.bf16.mxu0 %v11608_v54  ;;  %v11647_v54 = vld [vmem:[%s14580_s1 + $0x1198] sm:$0xff]  }
 0x20a   :  { %10707 = vmatpush3.bf16.msra.mxu1 %v11607_v53  ;;  %v11646_v53 = vld [vmem:[%s14580_s1 + $0x1118] sm:$0xff]  }
 0x20b   :  { %10708 = vmatprep.subr.bf16.mxu1 %v11609_v55  ;;  %v11648_v55 = vld [vmem:[%s14580_s1 + $0x1160] sm:$0xff]  }
 0x20c   :  { %10687 = vmatpush3.bf16.msra.mxu0 %v11610_v56  ;;  %v11649_v56 = vld [vmem:[%s14580_s1 + $0x11e0] sm:$0xff]  }
 0x20d   :  { %10688 = vmatprep.subr.bf16.mxu0 %v11612_v58  ;;  %v11651_v58 = vld [vmem:[%s14580_s1 + $0x11a0] sm:$0xff]  }
 0x20e   :  { %10709 = vmatpush3.bf16.msra.mxu1 %v11611_v57  ;;  %v11650_v57 = vld [vmem:[%s14580_s1 + $0x1120] sm:$0xff]  }
 0x20f   :  { %10710 = vmatprep.subr.bf16.mxu1 %v11613_v59  ;;  %v11652_v59 = vld [vmem:[%s14580_s1 + $0x1168] sm:$0xff]  }
 0x210   :  { %10689 = vmatpush3.bf16.msra.mxu0 %v11614_v60  ;;  %v11653_v60 = vld [vmem:[%s14580_s1 + $0x11e8] sm:$0xff]  }
 0x211   :  { %10690 = vmatprep.subr.bf16.mxu0 %v11616_v62  ;;  %v11655_v62 = vld [vmem:[%s14580_s1 + $0x11a8] sm:$0xff]  }
 0x212   :  { %10711 = vmatpush3.bf16.msra.mxu1 %v11615_v61  ;;  %v11654_v61 = vld [vmem:[%s14580_s1 + $0x1128] sm:$0xff]  }
 0x213   :  { %10712 = vmatprep.subr.bf16.mxu1 %v11617_v63  ;;  %v11656_v63 = vld [vmem:[%s14580_s1 + $0x1170] sm:$0xff]  }
 0x214   :  { %10691 = vmatpush3.bf16.msra.mxu0 %v11618_v0 }
 0x215   :  { %10692 = vmatprep.subr.bf16.mxu0 %v11620_v2 }
 0x216   :  { %10713 = vmatpush3.bf16.msra.mxu1 %v11619_v1  ;;  %v10390_v7 = vpop.f32.mrb[36].mxu0  ;;  %v11657_v1 = vld [vmem:[%s14580_s1 + $0x11f0] sm:$0xff]  }
 0x217   :  { %v10391_v9 = vpop.f32.mrb[37].mxu0  ;;  %10714 = vmatprep.subr.bf16.mxu1 %v11621_v3  ;;  %v11658_v3 = vld [vmem:[%s14580_s1 + $0x1130] sm:$0xff]  }
 0x218   :  { %v10412_v11 = vpop.f32.mrb[36].mxu1  ;;  %v10392_v12 = vadd.f32 %v10391_v9, %v10390_v7  ;;  %v10393_v13 = vpop.f32.mrb[38].mxu0  ;;  %10693 = vmatpush3.bf16.msra.mxu0 %v11622_v4  ;;  %v11659_v7 = vld [vmem:[%s14580_s1 + $0x11b0] sm:$0xff]  }
 0x219   :  { %v10413_v15 = vpop.f32.mrb[37].mxu1  ;;  %v10394_v16 = vpop.f32.mrb[39].mxu0  ;;  %10694 = vmatprep.subr.bf16.mxu0 %v11624_v6 }
 0x21a   :  { %v7916_v19 = vadd.f32 %v10392_v12, %v13610_v42  ;;  %v10414_v20 = vadd.f32 %v10413_v15, %v10412_v11  ;;  %v10415_v21 = vpop.f32.mrb[38].mxu1  ;;  %10715 = vmatpush3.bf16.msra.mxu1 %v11623_v5  ;;  %v11637_v42 = vld [vmem:[%s14580_s1 + $0x11c8] sm:$0xff]   ;;  %v11662_v16 = vld [vmem:[%s14580_s1 + $0x1138] sm:$0xff]  }
 0x21b   :  { %v10416_v23 = vpop.f32.mrb[39].mxu1  ;;  %10716 = vmatprep.subr.bf16.mxu1 %v11625_v8  ;;  %v11660_v8 = vld [vmem:[%s14580_s1 + $0x1178] sm:$0xff]   ;;  %v11666_v21 = vld [vmem:[%s14580_s1 + $0x12c0] sm:$0xff]  }
 0x21c   :  { %v13714_v25 = vadd.f32 %v10414_v20, %v7916_v19  ;;  %10695 = vmatpush3.bf16.msra.mxu0 %v11626_v10  ;;  %v2071_v19 = vrot.slane %v13728_v33, %v12043_v41  ;;  %v11665_v20 = vld [vmem:[%s14580_s1 + $0x1240] sm:$0xff]   ;;  %v11677_v33 = vld [vmem:[%s14580_s1 + $0x1258] sm:$0xff]  }
 0x21d   :  { %10696 = vmatprep.subr.bf16.mxu0 %v11628_v17  ;;  %v11668_v23 = vld [vmem:[%s14580_s1 + $0x1280] sm:$0xff]  }
 0x21e   :  { %10717 = vmatpush3.bf16.msra.mxu1 %v11627_v14  ;;  %v11661_v14 = vld [vmem:[%s14580_s1 + $0x11f8] sm:$0xff]   ;;  %v2087_v24 = vcombine.high %v2071_v19, %v2071_v19 }
 0x21f   :  { %10718 = vmatprep.subr.bf16.mxu1 %v11629_v18  ;;  %v11663_v18 = vld [vmem:[%s14580_s1 + $0x11b8] sm:$0xff]  }
 0x220   :  { %10697 = vmatpush3.bf16.msra.mxu0 %v11630_v22  ;;  %v11667_v22 = vld [vmem:[%s14580_s1 + $0x1200] sm:$0xff]  }
 0x221   :  { %10726 = vmatprep.subr.bf16.mxu0 %v11632_v29  ;;  %v11673_v29 = vld [vmem:[%s14580_s1 + $0x1250] sm:$0xff]  }
 0x222   :  { %10719 = vmatpush3.bf16.msra.mxu1 %v11631_v26  ;;  %v11670_v26 = vld [vmem:[%s14580_s1 + $0x12c8] sm:$0xff]  }
 0x223   :  { %8474 = vmatmul.mubr.bf16.vlgmr.msra.gmra.mrb[64].mxu0 %v2064_v31  ;;  %10748 = vmatprep.subr.bf16.mxu1 %v11633_v32  ;;  %v11675_v31 = vld [vmem:[%s14580_s1 + $0x1210] sm:$0xff]  }
 0x224   :  { %10727 = vmatpush3.bf16.msra.mxu0 %v11634_v34  ;;  %8553 = vmatprep.mubr.bf16.mxu0 %v2085_v43  ;;  %v11676_v32 = vld [vmem:[%s14580_s1 + $0x1290] sm:$0xff]   ;;  %v11678_v34 = vld [vmem:[%s14580_s1 + $0x12d8] sm:$0xff]   ;;  %v11686_v43 = vld [vmem:[%s14580_s1 + $0x12e8] sm:$0xff]  }
 0x225   :  { %8514 = vmatmul.mubr.bf16.vlgmr.msra.gmra.mrb[64].mxu1 %v2086_v38  ;;  %10728 = vmatprep.subr.bf16.mxu0 %v11636_v39  ;;  %v11682_v38 = vld [vmem:[%s14580_s1 + $0x12e0] sm:$0xff]  }
 0x226   :  { %10749 = vmatpush3.bf16.msra.mxu1 %v11635_v36  ;;  %8593 = vmatprep.mubr.bf16.mxu1 %v2089_v46  ;;  %v11680_v36 = vld [vmem:[%s14580_s1 + $0x1298] sm:$0xff]   ;;  %v11683_v39 = vld [vmem:[%s14580_s1 + $0x1220] sm:$0xff]   ;;  %v11689_v46 = vld [vmem:[%s14580_s1 + $0x1270] sm:$0xff]  }
 0x227   :  { %10750 = vmatprep.subr.bf16.mxu1 %v11637_v42  ;;  %v11685_v42 = vld [vmem:[%s14580_s1 + $0x1268] sm:$0xff]  }
 0x228   :  { %10729 = vmatpush3.bf16.msra.mxu0 %v11638_v44  ;;  %v11687_v44 = vld [vmem:[%s14580_s1 + $0x1228] sm:$0xff]  }
 0x229   :  { %10730 = vmatprep.subr.bf16.mxu0 %v11640_v47 }
 0x22a   :  { %10751 = vmatpush3.bf16.msra.mxu1 %v11639_v45  ;;  %v11688_v45 = vld [vmem:[%s14580_s1 + $0x12a8] sm:$0xff]  }
 0x22b   :  { %10752 = vmatprep.subr.bf16.mxu1 %v11641_v48  ;;  %v11690_v48 = vld [vmem:[%s14580_s1 + $0x12f0] sm:$0xff]  }
 0x22c   :  { %10731 = vmatpush3.bf16.msra.mxu0 %v11642_v49 }
 0x22d   :  { %10732 = vmatprep.subr.bf16.mxu0 %v11644_v51 }
 0x22e   :  { %10753 = vmatpush3.bf16.msra.mxu1 %v11643_v50  ;;  %v11691_v50 = vld [vmem:[%s14580_s1 + $0x1230] sm:$0xff]  }
 0x22f   :  { %10754 = vmatprep.subr.bf16.mxu1 %v11645_v52 }
 0x230   :  { %10733 = vmatpush3.bf16.msra.mxu0 %v11646_v53 }
 0x231   :  { %10734 = vmatprep.subr.bf16.mxu0 %v11648_v55 }
 0x232   :  { %10755 = vmatpush3.bf16.msra.mxu1 %v11647_v54 }
 0x233   :  { %10756 = vmatprep.subr.bf16.mxu1 %v11649_v56  ;;  %v11692_v56 = vld [vmem:[%s14580_s1 + $0x12b0] sm:$0xff]  }
 0x234   :  { %10735 = vmatpush3.bf16.msra.mxu0 %v11650_v57  ;;  %v11693_v57 = vld [vmem:[%s14580_s1 + $0x1278] sm:$0xff]  }
 0x235   :  { %10736 = vmatprep.subr.bf16.mxu0 %v11652_v59 }
 0x236   :  { %10757 = vmatpush3.bf16.msra.mxu1 %v11651_v58  ;;  %v10434_v0 = vpop.f32.mrb[40].mxu0 }
 0x237   :  { %v10435_v2 = vpop.f32.mrb[41].mxu0  ;;  %10758 = vmatprep.subr.bf16.mxu1 %v11653_v60 }
 0x238   :  { %v10456_v4 = vpop.f32.mrb[40].mxu1  ;;  %v10436_v5 = vadd.f32 %v10435_v2, %v10434_v0  ;;  %v10437_v6 = vpop.f32.mrb[42].mxu0  ;;  %10737 = vmatpush3.bf16.msra.mxu0 %v11654_v61  ;;  %v11694_v61 = vld [vmem:[%s14580_s1 + $0x12f8] sm:$0xff]  }
 0x239   :  { %v10457_v9 = vpop.f32.mrb[41].mxu1  ;;  %v10438_v10 = vpop.f32.mrb[43].mxu0  ;;  %10738 = vmatprep.subr.bf16.mxu0 %v11656_v63  ;;  %v11695_v63 = vld [vmem:[%s14580_s1 + $0x1238] sm:$0xff]  }
 0x23a   :  { %v7996_v11 = vadd.f32 %v10436_v5, %v13714_v25  ;;  %v10458_v12 = vadd.f32 %v10457_v9, %v10456_v4  ;;  %v10459_v13 = vpop.f32.mrb[42].mxu1  ;;  %10759 = vmatpush3.bf16.msra.mxu1 %v11655_v62  ;;  %v11669_v25 = vld [vmem:[%s14580_s1 + $0x1248] sm:$0xff]   ;;  %v11696_v5 = vld [vmem:[%s14580_s1 + $0x12b8] sm:$0xff]  }
 0x23b   :  { %v10460_v15 = vpop.f32.mrb[43].mxu1  ;;  %10760 = vmatprep.subr.bf16.mxu1 %v11657_v1  ;;  %v25_v1 = vld [vmem:[%s14579_s0 + $0x48] sm:$0xff] }
 0x23c   :  { %v13822_v17 = vadd.f32 %v10458_v12, %v7996_v11  ;;  %10739 = vmatpush3.bf16.msra.mxu0 %v11658_v3  ;;  %v2097_v2 = vrot.slane %v25_v1, %v12043_v41  ;;  %v11697_v3 = vld [vmem:[%s14580_s1 + $0x1340] sm:$0xff]   ;;  %v2090_v4 = vcombine.high %v25_v1, %v25_v1  ;;  %v11734_v1 = vld [vmem:[%s14580_s1 + $0x1448] sm:$0xff]  }
 0x23d   :  { %10740 = vmatprep.subr.bf16.mxu0 %v11660_v8  ;;  %v11698_v8 = vld [vmem:[%s14580_s1 + $0x13c0] sm:$0xff]  }
 0x23e   :  { %10761 = vmatpush3.bf16.msra.mxu1 %v11659_v7  ;;  %v2105_v6 = vcombine.high %v2097_v2, %v2097_v2  ;;  %v2113_v7 = vrot.slane %v2097_v2, %v12043_v41  ;;  %v13940_v9 = vrot.slane %v2090_v4, %v12043_v41  ;;  %v11699_v11 = vld [vmem:[%s14580_s1 + $0x1300] sm:$0xff]   ;;  %v11735_v2 = vld [vmem:[%s14580_s1 + $0x14c8] sm:$0xff]  }
 0x23f   :  { %10762 = vmatprep.subr.bf16.mxu1 %v11661_v14  ;;  %v11701_v14 = vld [vmem:[%s14580_s1 + $0x1348] sm:$0xff]  }
 0x240   :  { %10741 = vmatpush3.bf16.msra.mxu0 %v11662_v16  ;;  %v2127_v10 = vrot.slane %v2105_v6, %v12043_v41  ;;  %v2106_v12 = vcombine.high %v13940_v9, %v13940_v9  ;;  %v2135_v13 = vcombine.high %v2113_v7, %v2113_v7  ;;  %v11700_v16 = vld [vmem:[%s14580_s1 + $0x1380] sm:$0xff]   ;;  %v11737_v4 = vld [vmem:[%s14580_s1 + $0x1488] sm:$0xff]   ;;  %v11739_v6 = vld [vmem:[%s14580_s1 + $0x14d0] sm:$0xff]  }
 0x241   :  { %10770 = vmatprep.subr.bf16.mxu0 %v11665_v20 }
 0x242   :  { %10763 = vmatpush3.bf16.msra.mxu1 %v11663_v18  ;;  %v2137_v15 = vcombine.high %v2127_v10, %v2127_v10  ;;  %v11702_v18 = vld [vmem:[%s14580_s1 + $0x13c8] sm:$0xff]  }
 0x243   :  { %8554 = vmatmul.mubr.bf16.vlgmr.msra.gmra.mrb[68].mxu0 %v2071_v19  ;;  %10792 = vmatprep.subr.bf16.mxu1 %v11666_v21  ;;  %v11703_v19 = vld [vmem:[%s14580_s1 + $0x1308] sm:$0xff]   ;;  %v11705_v21 = vld [vmem:[%s14580_s1 + $0x1350] sm:$0xff]  }
 0x244   :  { %10771 = vmatpush3.bf16.msra.mxu0 %v11667_v22  ;;  %8633 = vmatprep.mubr.bf16.mxu0 %v2127_v10  ;;  %v11704_v22 = vld [vmem:[%s14580_s1 + $0x1388] sm:$0xff]   ;;  %v11743_v10 = vld [vmem:[%s14580_s1 + $0x14d8] sm:$0xff]  }
 0x245   :  { %8594 = vmatmul.mubr.bf16.vlgmr.msra.gmra.mrb[68].mxu1 %v2087_v24  ;;  %10772 = vmatprep.subr.bf16.mxu0 %v11669_v25  ;;  %v11707_v24 = vld [vmem:[%s14580_s1 + $0x1310] sm:$0xff]   ;;  %v11709_v25 = vld [vmem:[%s14580_s1 + $0x1358] sm:$0xff]  }
 0x246   :  { %10793 = vmatpush3.bf16.msra.mxu1 %v11668_v23  ;;  %8673 = vmatprep.mubr.bf16.mxu1 %v2137_v15  ;;  %v11706_v23 = vld [vmem:[%s14580_s1 + $0x13d0] sm:$0xff]   ;;  %v11748_v15 = vld [vmem:[%s14580_s1 + $0x1420] sm:$0xff]  }
 0x247   :  { %10794 = vmatprep.subr.bf16.mxu1 %v11670_v26  ;;  %v11708_v26 = vld [vmem:[%s14580_s1 + $0x1390] sm:$0xff]  }
 0x248   :  { %10773 = vmatpush3.bf16.msra.mxu0 %v11671_v27  ;;  %v11710_v27 = vld [vmem:[%s14580_s1 + $0x13d8] sm:$0xff]  }
 0x249   :  { %10774 = vmatprep.subr.bf16.mxu0 %v11673_v29  ;;  %v11713_v29 = vld [vmem:[%s14580_s1 + $0x1360] sm:$0xff]  }
 0x24a   :  { %10795 = vmatpush3.bf16.msra.mxu1 %v11672_v28  ;;  %v11711_v28 = vld [vmem:[%s14580_s1 + $0x1318] sm:$0xff]  }
 0x24b   :  { %10796 = vmatprep.subr.bf16.mxu1 %v11674_v30  ;;  %v11712_v30 = vld [vmem:[%s14580_s1 + $0x1398] sm:$0xff]  }
 0x24c   :  { %10775 = vmatpush3.bf16.msra.mxu0 %v11675_v31  ;;  %v11714_v31 = vld [vmem:[%s14580_s1 + $0x13e0] sm:$0xff]  }
 0x24d   :  { %10776 = vmatprep.subr.bf16.mxu0 %v11677_v33  ;;  %v11717_v33 = vld [vmem:[%s14580_s1 + $0x1368] sm:$0xff]  }
 0x24e   :  { %10797 = vmatpush3.bf16.msra.mxu1 %v11676_v32  ;;  %v11715_v32 = vld [vmem:[%s14580_s1 + $0x1320] sm:$0xff]  }
 0x24f   :  { %10798 = vmatprep.subr.bf16.mxu1 %v11678_v34  ;;  %v11716_v34 = vld [vmem:[%s14580_s1 + $0x13a0] sm:$0xff]  }
 0x250   :  { %10777 = vmatpush3.bf16.msra.mxu0 %v11679_v35  ;;  %v11718_v35 = vld [vmem:[%s14580_s1 + $0x13e8] sm:$0xff]  }
 0x251   :  { %10778 = vmatprep.subr.bf16.mxu0 %v11681_v37 }
 0x252   :  { %10799 = vmatpush3.bf16.msra.mxu1 %v11680_v36  ;;  %v11719_v36 = vld [vmem:[%s14580_s1 + $0x1328] sm:$0xff]  }
 0x253   :  { %10800 = vmatprep.subr.bf16.mxu1 %v11682_v38  ;;  %v11721_v38 = vld [vmem:[%s14580_s1 + $0x1370] sm:$0xff]  }
 0x254   :  { %10779 = vmatpush3.bf16.msra.mxu0 %v11683_v39 }
 0x255   :  { %10780 = vmatprep.subr.bf16.mxu0 %v11685_v42 }
 0x256   :  { %10801 = vmatpush3.bf16.msra.mxu1 %v11684_v40  ;;  %v10478_v47 = vpop.f32.mrb[44].mxu0  ;;  %v11720_v40 = vld [vmem:[%s14580_s1 + $0x13a8] sm:$0xff]  }
 0x257   :  { %v10479_v49 = vpop.f32.mrb[45].mxu0  ;;  %10802 = vmatprep.subr.bf16.mxu1 %v11686_v43 }
 0x258   :  { %v10500_v51 = vpop.f32.mrb[44].mxu1  ;;  %v10480_v52 = vadd.f32 %v10479_v49, %v10478_v47  ;;  %v10481_v53 = vpop.f32.mrb[46].mxu0  ;;  %10781 = vmatpush3.bf16.msra.mxu0 %v11687_v44  ;;  %v11724_v49 = vld [vmem:[%s14580_s1 + $0x13b0] sm:$0xff]  }
 0x259   :  { %v10501_v54 = vpop.f32.mrb[45].mxu1  ;;  %v10482_v55 = vpop.f32.mrb[47].mxu0  ;;  %10782 = vmatprep.subr.bf16.mxu0 %v11689_v46  ;;  %v11723_v46 = vld [vmem:[%s14580_s1 + $0x1330] sm:$0xff]   ;;  %v11725_v53 = vld [vmem:[%s14580_s1 + $0x1378] sm:$0xff]  }
 0x25a   :  { %v8076_v58 = vadd.f32 %v10480_v52, %v13822_v17  ;;  %v10502_v59 = vadd.f32 %v10501_v54, %v10500_v51  ;;  %v10503_v60 = vpop.f32.mrb[46].mxu1  ;;  %10803 = vmatpush3.bf16.msra.mxu1 %v11688_v45  ;;  %v2134_v17 = vrot.slane %v2106_v12, %v12043_v41  ;;  %v11722_v45 = vld [vmem:[%s14580_s1 + $0x13f0] sm:$0xff]   ;;  %v11726_v55 = vld [vmem:[%s14580_s1 + $0x13f8] sm:$0xff]  }
 0x25b   :  { %v10504_v62 = vpop.f32.mrb[47].mxu1  ;;  %10804 = vmatprep.subr.bf16.mxu1 %v11690_v48  ;;  %v11730_v60 = vld [vmem:[%s14580_s1 + $0x1440] sm:$0xff]   ;;  %v11745_v12 = vld [vmem:[%s14580_s1 + $0x1498] sm:$0xff]  }
 0x25c   :  { %v13923_v0 = vadd.f32 %v10502_v59, %v8076_v58  ;;  %10783 = vmatpush3.bf16.msra.mxu0 %v11691_v50  ;;  %v2138_v20 = vcombine.high %v2134_v17, %v2134_v17  ;;  %v11728_v58 = vld [vmem:[%s14580_s1 + $0x13b8] sm:$0xff]   ;;  %v2120_v59 = vrot.slane %v13940_v9, %v12043_v41  ;;  %v11732_v62 = vld [vmem:[%s14580_s1 + $0x1400] sm:$0xff]  }
 0x25d   :  { %10784 = vmatprep.subr.bf16.mxu0 %v11693_v57  ;;  %v11727_v57 = vld [vmem:[%s14580_s1 + $0x1338] sm:$0xff]  }
 0x25e   :  { %10805 = vmatpush3.bf16.msra.mxu1 %v11692_v56  ;;  %v11742_v9 = vld [vmem:[%s14580_s1 + $0x1458] sm:$0xff]  }
 0x25f   :  { %10806 = vmatprep.subr.bf16.mxu1 %v11694_v61  ;;  %v11731_v61 = vld [vmem:[%s14580_s1 + $0x14c0] sm:$0xff]  }
 0x260   :  { %10785 = vmatpush3.bf16.msra.mxu0 %v11695_v63  ;;  %v11733_v63 = vld [vmem:[%s14580_s1 + $0x1480] sm:$0xff]  }
 0x261   :  { %10814 = vmatprep.subr.bf16.mxu0 %v11697_v3  ;;  %v11736_v3 = vld [vmem:[%s14580_s1 + $0x1408] sm:$0xff]  }
 0x262   :  { %10807 = vmatpush3.bf16.msra.mxu1 %v11696_v5  ;;  %v11738_v5 = vld [vmem:[%s14580_s1 + $0x1450] sm:$0xff]  }
 0x263   :  { %10836 = vmatprep.subr.bf16.mxu1 %v11698_v8  ;;  %8634 = vmatmul.mubr.bf16.vlgmr.msra.gmra.mrb[72].mxu0 %v2113_v7  ;;  %v11740_v7 = vld [vmem:[%s14580_s1 + $0x1410] sm:$0xff]  }
 0x264   :  { %10815 = vmatpush3.bf16.msra.mxu0 %v11699_v11  ;;  %8713 = vmatprep.mubr.bf16.mxu0 %v2134_v17  ;;  %v11741_v8 = vld [vmem:[%s14580_s1 + $0x1490] sm:$0xff]   ;;  %v11744_v11 = vld [vmem:[%s14580_s1 + $0x1418] sm:$0xff]   ;;  %v11750_v17 = vld [vmem:[%s14580_s1 + $0x1468] sm:$0xff]  }
 0x265   :  { %8674 = vmatmul.mubr.bf16.vlgmr.msra.gmra.mrb[72].mxu1 %v2135_v13  ;;  %10816 = vmatprep.subr.bf16.mxu0 %v11701_v14  ;;  %v11746_v13 = vld [vmem:[%s14580_s1 + $0x1460] sm:$0xff]  }
 0x266   :  { %10837 = vmatpush3.bf16.msra.mxu1 %v11700_v16  ;;  %8753 = vmatprep.mubr.bf16.mxu1 %v2138_v20  ;;  %v11747_v14 = vld [vmem:[%s14580_s1 + $0x14e0] sm:$0xff]   ;;  %v11753_v20 = vld [vmem:[%s14580_s1 + $0x14a8] sm:$0xff]  }
 0x267   :  { %10838 = vmatprep.subr.bf16.mxu1 %v11702_v18  ;;  %v11749_v16 = vld [vmem:[%s14580_s1 + $0x14a0] sm:$0xff]   ;;  %v11751_v18 = vld [vmem:[%s14580_s1 + $0x14e8] sm:$0xff]  }
 0x268   :  { %10817 = vmatpush3.bf16.msra.mxu0 %v11703_v19  ;;  %v11752_v19 = vld [vmem:[%s14580_s1 + $0x1428] sm:$0xff]  }
 0x269   :  { %10818 = vmatprep.subr.bf16.mxu0 %v11705_v21 }
 0x26a   :  { %10839 = vmatpush3.bf16.msra.mxu1 %v11704_v22  ;;  %v11754_v22 = vld [vmem:[%s14580_s1 + $0x1470] sm:$0xff]  }
 0x26b   :  { %10840 = vmatprep.subr.bf16.mxu1 %v11706_v23 }
 0x26c   :  { %10819 = vmatpush3.bf16.msra.mxu0 %v11707_v24  ;;  %v11755_v24 = vld [vmem:[%s14580_s1 + $0x14f0] sm:$0xff]  }
 0x26d   :  { %10820 = vmatprep.subr.bf16.mxu0 %v11709_v25 }
 0x26e   :  { %10841 = vmatpush3.bf16.msra.mxu1 %v11708_v26 }
 0x26f   :  { %10842 = vmatprep.subr.bf16.mxu1 %v11710_v27 }
 0x270   :  { %10821 = vmatpush3.bf16.msra.mxu0 %v11711_v28 }
 0x271   :  { %10822 = vmatprep.subr.bf16.mxu0 %v11713_v29 }
 0x272   :  { %10843 = vmatpush3.bf16.msra.mxu1 %v11712_v30  ;;  %v11756_v30 = vld [vmem:[%s14580_s1 + $0x1430] sm:$0xff]  }
 0x273   :  { %10844 = vmatprep.subr.bf16.mxu1 %v11714_v31  ;;  %v11757_v31 = vld [vmem:[%s14580_s1 + $0x14b0] sm:$0xff]  }
 0x274   :  { %10823 = vmatpush3.bf16.msra.mxu0 %v11715_v32 }
 0x275   :  { %10824 = vmatprep.subr.bf16.mxu0 %v11717_v33 }
 0x276   :  { %v10522_v37 = vpop.f32.mrb[48].mxu0  ;;  %10845 = vmatpush3.bf16.msra.mxu1 %v11716_v34 }
 0x277   :  { %v10523_v39 = vpop.f32.mrb[49].mxu0  ;;  %10846 = vmatprep.subr.bf16.mxu1 %v11718_v35  ;;  %v11758_v35 = vld [vmem:[%s14580_s1 + $0x1478] sm:$0xff]  }
 0x278   :  { %v10544_v42 = vpop.f32.mrb[48].mxu1  ;;  %v10524_v43 = vadd.f32 %v10523_v39, %v10522_v37  ;;  %v10525_v44 = vpop.f32.mrb[50].mxu0  ;;  %10825 = vmatpush3.bf16.msra.mxu0 %v11719_v36  ;;  %v11759_v37 = vld [vmem:[%s14580_s1 + $0x14f8] sm:$0xff]  }
 0x279   :  { %v10545_v47 = vpop.f32.mrb[49].mxu1  ;;  %v10526_v48 = vpop.f32.mrb[51].mxu0  ;;  %10826 = vmatprep.subr.bf16.mxu0 %v11721_v38  ;;  %v11760_v39 = vld [vmem:[%s14580_s1 + $0x1438] sm:$0xff]  }
 0x27a   :  { %v8156_v50 = vadd.f32 %v10524_v43, %v13923_v0  ;;  %v10546_v51 = vadd.f32 %v10545_v47, %v10544_v42  ;;  %v10547_v52 = vpop.f32.mrb[50].mxu1  ;;  %10847 = vmatpush3.bf16.msra.mxu1 %v11720_v40  ;;  %v2136_v0 = vcombine.high %v2120_v59, %v2120_v59  ;;  %v26_v40 = vld [vmem:[%s14579_s0 + $0x50] sm:$0xff]  ;;  %v11762_v43 = vld [vmem:[%s14580_s1 + $0x1540] sm:$0xff]  }
 0x27b   :  { %v10548_v54 = vpop.f32.mrb[51].mxu1  ;;  %10848 = vmatprep.subr.bf16.mxu1 %v11722_v45  ;;  %v2146_v42 = vrot.slane %v26_v40, %v12043_v41  ;;  %v2139_v44 = vcombine.high %v26_v40, %v26_v40  ;;  %v11761_v45 = vld [vmem:[%s14580_s1 + $0x14b8] sm:$0xff]   ;;  %v11763_v48 = vld [vmem:[%s14580_s1 + $0x15c0] sm:$0xff]   ;;  %v11799_v40 = vld [vmem:[%s14580_s1 + $0x1648] sm:$0xff]  }
 0x27c   :  { %v14031_v56 = vadd.f32 %v10546_v51, %v8156_v50  ;;  %10827 = vmatpush3.bf16.msra.mxu0 %v11723_v46  ;;  %v11764_v50 = vld [vmem:[%s14580_s1 + $0x1500] sm:$0xff]  }
 0x27d   :  { %10828 = vmatprep.subr.bf16.mxu0 %v11725_v53  ;;  %v2154_v46 = vcombine.high %v2146_v42, %v2146_v42  ;;  %v2162_v47 = vrot.slane %v2146_v42, %v12043_v41  ;;  %v11765_v52 = vld [vmem:[%s14580_s1 + $0x1580] sm:$0xff]   ;;  %v11800_v42 = vld [vmem:[%s14580_s1 + $0x16c8] sm:$0xff]  }
 0x27e   :  { %10849 = vmatpush3.bf16.msra.mxu1 %v11724_v49  ;;  %v14152_v49 = vrot.slane %v2139_v44, %v12043_v41  ;;  %v11802_v44 = vld [vmem:[%s14580_s1 + $0x1688] sm:$0xff]  }
 0x27f   :  { %10850 = vmatprep.subr.bf16.mxu1 %v11726_v55  ;;  %v2176_v51 = vrot.slane %v2154_v46, %v12043_v41  ;;  %v2184_v54 = vcombine.high %v2162_v47, %v2162_v47  ;;  %v11766_v55 = vld [vmem:[%s14580_s1 + $0x1548] sm:$0xff]   ;;  %v11804_v46 = vld [vmem:[%s14580_s1 + $0x16d0] sm:$0xff]  }
 0x280   :  { %10829 = vmatpush3.bf16.msra.mxu0 %v11727_v57  ;;  %v2155_v53 = vcombine.high %v14152_v49, %v14152_v49  ;;  %v11767_v57 = vld [vmem:[%s14580_s1 + $0x15c8] sm:$0xff]  }
 0x281   :  { %10858 = vmatprep.subr.bf16.mxu0 %v11730_v60  ;;  %v11769_v60 = vld [vmem:[%s14580_s1 + $0x1588] sm:$0xff]  }
 0x282   :  { %10851 = vmatpush3.bf16.msra.mxu1 %v11728_v58  ;;  %v2183_v58 = vrot.slane %v2155_v53, %v12043_v41  ;;  %v11811_v53 = vld [vmem:[%s14580_s1 + $0x1660] sm:$0xff]  }
 0x283   :  { %8714 = vmatmul.mubr.bf16.vlgmr.msra.gmra.mrb[76].mxu0 %v2120_v59  ;;  %10880 = vmatprep.subr.bf16.mxu1 %v11731_v61  ;;  %v11768_v59 = vld [vmem:[%s14580_s1 + $0x1508] sm:$0xff]  }
 0x284   :  { %10859 = vmatpush3.bf16.msra.mxu0 %v11732_v62  ;;  %8793 = vmatprep.mubr.bf16.mxu0 %v2176_v51  ;;  %v2187_v61 = vcombine.high %v2183_v58, %v2183_v58  ;;  %v11770_v62 = vld [vmem:[%s14580_s1 + $0x1550] sm:$0xff]  }
 0x285   :  { %8754 = vmatmul.mubr.bf16.vlgmr.msra.gmra.mrb[76].mxu1 %v2136_v0  ;;  %10860 = vmatprep.subr.bf16.mxu0 %v11734_v1  ;;  %v11772_v0 = vld [vmem:[%s14580_s1 + $0x1510] sm:$0xff]  }
 0x286   :  { %10881 = vmatpush3.bf16.msra.mxu1 %v11733_v63  ;;  %v11771_v63 = vld [vmem:[%s14580_s1 + $0x15d0] sm:$0xff]  }
 0x287   :  { %10882 = vmatprep.subr.bf16.mxu1 %v11735_v2  ;;  %v11773_v1 = vld [vmem:[%s14580_s1 + $0x1590] sm:$0xff]   ;;  %v11774_v2 = vld [vmem:[%s14580_s1 + $0x1558] sm:$0xff]  }
 0x288   :  { %10861 = vmatpush3.bf16.msra.mxu0 %v11736_v3  ;;  %v11775_v3 = vld [vmem:[%s14580_s1 + $0x15d8] sm:$0xff]  }
 0x289   :  { %10862 = vmatprep.subr.bf16.mxu0 %v11738_v5  ;;  %v11777_v5 = vld [vmem:[%s14580_s1 + $0x1598] sm:$0xff]  }
 0x28a   :  { %10883 = vmatpush3.bf16.msra.mxu1 %v11737_v4  ;;  %v11776_v4 = vld [vmem:[%s14580_s1 + $0x1518] sm:$0xff]  }
 0x28b   :  { %10884 = vmatprep.subr.bf16.mxu1 %v11739_v6  ;;  %v11778_v6 = vld [vmem:[%s14580_s1 + $0x1560] sm:$0xff]  }
 0x28c   :  { %10863 = vmatpush3.bf16.msra.mxu0 %v11740_v7  ;;  %v11779_v7 = vld [vmem:[%s14580_s1 + $0x15e0] sm:$0xff]  }
 0x28d   :  { %10864 = vmatprep.subr.bf16.mxu0 %v11742_v9  ;;  %v11781_v9 = vld [vmem:[%s14580_s1 + $0x15a0] sm:$0xff]  }
 0x28e   :  { %10885 = vmatpush3.bf16.msra.mxu1 %v11741_v8  ;;  %v11780_v8 = vld [vmem:[%s14580_s1 + $0x1520] sm:$0xff]  }
 0x28f   :  { %10886 = vmatprep.subr.bf16.mxu1 %v11743_v10  ;;  %v11782_v10 = vld [vmem:[%s14580_s1 + $0x1568] sm:$0xff]  }
 0x290   :  { %10865 = vmatpush3.bf16.msra.mxu0 %v11744_v11  ;;  %v11783_v11 = vld [vmem:[%s14580_s1 + $0x15e8] sm:$0xff]  }
 0x291   :  { %10866 = vmatprep.subr.bf16.mxu0 %v11746_v13 }
 0x292   :  { %10887 = vmatpush3.bf16.msra.mxu1 %v11745_v12  ;;  %v11784_v12 = vld [vmem:[%s14580_s1 + $0x1528] sm:$0xff]  }
 0x293   :  { %10888 = vmatprep.subr.bf16.mxu1 %v11747_v14  ;;  %v11785_v14 = vld [vmem:[%s14580_s1 + $0x15a8] sm:$0xff]  }
 0x294   :  { %10867 = vmatpush3.bf16.msra.mxu0 %v11748_v15 }
 0x295   :  { %10868 = vmatprep.subr.bf16.mxu0 %v11750_v17 }
 0x296   :  { %v10566_v21 = vpop.f32.mrb[52].mxu0  ;;  %10889 = vmatpush3.bf16.msra.mxu1 %v11749_v16  ;;  %v11786_v16 = vld [vmem:[%s14580_s1 + $0x1570] sm:$0xff]  }
 0x297   :  { %v10567_v23 = vpop.f32.mrb[53].mxu0  ;;  %10890 = vmatprep.subr.bf16.mxu1 %v11751_v18 }
 0x298   :  { %v10588_v25 = vpop.f32.mrb[52].mxu1  ;;  %v10568_v26 = vadd.f32 %v10567_v23, %v10566_v21  ;;  %v10569_v27 = vpop.f32.mrb[54].mxu0  ;;  %10869 = vmatpush3.bf16.msra.mxu0 %v11752_v19  ;;  %v11788_v21 = vld [vmem:[%s14580_s1 + $0x1530] sm:$0xff]  }
 0x299   :  { %v10589_v28 = vpop.f32.mrb[53].mxu1  ;;  %v10570_v29 = vpop.f32.mrb[55].mxu0  ;;  %10870 = vmatprep.subr.bf16.mxu0 %v11754_v22  ;;  %v11789_v27 = vld [vmem:[%s14580_s1 + $0x15b0] sm:$0xff]  }
 0x29a   :  { %v8236_v32 = vadd.f32 %v10568_v26, %v14031_v56  ;;  %v10590_v33 = vadd.f32 %v10589_v28, %v10588_v25  ;;  %v10591_v34 = vpop.f32.mrb[54].mxu1  ;;  %10891 = vmatpush3.bf16.msra.mxu1 %v11753_v20  ;;  %v2186_v56 = vcombine.high %v2176_v51, %v2176_v51  ;;  %v11787_v20 = vld [vmem:[%s14580_s1 + $0x15f0] sm:$0xff]   ;;  %v11790_v29 = vld [vmem:[%s14580_s1 + $0x1578] sm:$0xff]  }
 0x29b   :  { %v10592_v36 = vpop.f32.mrb[55].mxu1  ;;  %10892 = vmatprep.subr.bf16.mxu1 %v11755_v24  ;;  %v2169_v34 = vrot.slane %v14152_v49, %v12043_v41  ;;  %v11807_v49 = vld [vmem:[%s14580_s1 + $0x1658] sm:$0xff]  }
 0x29c   :  { %v14132_v38 = vadd.f32 %v10590_v33, %v8236_v32  ;;  %10871 = vmatpush3.bf16.msra.mxu0 %v11756_v30  ;;  %8833 = vmatprep.mubr.bf16.mxu1 %v2186_v56  ;;  %v11792_v32 = vld [vmem:[%s14580_s1 + $0x1538] sm:$0xff]   ;;  %v11796_v36 = vld [vmem:[%s14580_s1 + $0x16c0] sm:$0xff]  }
 0x29d   :  { %10872 = vmatprep.subr.bf16.mxu0 %v11758_v35  ;;  %v11793_v33 = vld [vmem:[%s14580_s1 + $0x15b8] sm:$0xff]   ;;  %v11795_v35 = vld [vmem:[%s14580_s1 + $0x1640] sm:$0xff]  }
 0x29e   :  { %10893 = vmatpush3.bf16.msra.mxu1 %v11757_v31  ;;  %v11791_v31 = vld [vmem:[%s14580_s1 + $0x15f8] sm:$0xff]   ;;  %v11814_v56 = vld [vmem:[%s14580_s1 + $0x16a0] sm:$0xff]  }
 0x29f   :  { %10894 = vmatprep.subr.bf16.mxu1 %v11759_v37  ;;  %v11797_v37 = vld [vmem:[%s14580_s1 + $0x1600] sm:$0xff]   ;;  %v11809_v51 = vld [vmem:[%s14580_s1 + $0x1618] sm:$0xff]  }
 0x2a0   :  { %10873 = vmatpush3.bf16.msra.mxu0 %v11760_v39  ;;  %v2185_v39 = vcombine.high %v2169_v34, %v2169_v34 }
 0x2a1   :  { %10902 = vmatprep.subr.bf16.mxu0 %v11762_v43  ;;  %v11801_v43 = vld [vmem:[%s14580_s1 + $0x1608] sm:$0xff]  }
 0x2a2   :  { %10895 = vmatpush3.bf16.msra.mxu1 %v11761_v45  ;;  %v11803_v45 = vld [vmem:[%s14580_s1 + $0x1650] sm:$0xff]  }
 0x2a3   :  { %10924 = vmatprep.subr.bf16.mxu1 %v11763_v48  ;;  %8794 = vmatmul.mubr.bf16.vlgmr.msra.gmra.mrb[80].mxu0 %v2162_v47  ;;  %v11805_v47 = vld [vmem:[%s14580_s1 + $0x1610] sm:$0xff]  }
 0x2a4   :  { %10903 = vmatpush3.bf16.msra.mxu0 %v11764_v50  ;;  %8873 = vmatprep.mubr.bf16.mxu0 %v2183_v58  ;;  %v11806_v48 = vld [vmem:[%s14580_s1 + $0x1690] sm:$0xff]   ;;  %v11808_v50 = vld [vmem:[%s14580_s1 + $0x16d8] sm:$0xff]   ;;  %v11816_v58 = vld [vmem:[%s14580_s1 + $0x16e8] sm:$0xff]  }
 0x2a5   :  { %8834 = vmatmul.mubr.bf16.vlgmr.msra.gmra.mrb[80].mxu1 %v2184_v54  ;;  %10904 = vmatprep.subr.bf16.mxu0 %v11766_v55  ;;  %v11812_v54 = vld [vmem:[%s14580_s1 + $0x16e0] sm:$0xff]  }
 0x2a6   :  { %10925 = vmatpush3.bf16.msra.mxu1 %v11765_v52  ;;  %8913 = vmatprep.mubr.bf16.mxu1 %v2187_v61  ;;  %v11810_v52 = vld [vmem:[%s14580_s1 + $0x1698] sm:$0xff]   ;;  %v11813_v55 = vld [vmem:[%s14580_s1 + $0x1620] sm:$0xff]   ;;  %v11818_v61 = vld [vmem:[%s14580_s1 + $0x16a8] sm:$0xff]  }
 0x2a7   :  { %10926 = vmatprep.subr.bf16.mxu1 %v11767_v57  ;;  %v11815_v57 = vld [vmem:[%s14580_s1 + $0x1668] sm:$0xff]  }
 0x2a8   :  { %10905 = vmatpush3.bf16.msra.mxu0 %v11768_v59  ;;  %v11817_v59 = vld [vmem:[%s14580_s1 + $0x1628] sm:$0xff]  }
 0x2a9   :  { %10906 = vmatprep.subr.bf16.mxu0 %v11770_v62 }
 0x2aa   :  { %10927 = vmatpush3.bf16.msra.mxu1 %v11769_v60 }
 0x2ab   :  { %10928 = vmatprep.subr.bf16.mxu1 %v11771_v63  ;;  %v11819_v63 = vld [vmem:[%s14580_s1 + $0x1670] sm:$0xff]  }
 0x2ac   :  { %10907 = vmatpush3.bf16.msra.mxu0 %v11772_v0 }
 0x2ad   :  { %10908 = vmatprep.subr.bf16.mxu0 %v11774_v2 }
 0x2ae   :  { %10929 = vmatpush3.bf16.msra.mxu1 %v11773_v1 }
 0x2af   :  { %10930 = vmatprep.subr.bf16.mxu1 %v11775_v3 }
 0x2b0   :  { %10909 = vmatpush3.bf16.msra.mxu0 %v11776_v4 }
 0x2b1   :  { %10910 = vmatprep.subr.bf16.mxu0 %v11778_v6  ;;  %v11821_v6 = vld [vmem:[%s14580_s1 + $0x1630] sm:$0xff]  }
 0x2b2   :  { %10931 = vmatpush3.bf16.msra.mxu1 %v11777_v5  ;;  %v11820_v5 = vld [vmem:[%s14580_s1 + $0x16f0] sm:$0xff]  }
 0x2b3   :  { %10932 = vmatprep.subr.bf16.mxu1 %v11779_v7 }
 0x2b4   :  { %10911 = vmatpush3.bf16.msra.mxu0 %v11780_v8 }
 0x2b5   :  { %10912 = vmatprep.subr.bf16.mxu0 %v11782_v10  ;;  %v11822_v10 = vld [vmem:[%s14580_s1 + $0x16b0] sm:$0xff]  }
 0x2b6   :  { %v10610_v13 = vpop.f32.mrb[56].mxu0  ;;  %10933 = vmatpush3.bf16.msra.mxu1 %v11781_v9 }
 0x2b7   :  { %v10611_v15 = vpop.f32.mrb[57].mxu0  ;;  %10934 = vmatprep.subr.bf16.mxu1 %v11783_v11 }
 0x2b8   :  { %v10632_v17 = vpop.f32.mrb[56].mxu1  ;;  %v10612_v18 = vadd.f32 %v10611_v15, %v10610_v13  ;;  %v10613_v19 = vpop.f32.mrb[58].mxu0  ;;  %10913 = vmatpush3.bf16.msra.mxu0 %v11784_v12  ;;  %v11823_v12 = vld [vmem:[%s14580_s1 + $0x1678] sm:$0xff]  }
 0x2b9   :  { %v10633_v22 = vpop.f32.mrb[57].mxu1  ;;  %v10614_v23 = vpop.f32.mrb[59].mxu0  ;;  %10914 = vmatprep.subr.bf16.mxu0 %v11786_v16  ;;  %v11825_v15 = vld [vmem:[%s14580_s1 + $0x1638] sm:$0xff]  }
 0x2ba   :  { %v8316_v24 = vadd.f32 %v10612_v18, %v14132_v38  ;;  %v10634_v25 = vadd.f32 %v10633_v22, %v10632_v17  ;;  %v10635_v26 = vpop.f32.mrb[58].mxu1  ;;  %10935 = vmatpush3.bf16.msra.mxu1 %v11785_v14  ;;  %v11798_v38 = vld [vmem:[%s14580_s1 + $0x1680] sm:$0xff]   ;;  %v11824_v14 = vld [vmem:[%s14580_s1 + $0x16f8] sm:$0xff]  }
 0x2bb   :  { %v10636_v28 = vpop.f32.mrb[59].mxu1  ;;  %10936 = vmatprep.subr.bf16.mxu1 %v11787_v20  ;;  %v27_v16 = vld [vmem:[%s14579_s0 + $0x58] sm:$0xff]  ;;  %v11827_v18 = vld [vmem:[%s14580_s1 + $0x1740] sm:$0xff]  }
 0x2bc   :  { %v14240_v30 = vadd.f32 %v10634_v25, %v8316_v24  ;;  %10915 = vmatpush3.bf16.msra.mxu0 %v11788_v21  ;;  %v2195_v17 = vrot.slane %v27_v16, %v12043_v41  ;;  %v2188_v19 = vcombine.high %v27_v16, %v27_v16  ;;  %v11826_v20 = vld [vmem:[%s14580_s1 + $0x16b8] sm:$0xff]   ;;  %v11828_v23 = vld [vmem:[%s14580_s1 + $0x17c0] sm:$0xff]   ;;  %v11864_v16 = vld [vmem:[%s14580_s1 + $0x1848] sm:$0xff]  }
 0x2bd   :  { %10916 = vmatprep.subr.bf16.mxu0 %v11790_v29  ;;  %v11829_v25 = vld [vmem:[%s14580_s1 + $0x1700] sm:$0xff]  }
 0x2be   :  { %10937 = vmatpush3.bf16.msra.mxu1 %v11789_v27  ;;  %v2203_v21 = vcombine.high %v2195_v17, %v2195_v17  ;;  %v2211_v22 = vrot.slane %v2195_v17, %v12043_v41  ;;  %v14364_v24 = vrot.slane %v2188_v19, %v12043_v41  ;;  %v11830_v27 = vld [vmem:[%s14580_s1 + $0x1780] sm:$0xff]   ;;  %v11865_v17 = vld [vmem:[%s14580_s1 + $0x18c8] sm:$0xff]  }
 0x2bf   :  { %10938 = vmatprep.subr.bf16.mxu1 %v11791_v31  ;;  %v11867_v19 = vld [vmem:[%s14580_s1 + $0x1888] sm:$0xff]  }
 0x2c0   :  { %10917 = vmatpush3.bf16.msra.mxu0 %v11792_v32  ;;  %v2225_v26 = vrot.slane %v2203_v21, %v12043_v41  ;;  %v2204_v28 = vcombine.high %v14364_v24, %v14364_v24  ;;  %v2233_v29 = vcombine.high %v2211_v22, %v2211_v22  ;;  %v11832_v32 = vld [vmem:[%s14580_s1 + $0x17c8] sm:$0xff]   ;;  %v11869_v21 = vld [vmem:[%s14580_s1 + $0x18d0] sm:$0xff]  }
 0x2c1   :  { %10946 = vmatprep.subr.bf16.mxu0 %v11795_v35  ;;  %v11834_v35 = vld [vmem:[%s14580_s1 + $0x1788] sm:$0xff]  }
 0x2c2   :  { %10939 = vmatpush3.bf16.msra.mxu1 %v11793_v33  ;;  %v2235_v31 = vcombine.high %v2225_v26, %v2225_v26  ;;  %v2232_v33 = vrot.slane %v2204_v28, %v12043_v41  ;;  %v11876_v28 = vld [vmem:[%s14580_s1 + $0x1860] sm:$0xff]  }
 0x2c3   :  { %8874 = vmatmul.mubr.bf16.vlgmr.msra.gmra.mrb[84].mxu0 %v2169_v34  ;;  %10968 = vmatprep.subr.bf16.mxu1 %v11796_v36  ;;  %v11833_v34 = vld [vmem:[%s14580_s1 + $0x1708] sm:$0xff]  }
 0x2c4   :  { %10947 = vmatpush3.bf16.msra.mxu0 %v11797_v37  ;;  %8953 = vmatprep.mubr.bf16.mxu0 %v2225_v26  ;;  %v2236_v36 = vcombine.high %v2232_v33, %v2232_v33  ;;  %v11835_v37 = vld [vmem:[%s14580_s1 + $0x1750] sm:$0xff]   ;;  %v11874_v26 = vld [vmem:[%s14580_s1 + $0x1818] sm:$0xff]  }
 0x2c5   :  { %8914 = vmatmul.mubr.bf16.vlgmr.msra.gmra.mrb[84].mxu1 %v2185_v39  ;;  %10948 = vmatprep.subr.bf16.mxu0 %v11799_v40  ;;  %v11837_v39 = vld [vmem:[%s14580_s1 + $0x1710] sm:$0xff]  }
 0x2c6   :  { %10969 = vmatpush3.bf16.msra.mxu1 %v11798_v38  ;;  %8993 = vmatprep.mubr.bf16.mxu1 %v2235_v31  ;;  %v11836_v38 = vld [vmem:[%s14580_s1 + $0x17d0] sm:$0xff]   ;;  %v11879_v31 = vld [vmem:[%s14580_s1 + $0x18a0] sm:$0xff]  }
 0x2c7   :  { %10970 = vmatprep.subr.bf16.mxu1 %v11800_v42  ;;  %v11838_v40 = vld [vmem:[%s14580_s1 + $0x1790] sm:$0xff]   ;;  %v11839_v42 = vld [vmem:[%s14580_s1 + $0x1758] sm:$0xff]  }
 0x2c8   :  { %10949 = vmatpush3.bf16.msra.mxu0 %v11801_v43  ;;  %v11840_v43 = vld [vmem:[%s14580_s1 + $0x17d8] sm:$0xff]  }
 0x2c9   :  { %10950 = vmatprep.subr.bf16.mxu0 %v11803_v45  ;;  %v11842_v45 = vld [vmem:[%s14580_s1 + $0x1798] sm:$0xff]  }
 0x2ca   :  { %10971 = vmatpush3.bf16.msra.mxu1 %v11802_v44  ;;  %v11841_v44 = vld [vmem:[%s14580_s1 + $0x1718] sm:$0xff]  }
 0x2cb   :  { %10972 = vmatprep.subr.bf16.mxu1 %v11804_v46  ;;  %v11843_v46 = vld [vmem:[%s14580_s1 + $0x1760] sm:$0xff]  }
 0x2cc   :  { %10951 = vmatpush3.bf16.msra.mxu0 %v11805_v47  ;;  %v11844_v47 = vld [vmem:[%s14580_s1 + $0x17e0] sm:$0xff]  }
 0x2cd   :  { %10952 = vmatprep.subr.bf16.mxu0 %v11807_v49  ;;  %v11846_v49 = vld [vmem:[%s14580_s1 + $0x17a0] sm:$0xff]  }
 0x2ce   :  { %10973 = vmatpush3.bf16.msra.mxu1 %v11806_v48  ;;  %v11845_v48 = vld [vmem:[%s14580_s1 + $0x1720] sm:$0xff]  }
 0x2cf   :  { %10974 = vmatprep.subr.bf16.mxu1 %v11808_v50  ;;  %v11847_v50 = vld [vmem:[%s14580_s1 + $0x1768] sm:$0xff]  }
 0x2d0   :  { %10953 = vmatpush3.bf16.msra.mxu0 %v11809_v51  ;;  %v11848_v51 = vld [vmem:[%s14580_s1 + $0x17e8] sm:$0xff]  }
 0x2d1   :  { %10954 = vmatprep.subr.bf16.mxu0 %v11811_v53  ;;  %v11849_v53 = vld [vmem:[%s14580_s1 + $0x1728] sm:$0xff]  }
 0x2d2   :  { %10975 = vmatpush3.bf16.msra.mxu1 %v11810_v52 }
 0x2d3   :  { %10976 = vmatprep.subr.bf16.mxu1 %v11812_v54 }
 0x2d4   :  { %10955 = vmatpush3.bf16.msra.mxu0 %v11813_v55  ;;  %v11850_v55 = vld [vmem:[%s14580_s1 + $0x17a8] sm:$0xff]  }
 0x2d5   :  { %10956 = vmatprep.subr.bf16.mxu0 %v11815_v57 }
 0x2d6   :  { %v10654_v60 = vpop.f32.mrb[60].mxu0  ;;  %10977 = vmatpush3.bf16.msra.mxu1 %v11814_v56 }
 0x2d7   :  { %v10655_v62 = vpop.f32.mrb[61].mxu0  ;;  %10978 = vmatprep.subr.bf16.mxu1 %v11816_v58 }
 0x2d8   :  { %v10676_v0 = vpop.f32.mrb[60].mxu1  ;;  %v10656_v1 = vadd.f32 %v10655_v62, %v10654_v60  ;;  %v10657_v2 = vpop.f32.mrb[62].mxu0  ;;  %10957 = vmatpush3.bf16.msra.mxu0 %v11817_v59  ;;  %v11851_v59 = vld [vmem:[%s14580_s1 + $0x1770] sm:$0xff]  }
 0x2d9   :  { %v10677_v3 = vpop.f32.mrb[61].mxu1  ;;  %v10658_v4 = vpop.f32.mrb[63].mxu0  ;;  %10958 = vmatprep.subr.bf16.mxu0 %v11819_v63  ;;  %v11852_v60 = vld [vmem:[%s14580_s1 + $0x17f0] sm:$0xff]  }
 0x2da   :  { %v8396_v7 = vadd.f32 %v10656_v1, %v14240_v30  ;;  %v10678_v8 = vadd.f32 %v10677_v3, %v10676_v0  ;;  %v10679_v9 = vpop.f32.mrb[62].mxu1  ;;  %10979 = vmatpush3.bf16.msra.mxu1 %v11818_v61  ;;  %v11831_v30 = vld [vmem:[%s14580_s1 + $0x1748] sm:$0xff]   ;;  %v11853_v2 = vld [vmem:[%s14580_s1 + $0x1730] sm:$0xff]  }
 0x2db   :  { %v10680_v11 = vpop.f32.mrb[63].mxu1  ;;  %10980 = vmatprep.subr.bf16.mxu1 %v11820_v5  ;;  %v11854_v4 = vld [vmem:[%s14580_s1 + $0x17b0] sm:$0xff]   ;;  %v11858_v9 = vld [vmem:[%s14580_s1 + $0x17b8] sm:$0xff]  }
 0x2dc   :  { %v14341_v13 = vadd.f32 %v10678_v8, %v8396_v7  ;;  %10959 = vmatpush3.bf16.msra.mxu0 %v11821_v6  ;;  %v11855_v6 = vld [vmem:[%s14580_s1 + $0x1778] sm:$0xff]   ;;  %v11860_v11 = vld [vmem:[%s14580_s1 + $0x1840] sm:$0xff]  }
 0x2dd   :  { %10960 = vmatprep.subr.bf16.mxu0 %v11823_v12  ;;  %v11856_v7 = vld [vmem:[%s14580_s1 + $0x17f8] sm:$0xff]   ;;  %v11861_v12 = vld [vmem:[%s14580_s1 + $0x18c0] sm:$0xff]  }
 0x2de   :  { %10981 = vmatpush3.bf16.msra.mxu1 %v11822_v10  ;;  %v11857_v8 = vld [vmem:[%s14580_s1 + $0x1738] sm:$0xff]   ;;  %v2218_v10 = vrot.slane %v14364_v24, %v12043_v41 }
 0x2df   :  { %10982 = vmatprep.subr.bf16.mxu1 %v11824_v14  ;;  %v11863_v14 = vld [vmem:[%s14580_s1 + $0x1880] sm:$0xff]   ;;  %v11872_v24 = vld [vmem:[%s14580_s1 + $0x1858] sm:$0xff]  }
 0x2e0   :  { %10961 = vmatpush3.bf16.msra.mxu0 %v11825_v15  ;;  %v2234_v15 = vcombine.high %v2218_v10, %v2218_v10 }
 0x2e1   :  { %10990 = vmatprep.subr.bf16.mxu0 %v11827_v18  ;;  %v11866_v18 = vld [vmem:[%s14580_s1 + $0x1808] sm:$0xff]  }
 0x2e2   :  { %10983 = vmatpush3.bf16.msra.mxu1 %v11826_v20  ;;  %v11868_v20 = vld [vmem:[%s14580_s1 + $0x1850] sm:$0xff]  }
 0x2e3   :  { %11012 = vmatprep.subr.bf16.mxu1 %v11828_v23  ;;  %8954 = vmatmul.mubr.bf16.vlgmr.msra.gmra.mrb[88].mxu0 %v2211_v22  ;;  %v11870_v22 = vld [vmem:[%s14580_s1 + $0x1810] sm:$0xff]  }
 0x2e4   :  { %10991 = vmatpush3.bf16.msra.mxu0 %v11829_v25  ;;  %9033 = vmatprep.mubr.bf16.mxu0 %v2232_v33  ;;  %v11871_v23 = vld [vmem:[%s14580_s1 + $0x1890] sm:$0xff]   ;;  %v11873_v25 = vld [vmem:[%s14580_s1 + $0x18d8] sm:$0xff]   ;;  %v11881_v33 = vld [vmem:[%s14580_s1 + $0x18e8] sm:$0xff]  }
 0x2e5   :  { %8994 = vmatmul.mubr.bf16.vlgmr.msra.gmra.mrb[88].mxu1 %v2233_v29  ;;  %10992 = vmatprep.subr.bf16.mxu0 %v11831_v30  ;;  %v11877_v29 = vld [vmem:[%s14580_s1 + $0x18e0] sm:$0xff]  }
 0x2e6   :  { %11013 = vmatpush3.bf16.msra.mxu1 %v11830_v27  ;;  %9073 = vmatprep.mubr.bf16.mxu1 %v2236_v36  ;;  %v11875_v27 = vld [vmem:[%s14580_s1 + $0x1898] sm:$0xff]   ;;  %v11878_v30 = vld [vmem:[%s14580_s1 + $0x1820] sm:$0xff]  }
 0x2e7   :  { %11014 = vmatprep.subr.bf16.mxu1 %v11832_v32  ;;  %v11880_v32 = vld [vmem:[%s14580_s1 + $0x1868] sm:$0xff]  }
 0x2e8   :  { %10993 = vmatpush3.bf16.msra.mxu0 %v11833_v34 }
 0x2e9   :  { %10994 = vmatprep.subr.bf16.mxu0 %v11835_v37  ;;  %v11884_v37 = vld [vmem:[%s14580_s1 + $0x1870] sm:$0xff]  }
 0x2ea   :  { %11015 = vmatpush3.bf16.msra.mxu1 %v11834_v35  ;;  %v11882_v35 = vld [vmem:[%s14580_s1 + $0x1828] sm:$0xff]  }
 0x2eb   :  { %11016 = vmatprep.subr.bf16.mxu1 %v11836_v38 }
 0x2ec   :  { %10995 = vmatpush3.bf16.msra.mxu0 %v11837_v39 }
 0x2ed   :  { %10996 = vmatprep.subr.bf16.mxu0 %v11839_v42 }
 0x2ee   :  { %11017 = vmatpush3.bf16.msra.mxu1 %v11838_v40 }
 0x2ef   :  { %11018 = vmatprep.subr.bf16.mxu1 %v11840_v43  ;;  %v11883_v43 = vld [vmem:[%s14580_s1 + $0x18a8] sm:$0xff]  }
 0x2f0   :  { %10997 = vmatpush3.bf16.msra.mxu0 %v11841_v44 }
 0x2f1   :  { %10998 = vmatprep.subr.bf16.mxu0 %v11843_v46 }
 0x2f2   :  { %11019 = vmatpush3.bf16.msra.mxu1 %v11842_v45  ;;  %v11885_v45 = vld [vmem:[%s14580_s1 + $0x18f0] sm:$0xff]  }
 0x2f3   :  { %11020 = vmatprep.subr.bf16.mxu1 %v11844_v47 }
 0x2f4   :  { %10999 = vmatpush3.bf16.msra.mxu0 %v11845_v48 }
 0x2f5   :  { %11000 = vmatprep.subr.bf16.mxu0 %v11847_v50 }
 0x2f6   :  { %v10698_v52 = vpop.f32.mrb[64].mxu0  ;;  %11021 = vmatpush3.bf16.msra.mxu1 %v11846_v49  ;;  %v11886_v49 = vld [vmem:[%s14580_s1 + $0x1830] sm:$0xff]  }
 0x2f7   :  { %v10699_v54 = vpop.f32.mrb[65].mxu0  ;;  %11022 = vmatprep.subr.bf16.mxu1 %v11848_v51  ;;  %v11888_v51 = vld [vmem:[%s14580_s1 + $0x1878] sm:$0xff]  }
 0x2f8   :  { %v10720_v56 = vpop.f32.mrb[64].mxu1  ;;  %v10700_v57 = vadd.f32 %v10699_v54, %v10698_v52  ;;  %v10701_v58 = vpop.f32.mrb[66].mxu0  ;;  %11001 = vmatpush3.bf16.msra.mxu0 %v11849_v53  ;;  %v11887_v53 = vld [vmem:[%s14580_s1 + $0x18b0] sm:$0xff]   ;;  %v11889_v54 = vld [vmem:[%s14580_s1 + $0x18f8] sm:$0xff]  }
 0x2f9   :  { %v10721_v61 = vpop.f32.mrb[65].mxu1  ;;  %v10702_v62 = vpop.f32.mrb[67].mxu0  ;;  %11002 = vmatprep.subr.bf16.mxu0 %v11851_v59 }
 0x2fa   :  { %v8476_v63 = vadd.f32 %v10700_v57, %v14341_v13  ;;  %v10722_v0 = vadd.f32 %v10721_v61, %v10720_v56  ;;  %v10723_v1 = vpop.f32.mrb[66].mxu1  ;;  %11023 = vmatpush3.bf16.msra.mxu1 %v11850_v55  ;;  %v11862_v13 = vld [vmem:[%s14580_s1 + $0x1800] sm:$0xff]   ;;  %v11890_v55 = vld [vmem:[%s14580_s1 + $0x1838] sm:$0xff]  }
 0x2fb   :  { %v10724_v3 = vpop.f32.mrb[67].mxu1  ;;  %11024 = vmatprep.subr.bf16.mxu1 %v11852_v60  ;;  %v9177_v56 = vld.sshfl [vmem:[%s14579_s0 + $0x60] sm:$0x33 pattern:$0x75316420] }
 0x2fc   :  { %v14449_v5 = vadd.f32 %v10722_v0, %v8476_v63  ;;  %11003 = vmatpush3.bf16.msra.mxu0 %v11853_v2  ;;  %v2244_v57 = vcombine.high %v9177_v56, %v9177_v56  ;;  %v2251_v58 = vrot.slane %v9177_v56, %v12043_v41 }
 0x2fd   :  { %11004 = vmatprep.subr.bf16.mxu0 %v11855_v6 }
 0x2fe   :  { %11025 = vmatpush3.bf16.msra.mxu1 %v11854_v4 }
 0x2ff   :  { %11026 = vmatprep.subr.bf16.mxu1 %v11856_v7 }
 0x300   :  { %11005 = vmatpush3.bf16.msra.mxu0 %v11857_v8 }
 0x301   :  { %11034 = vmatprep.subr.bf16.mxu0 %v11860_v11 }
 0x302   :  { %11027 = vmatpush3.bf16.msra.mxu1 %v11858_v9 }
 0x303   :  { %9034 = vmatmul.mubr.bf16.vlgmr.msra.gmra.mrb[92].mxu0 %v2218_v10  ;;  %11056 = vmatprep.subr.bf16.mxu1 %v11861_v12 }
 0x304   :  { %11035 = vmatpush3.bf16.msra.mxu0 %v11862_v13 }
 0x305   :  { %9074 = vmatmul.mubr.bf16.vlgmr.msra.gmra.mrb[92].mxu1 %v2234_v15  ;;  %11036 = vmatprep.subr.bf16.mxu0 %v11864_v16 }
 0x306   :  { %11057 = vmatpush3.bf16.msra.mxu1 %v11863_v14 }
 0x307   :  { %11058 = vmatprep.subr.bf16.mxu1 %v11865_v17 }
 0x308   :  { %11037 = vmatpush3.bf16.msra.mxu0 %v11866_v18 }
 0x309   :  { %11038 = vmatprep.subr.bf16.mxu0 %v11868_v20 }
 0x30a   :  { %11059 = vmatpush3.bf16.msra.mxu1 %v11867_v19 }
 0x30b   :  { %11060 = vmatprep.subr.bf16.mxu1 %v11869_v21 }
 0x30c   :  { %11039 = vmatpush3.bf16.msra.mxu0 %v11870_v22 }
 0x30d   :  { %11040 = vmatprep.subr.bf16.mxu0 %v11872_v24 }
 0x30e   :  { %11061 = vmatpush3.bf16.msra.mxu1 %v11871_v23 }
 0x30f   :  { %11062 = vmatprep.subr.bf16.mxu1 %v11873_v25 }
 0x310   :  { %11041 = vmatpush3.bf16.msra.mxu0 %v11874_v26 }
 0x311   :  { %11042 = vmatprep.subr.bf16.mxu0 %v11876_v28 }
 0x312   :  { %11063 = vmatpush3.bf16.msra.mxu1 %v11875_v27 }
 0x313   :  { %11064 = vmatprep.subr.bf16.mxu1 %v11877_v29 }
 0x314   :  { %11043 = vmatpush3.bf16.msra.mxu0 %v11878_v30 }
 0x315   :  { %11044 = vmatprep.subr.bf16.mxu0 %v11880_v32 }
 0x316   :  { %v10742_v34 = vpop.f32.mrb[68].mxu0  ;;  %11065 = vmatpush3.bf16.msra.mxu1 %v11879_v31 }
 0x317   :  { %v10743_v36 = vpop.f32.mrb[69].mxu0  ;;  %11066 = vmatprep.subr.bf16.mxu1 %v11881_v33 }
 0x318   :  { %v10764_v38 = vpop.f32.mrb[68].mxu1  ;;  %v10744_v39 = vadd.f32 %v10743_v36, %v10742_v34  ;;  %v10745_v40 = vpop.f32.mrb[70].mxu0  ;;  %11045 = vmatpush3.bf16.msra.mxu0 %v11882_v35 }
 0x319   :  { %v10765_v42 = vpop.f32.mrb[69].mxu1  ;;  %v10746_v44 = vpop.f32.mrb[71].mxu0  ;;  %11046 = vmatprep.subr.bf16.mxu0 %v11884_v37 }
 0x31a   :  { %v8556_v46 = vadd.f32 %v10744_v39, %v14449_v5  ;;  %v10766_v47 = vadd.f32 %v10765_v42, %v10764_v38  ;;  %v10767_v48 = vpop.f32.mrb[70].mxu1  ;;  %11067 = vmatpush3.bf16.msra.mxu1 %v11883_v43 }
 0x31b   :  { %v10768_v50 = vpop.f32.mrb[71].mxu1  ;;  %11068 = vmatprep.subr.bf16.mxu1 %v11885_v45 }
 0x31c   :  { %v8596_v52 = vadd.f32 %v10766_v47, %v8556_v46  ;;  %11047 = vmatpush3.bf16.msra.mxu0 %v11886_v49 }
 0x31d   :  { %11048 = vmatprep.subr.bf16.mxu0 %v11888_v51 }
 0x31e   :  { %8 = vsyncpa [#allocation3], 0  ;;  %11069 = vmatpush3.bf16.msra.mxu1 %v11887_v53  ;;  %v11891_v59 = vld [vmem:[%s14580_s1 + $0x18b8] sm:$0xff]   ;;  %v2258_v60 = vrot.slane %v2244_v57, %v12043_v41  ;;  %v2259_v62 = vcombine.high %v2251_v58, %v2251_v58  ;;  %s11917_s0 = smov [#allocation2]  }
 0x31f   :  { %11070 = vmatprep.subr.bf16.mxu1 %v11889_v54  ;;  %s9168_s1 = sshll.u32 %s11917_s0, 4  ;;  %s9169_s1 = int_to_ptr.vmem [resolvable:$true] %s9168_s1 }
 0x320   :  { %11049 = vmatpush3.bf16.msra.mxu0 %v11890_v55  ;;  %9113 = vmatprep.mubr.bf16.mxu0 %v2258_v60  ;;  %v2260_v61 = vcombine.high %v2258_v60, %v2258_v60  ;;  %s11892_s7 = scalar_lea.vmem %s9169_s1, 32  ;;  %p11897_p1 = scmp.lt.s32.totalorder %s9169_s1, %s9169_s1 }
 0x321   :  { %p11893_p0 = scmp.ne.s32.totalorder %s9169_s1, %s11892_s7  ;;  %p11898_p2 = scmp.lt.s32.totalorder %s11892_s7, %s11892_s7 }
 0x322   :  { %11071 = vmatpush3.bf16.msra.mxu1 %v11891_v59  ;;  %9153 = vmatprep.mubr.bf16.mxu1 %v2260_v61 }
 0x323   :  { %9114 = vmatmul.mubr.bf16.vlgmr.msra.gmra.mrb[96].mxu0 %v2251_v58  ;;  %p11899_p3 = por %p11898_p2, %p11897_p1 }
 0x325   :  { %9154 = vmatmul.mubr.bf16.vlgmr.msra.gmra.mrb[96].mxu1 %v2259_v62  ;;  %p11900_p4 = pnand %p11899_p3, %p11893_p0 }
 0x336   :  { %v10786_v63 = vpop.f32.mrb[72].mxu0 }
 0x337   :  { %v10787_v0 = vpop.f32.mrb[73].mxu0 }
 0x338   :  { %v10808_v1 = vpop.f32.mrb[72].mxu1  ;;  %v10788_v2 = vadd.f32 %v10787_v0, %v10786_v63  ;;  %v10789_v3 = vpop.f32.mrb[74].mxu0 }
 0x339   :  { %v10809_v4 = vpop.f32.mrb[73].mxu1  ;;  %v10790_v5 = vpop.f32.mrb[75].mxu0 }
 0x33a   :  { %v8636_v6 = vadd.f32 %v10788_v2, %v8596_v52  ;;  %v10810_v7 = vadd.f32 %v10809_v4, %v10808_v1  ;;  %v10811_v8 = vpop.f32.mrb[74].mxu1 }
 0x33b   :  { %v10812_v9 = vpop.f32.mrb[75].mxu1 }
 0x33c   :  { %v8676_v41 = vadd.f32 %v10810_v7, %v8636_v6 }
 0x356   :  { %v10830_v10 = vpop.f32.mrb[76].mxu0 }
 0x357   :  { %v10831_v11 = vpop.f32.mrb[77].mxu0 }
 0x358   :  { %v10852_v12 = vpop.f32.mrb[76].mxu1  ;;  %v10832_v13 = vadd.f32 %v10831_v11, %v10830_v10  ;;  %v10833_v14 = vpop.f32.mrb[78].mxu0 }
 0x359   :  { %v10853_v15 = vpop.f32.mrb[77].mxu1  ;;  %v10834_v16 = vpop.f32.mrb[79].mxu0 }
 0x35a   :  { %v8716_v17 = vadd.f32 %v10832_v13, %v8676_v41  ;;  %v10854_v18 = vadd.f32 %v10853_v15, %v10852_v12  ;;  %v10855_v19 = vpop.f32.mrb[78].mxu1 }
 0x35b   :  { %v10856_v20 = vpop.f32.mrb[79].mxu1 }
 0x35c   :  { %v8756_v21 = vadd.f32 %v10854_v18, %v8716_v17 }
 0x376   :  { %v10874_v22 = vpop.f32.mrb[80].mxu0 }
 0x377   :  { %v10875_v23 = vpop.f32.mrb[81].mxu0 }
 0x378   :  { %v10896_v24 = vpop.f32.mrb[80].mxu1  ;;  %v10876_v25 = vadd.f32 %v10875_v23, %v10874_v22  ;;  %v10877_v26 = vpop.f32.mrb[82].mxu0 }
 0x379   :  { %v10897_v27 = vpop.f32.mrb[81].mxu1  ;;  %v10878_v28 = vpop.f32.mrb[83].mxu0 }
 0x37a   :  { %v8796_v29 = vadd.f32 %v10876_v25, %v8756_v21  ;;  %v10898_v30 = vadd.f32 %v10897_v27, %v10896_v24  ;;  %v10899_v31 = vpop.f32.mrb[82].mxu1 }
 0x37b   :  { %v10900_v32 = vpop.f32.mrb[83].mxu1 }
 0x37c   :  { %v8836_v33 = vadd.f32 %v10898_v30, %v8796_v29 }
 0x396   :  { %v10918_v34 = vpop.f32.mrb[84].mxu0 }
 0x397   :  { %v10919_v35 = vpop.f32.mrb[85].mxu0 }
 0x398   :  { %v10940_v36 = vpop.f32.mrb[84].mxu1  ;;  %v10920_v37 = vadd.f32 %v10919_v35, %v10918_v34  ;;  %v10921_v38 = vpop.f32.mrb[86].mxu0 }
 0x399   :  { %v10941_v39 = vpop.f32.mrb[85].mxu1  ;;  %v10922_v40 = vpop.f32.mrb[87].mxu0 }
 0x39a   :  { %v8876_v42 = vadd.f32 %v10920_v37, %v8836_v33  ;;  %v10942_v43 = vadd.f32 %v10941_v39, %v10940_v36  ;;  %v10943_v44 = vpop.f32.mrb[86].mxu1 }
 0x39b   :  { %v10944_v45 = vpop.f32.mrb[87].mxu1 }
 0x39c   :  { %v8916_v46 = vadd.f32 %v10942_v43, %v8876_v42 }
 0x3b6   :  { %v10962_v47 = vpop.f32.mrb[88].mxu0 }
 0x3b7   :  { %v10963_v48 = vpop.f32.mrb[89].mxu0 }
 0x3b8   :  { %v10984_v49 = vpop.f32.mrb[88].mxu1  ;;  %v10964_v50 = vadd.f32 %v10963_v48, %v10962_v47  ;;  %v10965_v51 = vpop.f32.mrb[90].mxu0 }
 0x3b9   :  { %v10985_v52 = vpop.f32.mrb[89].mxu1  ;;  %v10966_v53 = vpop.f32.mrb[91].mxu0 }
 0x3ba   :  { %v8956_v54 = vadd.f32 %v10964_v50, %v8916_v46  ;;  %v10986_v55 = vadd.f32 %v10985_v52, %v10984_v49  ;;  %v10987_v56 = vpop.f32.mrb[90].mxu1 }
 0x3bb   :  { %v10988_v57 = vpop.f32.mrb[91].mxu1 }
 0x3bc   :  { %v8996_v58 = vadd.f32 %v10986_v55, %v8956_v54 }
 0x3d6   :  { %v11006_v59 = vpop.f32.mrb[92].mxu0 }
 0x3d7   :  { %v11007_v60 = vpop.f32.mrb[93].mxu0 }
 0x3d8   :  { %v11028_v61 = vpop.f32.mrb[92].mxu1  ;;  %v11008_v62 = vadd.f32 %v11007_v60, %v11006_v59  ;;  %v11009_v63 = vpop.f32.mrb[94].mxu0 }
 0x3d9   :  { %v11029_v0 = vpop.f32.mrb[93].mxu1  ;;  %v11010_v1 = vpop.f32.mrb[95].mxu0 }
 0x3da   :  { %v9036_v2 = vadd.f32 %v11008_v62, %v8996_v58  ;;  %v11030_v3 = vadd.f32 %v11029_v0, %v11028_v61  ;;  %v11031_v4 = vpop.f32.mrb[94].mxu1 }
 0x3db   :  { %v11032_v5 = vpop.f32.mrb[95].mxu1 }
 0x3dc   :  { %v9076_v6 = vadd.f32 %v11030_v3, %v9036_v2 }
 0x3f6   :  { %v11050_v7 = vpop.f32.mrb[96].mxu0 }
 0x3f7   :  { %v11051_v8 = vpop.f32.mrb[97].mxu0 }
 0x3f8   :  { %v11072_v9 = vpop.f32.mrb[96].mxu1  ;;  %v11052_v41 = vadd.f32 %v11051_v8, %v11050_v7  ;;  %v11053_v10 = vpop.f32.mrb[98].mxu0 }
 0x3f9   :  { %v11073_v11 = vpop.f32.mrb[97].mxu1  ;;  %v11054_v12 = vpop.f32.mrb[99].mxu0 }
 0x3fa   :  { %v9116_v13 = vadd.f32 %v11052_v41, %v9076_v6  ;;  %v11074_v14 = vadd.f32 %v11073_v11, %v11072_v9  ;;  %v11075_v15 = vpop.f32.mrb[98].mxu1 }
 0x3fb   :  { %v11076_v16 = vpop.f32.mrb[99].mxu1 }
 0x3fc   :  { %v9156_v17 = vadd.f32 %v11074_v14, %v9116_v13 }
 0x3fe   :  { %9161 = vst [vmem:[#allocation2] sm:$0x3] %v9156_v17 }
 0x3ff   :  { %11903 = shalt.err (!%p11900_p4)
}
 0x400   :  { %s11904_s10 = scalar_lea.hbm %s14582_s3, 32 }
 0x401   :  { %p11905_p5 = scmp.ne.s32.totalorder %s14582_s3, %s11904_s10  ;;  %p11908_p6 = scmp.lt.u32.totalorder %s11904_s10, %s14582_s3 }
 0x403   :  { %p11910_p7 = pnand %p11908_p6, %p11905_p5 }
 0x405   :  { %11913 = shalt.err (!%p11910_p7)
}
 0x406   :  { %9171 = dma.vmem_to_hbm [thread:$0]  %s9169_s1, 32, %s14582_s3, [#allocation3]  }
 0x407   :  { %11914 = dma.done.wait [#allocation3], 32  }
 0x408   :  { %11915 = vsyncadd [#allocation3], 4294967264 }
 0x409   :  { %9175 = vsyncpa [#allocation3], 1 }

</bundles_post_ra>
